<compile_context>
chip_gen: v5e
topology: v5e:2x2
jax: 0.10.0
libtpu: 0.0.40
codegen_flags: <defaults>
</compile_context>

<pallas_src>
import functools
import math

import jax
import jax.numpy as jnp
from jax import lax
from jax.experimental import pallas as pl
from jax.experimental.pallas import tpu as pltpu


# ----------------------------------------------------------------------------- helpers
def _layer_norm_f32(v, g, b, eps=1e-6):
    """LayerNorm in f32 (biased variance, eps=1e-6 matches LayerNorm(..., eps=1e-06))."""
    mu = jnp.mean(v, axis=-1, keepdims=True)
    var = jnp.mean(jnp.square(v - mu), axis=-1, keepdims=True)
    return (v - mu) * lax.rsqrt(var + eps) * g + b


def extract_patches(img, patch):
    """Conv2d(kernel=stride=patch) == non-overlapping patch extraction + matmul.
    Pure layout plumbing, done in the wrapper."""
    B, C, H, W = img.shape
    gh, gw = H // patch, W // patch
    p = img.reshape(B, C, gh, patch, gw, patch)
    p = p.transpose(0, 2, 4, 1, 3, 5)            # (B, gh, gw, C, ph, pw), row-major grid
    return p.reshape(B, gh * gw, C * patch * patch)


# ----------------------------------------------------------------------------- kernel
def transformer_kernel(patches_ref, w_patch_ref, b_patch_ref, pos_ref,
                       ln1_g_ref, ln1_b_ref, wqkv_ref, bqkv_ref, wo_ref, bo_ref,
                       ln2_g_ref, ln2_b_ref, w1_ref, b1_ref, w2_ref, b2_ref,
                       lnf_g_ref, lnf_b_ref,
                       o_ref, *, num_heads, seq_valid):
    """Full forward for one batch element: embeddings + L encoder blocks + final LN."""
    dt = w_patch_ref.dtype                        # bf16 MXU operand dtype
    S, H = o_ref.shape                            # padded sequence length, hidden
    dh = H // num_heads
    L = wqkv_ref.shape[0]
    scale = 1.0 / math.sqrt(dh)

    # ---- embeddings: cls token / pos emb / pad-row zeroing folded into pos_ref ----
    x = jnp.dot(patches_ref[...], w_patch_ref[...], preferred_element_type=jnp.float32)
    x = x + b_patch_ref[...] + pos_ref[...]       # (S, H) f32 residual stream
    # TODO(synk): Dropout(dropout_rate) after the embeddings is identity in eval mode.

    # additive softmax bias that masks padded key positions (hoisted out of layer loop)
    kpos = lax.broadcasted_iota(jnp.int32, (S, S), 1)
    mask_bias = jnp.where(kpos < seq_valid, jnp.float32(0.0), jnp.float32(-1e30))

    for l in range(L):                            # static unroll; weights VMEM-resident
        # ---------------- attention ----------------
        h1 = _layer_norm_f32(x, ln1_g_ref[l], ln1_b_ref[l]).astype(dt)
        # fused QKV: one (S,H) @ (H,3H) MXU matmul, f32 accumulate, f32 bias
        qkv = jnp.dot(h1, wqkv_ref[l], preferred_element_type=jnp.float32) + bqkv_ref[l]
        qh = jnp.stack([qkv[:, h * dh:(h + 1) * dh] for h in range(num_heads)], 0).astype(dt)
        kh = jnp.stack([qkv[:, H + h * dh:H + (h + 1) * dh] for h in range(num_heads)], 0).astype(dt)
        vh = jnp.stack([qkv[:, 2 * H + h * dh:2 * H + (h + 1) * dh] for h in range(num_heads)], 0).astype(dt)
        # heads as leading batch dim -> single batched matmul for all heads
        scores = jnp.einsum("hqd,hkd->hqk", qh, kh,
                            preferred_element_type=jnp.float32) * scale + mask_bias
        scores = scores - jnp.max(scores, axis=-1, keepdims=True)
        probs = jnp.exp(scores)                   # softmax in f32
        probs = probs * pl.reciprocal(jnp.sum(probs, axis=-1, keepdims=True), approx=True)
        # TODO(synk): attn_dropout and the UCB top-k selection branch (ucb=True and
        # counter >= ucb_activation_step) are not implemented (eval / non-UCB path).
        ctx = jnp.einsum("hqk,hkd->hqd", probs.astype(dt), vh,
                         preferred_element_type=jnp.float32)
        ctx = jnp.concatenate([ctx[h] for h in range(num_heads)], axis=-1).astype(dt)
        # single full-width out-projection (S,128)@(128,128)
        x = x + jnp.dot(ctx, wo_ref[l], preferred_element_type=jnp.float32) + bo_ref[l]

        # ---------------- MLP ----------------
        h2 = _layer_norm_f32(x, ln2_g_ref[l], ln2_b_ref[l]).astype(dt)
        m = jnp.dot(h2, w1_ref[l], preferred_element_type=jnp.float32) + b1_ref[l]
        m = 0.5 * m * (1.0 + lax.erf(m * (1.0 / math.sqrt(2.0))))   # exact GELU, f32
        x = x + jnp.dot(m.astype(dt), w2_ref[l],
                        preferred_element_type=jnp.float32) + b2_ref[l]

    # ---- final encoder LayerNorm, single full-tile lane-dense store ----
    o_ref[...] = _layer_norm_f32(x, lnf_g_ref[...], lnf_b_ref[...]).astype(o_ref.dtype)


# ----------------------------------------------------------------------------- wrapper
def _const_spec(shape):
    """Whole (small) parameter resident every grid step; constant block index."""
    if len(shape) == 2:
        return pl.BlockSpec(shape, lambda i: (0, 0))
    return pl.BlockSpec(shape, lambda i: (0, 0, 0))


def transformer_forward(img, params, *, patch_size, num_heads,
                        counter=0, ucb_count_score=None, ucb=False):
    """Mirrors Transformer.forward(input_ids, counter, ucb_count_score, ucb), eval mode."""
    pe = params["embed"]
    dt = pe["w_patch"].dtype
    patches = extract_patches(img, patch_size).astype(dt)
    B, N, P = patches.shape
    H = pe["w_patch"].shape[1]
    M = params["blocks"][0]["w1"].shape[1]
    L = len(params["blocks"])
    S = N + 1                                     # +1 for the cls token
    S_pad = max(8, -(-S // 8) * 8)                # pad sequence to a sublane multiple

    # ---- wrapper-side layout plumbing: pad patches, fold cls/pos/pad into one map ----
    patches_pad = jnp.zeros((B, S_pad, P), dt).at[:, 1:S, :].set(patches)
    pos_eff = jnp.zeros((S_pad, H), jnp.float32)
    pos_eff = pos_eff.at[1:S, :].set(pe["pos"][1:, :])
    # row 0: emb(row0)=b_patch (zero patch row), so cls+pos0-b_patch gives exactly cls+pos0
    pos_eff = pos_eff.at[0:1, :].set(pe["cls"] + pe["pos"][0:1, :] - pe["b_patch"])
    if S_pad > S:
        pos_eff = pos_eff.at[S:, :].set(-pe["b_patch"])    # padded rows start at exactly 0

    # ---- stack per-layer weights (L, ...) so one pallas_call covers every block ----
    blocks = params["blocks"]
    stk = lambda n: jnp.stack([b[n] for b in blocks], 0)
    wqkv = jnp.stack([jnp.concatenate([b["wq"], b["wk"], b["wv"]], 1) for b in blocks], 0)
    bqkv = jnp.stack([jnp.concatenate([b["bq"], b["bk"], b["bv"]], 1) for b in blocks], 0)
    wo, bo = stk("wo"), stk("bo")
    ln1_g, ln1_b, ln2_g, ln2_b = stk("ln1_g"), stk("ln1_b"), stk("ln2_g"), stk("ln2_b")
    w1, b1, w2, b2 = stk("w1"), stk("b1"), stk("w2"), stk("b2")

    operands = (patches_pad, pe["w_patch"], pe["b_patch"], pos_eff,
                ln1_g, ln1_b, wqkv, bqkv, wo, bo,
                ln2_g, ln2_b, w1, b1, w2, b2,
                params["enc_ln_g"], params["enc_ln_b"])

    dh = H // num_heads
    flops = int(B * (2 * S_pad * P * H
                     + L * (2 * S_pad * H * 3 * H + 4 * num_heads * S_pad * S_pad * dh
                            + 2 * S_pad * H * H + 4 * S_pad * H * M)))
    transcendentals = int(B * L * (num_heads * S_pad * S_pad + S_pad * M))
    bytes_accessed = int(sum(int(a.size) * a.dtype.itemsize for a in operands)
                         + B * S_pad * H * jnp.dtype(dt).itemsize)

    kernel = functools.partial(transformer_kernel, num_heads=num_heads, seq_valid=S)

    out_pad = pl.pallas_call(
        kernel,
        out_shape=jax.ShapeDtypeStruct((B, S_pad, H), dt),
        grid_spec=pltpu.PrefetchScalarGridSpec(
            num_scalar_prefetch=0,
            grid=(B,),
            in_specs=[
                pl.BlockSpec((None, S_pad, P), lambda i: (i, 0, 0)),       # per-batch patches
                _const_spec((P, H)),                                       # patch-embed weight
                _const_spec((1, H)),                                       # patch-embed bias (f32)
                _const_spec((S_pad, H)),                                   # effective pos map (f32)
                _const_spec((L, 1, H)), _const_spec((L, 1, H)),            # ln1 g/b
                _const_spec((L, H, 3 * H)), _const_spec((L, 1, 3 * H)),    # fused wqkv / bqkv
                _const_spec((L, H, H)), _const_spec((L, 1, H)),            # wo / bo
                _const_spec((L, 1, H)), _const_spec((L, 1, H)),            # ln2 g/b
                _const_spec((L, H, M)), _const_spec((L, 1, M)),            # w1 / b1
                _const_spec((L, M, H)), _const_spec((L, 1, H)),            # w2 / b2
                _const_spec((1, H)), _const_spec((1, H)),                  # final encoder LN g/b
            ],
            out_specs=pl.BlockSpec((None, S_pad, H), lambda i: (i, 0, 0)), # lane-dense (8,128)
        ),
        compiler_params=pltpu.CompilerParams(dimension_semantics=("parallel",)),
        cost_estimate=pl.CostEstimate(flops=flops, transcendentals=transcendentals,
                                      bytes_accessed=bytes_accessed),
    )(*operands)

    encoded = out_pad[:, :S, :]                   # drop padded rows
    attn_weights = []                             # vis=False path: no attention maps
    # TODO(synk): UCB branch (ucb=True and counter >= ucb_activation_step) needs
    # data-dependent top-k + scatter count updates; only the non-UCB path is implemented.
    updated_count = ucb_count_score if ucb else jnp.asarray(-1.0, jnp.float32)
    return encoded, attn_weights, updated_count


# ----------------------------------------------------------------------------- pure-JAX reference
def _block_ref(x, p, num_heads, dt):
    f32 = jnp.float32
    B, S, H = x.shape
    dh = H // num_heads
    h1 = _layer_norm_f32(x, p["ln1_g"], p["ln1_b"]).astype(dt)
    q = (jnp.einsum("bsh,hd->bsd", h1, p["wq"], preferred_element_type=f32) + p["bq"]).astype(dt)
    k = (jnp.einsum("bsh,hd->bsd", h1, p["wk"], preferred_element_type=f32) + p["bk"]).astype(dt)
    v = (jnp.einsum("bsh,hd->bsd", h1, p["wv"], preferred_element_type=f32) + p["bv"]).astype(dt)
    qh = q.reshape(B, S, num_heads, dh).transpose(0, 2, 1, 3)
    kh = k.reshape(B, S, num_heads, dh).transpose(0, 2, 1, 3)
    vh = v.reshape(B, S, num_heads, dh).transpose(0, 2, 1, 3)
    scores = jnp.einsum("bhqd,bhkd->bhqk", qh, kh,
                        preferred_element_type=f32) * (1.0 / math.sqrt(dh))
    scores = scores - jnp.max(scores, axis=-1, keepdims=True)
    probs = jnp.exp(scores)
    probs = probs / jnp.sum(probs, axis=-1, keepdims=True)
    ctx = jnp.einsum("bhqk,bhkd->bhqd", probs.astype(dt), vh, preferred_element_type=f32)
    ctx = ctx.transpose(0, 2, 1, 3).reshape(B, S, H).astype(dt)
    x = x + jnp.einsum("bsh,hd->bsd", ctx, p["wo"], preferred_element_type=f32) + p["bo"]
    h2 = _layer_norm_f32(x, p["ln2_g"], p["ln2_b"]).astype(dt)
    m = jnp.einsum("bsh,hm->bsm", h2, p["w1"], preferred_element_type=f32) + p["b1"]
    m = 0.5 * m * (1.0 + lax.erf(m * (1.0 / math.sqrt(2.0))))
    x = x + jnp.einsum("bsm,mh->bsh", m.astype(dt), p["w2"], preferred_element_type=f32) + p["b2"]
    return x


def transformer_ref(img, params, *, patch_size, num_heads):
    f32 = jnp.float32
    pe = params["embed"]
    dt = pe["w_patch"].dtype
    patches = extract_patches(img, patch_size).astype(dt)
    B = patches.shape[0]
    emb = jnp.einsum("bnp,ph->bnh", patches, pe["w_patch"],
                     preferred_element_type=f32) + pe["b_patch"]
    cls_row = (pe["cls"] + pe["pos"][0:1, :])[None, :, :]
    x = jnp.concatenate(
        [jnp.broadcast_to(cls_row, (B, 1, cls_row.shape[-1])),
         emb + pe["pos"][1:, :][None, :, :]], axis=1)        # f32 residual stream
    for p in params["blocks"]:
        x = _block_ref(x, p, num_heads, dt)
    return _layer_norm_f32(x, params["enc_ln_g"], params["enc_ln_b"]).astype(dt)


# ----------------------------------------------------------------------------- demo / check
if __name__ == "__main__":
    # Small ViT-style config: 16x16 image, patch 8 -> 4 patches + cls = seq 5 (padded to 8).
    # hidden=128 / mlp_dim=256 keep every matmul/store lane-dense (multiples of 128).
    img_size, patch_size, in_ch = 16, 8, 3
    hidden, mlp_dim, num_heads, num_layers, batch = 128, 256, 4, 2, 2
    param_dt = jnp.bfloat16      # MXU-native operand dtype; f32 accumulation in-kernel

    n_patches = (img_size // patch_size) ** 2
    seq = n_patches + 1
    patch_dim = in_ch * patch_size * patch_size

    key = jax.random.PRNGKey(0)

    def xavier(k, fan_in, fan_out):
        bound = math.sqrt(6.0 / (fan_in + fan_out))
        return jax.random.uniform(k, (fan_in, fan_out), jnp.float32,
                                  minval=-bound, maxval=bound).astype(param_dt)

    key, *ks = jax.random.split(key, 6)
    embed = {
        "w_patch": xavier(ks[0], patch_dim, hidden),   # conv weight pre-flattened to (in, out)
        "b_patch": 0.01 * jax.random.normal(ks[1], (1, hidden), jnp.float32),
        "cls": 0.02 * jax.random.normal(ks[2], (1, hidden), jnp.float32),
        "pos": 0.02 * jax.random.normal(ks[3], (seq, hidden), jnp.float32),
    }

    blocks = []
    for _ in range(num_layers):
        key, *ks = jax.random.split(key, 9)
        blocks.append({
            "ln1_g": jnp.ones((1, hidden), jnp.float32),
            "ln1_b": jnp.zeros((1, hidden), jnp.float32),
            "wq": xavier(ks[0], hidden, hidden), "bq": jnp.zeros((1, hidden), jnp.float32),
            "wk": xavier(ks[1], hidden, hidden), "bk": jnp.zeros((1, hidden), jnp.float32),
            "wv": xavier(ks[2], hidden, hidden), "bv": jnp.zeros((1, hidden), jnp.float32),
            "wo": xavier(ks[3], hidden, hidden), "bo": jnp.zeros((1, hidden), jnp.float32),
            "ln2_g": jnp.ones((1, hidden), jnp.float32),
            "ln2_b": jnp.zeros((1, hidden), jnp.float32),
            # Mlp._init_weights(): xavier_uniform weights, normal(std=1e-6) biases.
            "w1": xavier(ks[4], hidden, mlp_dim),
            "b1": 1e-6 * jax.random.normal(ks[5], (1, mlp_dim), jnp.float32),
            "w2": xavier(ks[6], mlp_dim, hidden),
            "b2": 1e-6 * jax.random.normal(ks[7], (1, hidden), jnp.float32),
        })

    params = {
        "embed": embed,
        "blocks": blocks,
        "enc_ln_g": jnp.ones((1, hidden), jnp.float32),
        "enc_ln_b": jnp.zeros((1, hidden), jnp.float32),
    }

    key, kimg = jax.random.split(key)
    img = jax.random.normal(kimg, (batch, in_ch, img_size, img_size), jnp.float32)

    encoded, attn_weights, count_score = transformer_forward(
        img, params, patch_size=patch_size, num_heads=num_heads,
        counter=0, ucb_count_score=None, ucb=False)
    encoded = jax.block_until_ready(encoded)

    assert encoded.shape == (batch, seq, hidden)
    assert attn_weights == []

    ref = transformer_ref(img, params, patch_size=patch_size, num_heads=num_heads)
    enc_f = encoded.astype(jnp.float32)
    ref_f = ref.astype(jnp.float32)
    err = float(jnp.max(jnp.abs(enc_f - ref_f)))
    assert jnp.allclose(enc_f, ref_f, atol=5e-2, rtol=5e-2), f"max abs err {err}"

    print("KERNEL_OK")
</pallas_src>

<mosaic_0001>
module attributes {stable_mosaic.version = 11 : i64} {
  func.func @transformer_kernel(%arg0: i32, %arg1: memref<1x8x192xbf16, #tpu.memory_space<vmem>>, %arg2: memref<192x128xbf16, #tpu.memory_space<vmem>>, %arg3: memref<1x128xf32, #tpu.memory_space<vmem>>, %arg4: memref<8x128xf32, #tpu.memory_space<vmem>>, %arg5: memref<2x1x128xf32, #tpu.memory_space<vmem>>, %arg6: memref<2x1x128xf32, #tpu.memory_space<vmem>>, %arg7: memref<2x128x384xbf16, #tpu.memory_space<vmem>>, %arg8: memref<2x1x384xf32, #tpu.memory_space<vmem>>, %arg9: memref<2x128x128xbf16, #tpu.memory_space<vmem>>, %arg10: memref<2x1x128xf32, #tpu.memory_space<vmem>>, %arg11: memref<2x1x128xf32, #tpu.memory_space<vmem>>, %arg12: memref<2x1x128xf32, #tpu.memory_space<vmem>>, %arg13: memref<2x128x256xbf16, #tpu.memory_space<vmem>>, %arg14: memref<2x1x256xf32, #tpu.memory_space<vmem>>, %arg15: memref<2x256x128xbf16, #tpu.memory_space<vmem>>, %arg16: memref<2x1x128xf32, #tpu.memory_space<vmem>>, %arg17: memref<1x128xf32, #tpu.memory_space<vmem>>, %arg18: memref<1x128xf32, #tpu.memory_space<vmem>>, %arg19: memref<1x8x128xbf16, #tpu.memory_space<vmem>>) attributes {dimension_semantics = [#tpu.dimension_semantics<parallel>], iteration_bounds = array<i64: 2>, scalar_prefetch = 0 : i64, scratch_operands = 0 : i64, tpu.core_type = #tpu.core_type<tc>, window_params = [{transform_indices = @transform_0, window_bounds = array<i64: 1, 8, 192>}, {pipeline_mode = #tpu.pipeline_mode<synchronous>, transform_indices = @transform_1, window_bounds = array<i64: 192, 128>}, {pipeline_mode = #tpu.pipeline_mode<synchronous>, transform_indices = @transform_2, window_bounds = array<i64: 1, 128>}, {pipeline_mode = #tpu.pipeline_mode<synchronous>, transform_indices = @transform_3, window_bounds = array<i64: 8, 128>}, {pipeline_mode = #tpu.pipeline_mode<synchronous>, transform_indices = @transform_4, window_bounds = array<i64: 2, 1, 128>}, {pipeline_mode = #tpu.pipeline_mode<synchronous>, transform_indices = @transform_5, window_bounds = array<i64: 2, 1, 128>}, {pipeline_mode = #tpu.pipeline_mode<synchronous>, transform_indices = @transform_6, window_bounds = array<i64: 2, 128, 384>}, {pipeline_mode = #tpu.pipeline_mode<synchronous>, transform_indices = @transform_7, window_bounds = array<i64: 2, 1, 384>}, {pipeline_mode = #tpu.pipeline_mode<synchronous>, transform_indices = @transform_8, window_bounds = array<i64: 2, 128, 128>}, {pipeline_mode = #tpu.pipeline_mode<synchronous>, transform_indices = @transform_9, window_bounds = array<i64: 2, 1, 128>}, {pipeline_mode = #tpu.pipeline_mode<synchronous>, transform_indices = @transform_10, window_bounds = array<i64: 2, 1, 128>}, {pipeline_mode = #tpu.pipeline_mode<synchronous>, transform_indices = @transform_11, window_bounds = array<i64: 2, 1, 128>}, {pipeline_mode = #tpu.pipeline_mode<synchronous>, transform_indices = @transform_12, window_bounds = array<i64: 2, 128, 256>}, {pipeline_mode = #tpu.pipeline_mode<synchronous>, transform_indices = @transform_13, window_bounds = array<i64: 2, 1, 256>}, {pipeline_mode = #tpu.pipeline_mode<synchronous>, transform_indices = @transform_14, window_bounds = array<i64: 2, 256, 128>}, {pipeline_mode = #tpu.pipeline_mode<synchronous>, transform_indices = @transform_15, window_bounds = array<i64: 2, 1, 128>}, {pipeline_mode = #tpu.pipeline_mode<synchronous>, transform_indices = @transform_16, window_bounds = array<i64: 1, 128>}, {pipeline_mode = #tpu.pipeline_mode<synchronous>, transform_indices = @transform_17, window_bounds = array<i64: 1, 128>}, {transform_indices = @transform_18, window_bounds = array<i64: 1, 8, 128>}]} {
    %c0 = arith.constant 0 : index
    %c0_0 = arith.constant 0 : index
    %c0_1 = arith.constant 0 : index
    %0 = vector.load %arg1[%c0, %c0_0, %c0_1] : memref<1x8x192xbf16, #tpu.memory_space<vmem>>, vector<1x8x192xbf16>
    %1 = vector.shape_cast %0 : vector<1x8x192xbf16> to vector<8x192xbf16>
    %c0_2 = arith.constant 0 : index
    %c0_3 = arith.constant 0 : index
    %2 = vector.load %arg2[%c0_2, %c0_3] : memref<192x128xbf16, #tpu.memory_space<vmem>>, vector<192x128xbf16>
    %cst = arith.constant dense<0.000000e+00> : vector<8x128xf32>
    %3 = tpu.matmul %1, %2, %cst {dimension_numbers = #tpu.dot_dimension_numbers<[1], [0], [0], [1], [0, 0, 1, 1], [], []>} : vector<8x192xbf16>, vector<192x128xbf16>, vector<8x128xf32> -> vector<8x128xf32>
    %c0_4 = arith.constant 0 : index
    %c0_5 = arith.constant 0 : index
    %4 = vector.load %arg3[%c0_4, %c0_5] : memref<1x128xf32, #tpu.memory_space<vmem>>, vector<1x128xf32>
    %5 = vector.broadcast %4 : vector<1x128xf32> to vector<8x128xf32>
    %6 = arith.addf %3, %5 : vector<8x128xf32>
    %c0_6 = arith.constant 0 : index
    %c0_7 = arith.constant 0 : index
    %7 = vector.load %arg4[%c0_6, %c0_7] : memref<8x128xf32, #tpu.memory_space<vmem>>, vector<8x128xf32>
    %8 = arith.addf %6, %7 : vector<8x128xf32>
    %9 = tpu.iota {dimensions = array<i32: 1>} : vector<8x8xi32>
    %c5_i32 = arith.constant 5 : i32
    %10 = vector.broadcast %c5_i32 : i32 to vector<8x8xi32>
    %11 = arith.cmpi slt, %9, %10 : vector<8x8xi32>
    %cst_8 = arith.constant 0.000000e+00 : f32
    %cst_9 = arith.constant -1.000000e+30 : f32
    %12 = vector.broadcast %cst_8 : f32 to vector<8x8xf32>
    %13 = vector.broadcast %cst_9 : f32 to vector<8x8xf32>
    %14 = arith.select %11, %12, %13 : vector<8x8xi1>, vector<8x8xf32>
    %c0_10 = arith.constant 0 : index
    %c0_11 = arith.constant 0 : index
    %c0_12 = arith.constant 0 : index
    %15 = vector.load %arg5[%c0_10, %c0_11, %c0_12] : memref<2x1x128xf32, #tpu.memory_space<vmem>>, vector<1x1x128xf32>
    %16 = vector.shape_cast %15 : vector<1x1x128xf32> to vector<1x128xf32>
    %c0_13 = arith.constant 0 : index
    %c0_14 = arith.constant 0 : index
    %c0_15 = arith.constant 0 : index
    %17 = vector.load %arg6[%c0_13, %c0_14, %c0_15] : memref<2x1x128xf32, #tpu.memory_space<vmem>>, vector<1x1x128xf32>
    %18 = vector.shape_cast %17 : vector<1x1x128xf32> to vector<1x128xf32>
    %cst_16 = arith.constant dense<0.000000e+00> : vector<8xf32>
    %19 = vector.multi_reduction <add>, %8, %cst_16 [1] : vector<8x128xf32> to vector<8xf32>
    %20 = vector.shape_cast %19 : vector<8xf32> to vector<8x1xf32>
    %cst_17 = arith.constant 1.280000e+02 : f32
    %21 = vector.broadcast %cst_17 : f32 to vector<8x1xf32>
    %22 = arith.divf %20, %21 : vector<8x1xf32>
    %23 = vector.broadcast %22 : vector<8x1xf32> to vector<8x128xf32>
    %24 = arith.subf %8, %23 : vector<8x128xf32>
    %25 = arith.mulf %24, %24 : vector<8x128xf32>
    %cst_18 = arith.constant dense<0.000000e+00> : vector<8xf32>
    %26 = vector.multi_reduction <add>, %25, %cst_18 [1] : vector<8x128xf32> to vector<8xf32>
    %27 = vector.shape_cast %26 : vector<8xf32> to vector<8x1xf32>
    %cst_19 = arith.constant 1.280000e+02 : f32
    %28 = vector.broadcast %cst_19 : f32 to vector<8x1xf32>
    %29 = arith.divf %27, %28 : vector<8x1xf32>
    %30 = vector.broadcast %22 : vector<8x1xf32> to vector<8x128xf32>
    %31 = arith.subf %8, %30 : vector<8x128xf32>
    %cst_20 = arith.constant 9.99999997E-7 : f32
    %32 = vector.broadcast %cst_20 : f32 to vector<8x1xf32>
    %33 = arith.addf %29, %32 : vector<8x1xf32>
    %34 = math.rsqrt %33 : vector<8x1xf32>
    %35 = vector.broadcast %34 : vector<8x1xf32> to vector<8x128xf32>
    %36 = arith.mulf %31, %35 : vector<8x128xf32>
    %37 = vector.broadcast %16 : vector<1x128xf32> to vector<8x128xf32>
    %38 = arith.mulf %36, %37 : vector<8x128xf32>
    %39 = vector.broadcast %18 : vector<1x128xf32> to vector<8x128xf32>
    %40 = arith.addf %38, %39 : vector<8x128xf32>
    %41 = arith.truncf %40 : vector<8x128xf32> to vector<8x128xbf16>
    %c0_21 = arith.constant 0 : index
    %c0_22 = arith.constant 0 : index
    %c0_23 = arith.constant 0 : index
    %42 = vector.load %arg7[%c0_21, %c0_22, %c0_23] : memref<2x128x384xbf16, #tpu.memory_space<vmem>>, vector<1x128x384xbf16>
    %43 = vector.shape_cast %42 : vector<1x128x384xbf16> to vector<128x384xbf16>
    %cst_24 = arith.constant dense<0.000000e+00> : vector<8x384xf32>
    %44 = tpu.matmul %41, %43, %cst_24 {dimension_numbers = #tpu.dot_dimension_numbers<[1], [0], [0], [1], [0, 0, 1, 1], [], []>} : vector<8x128xbf16>, vector<128x384xbf16>, vector<8x384xf32> -> vector<8x384xf32>
    %c0_25 = arith.constant 0 : index
    %c0_26 = arith.constant 0 : index
    %c0_27 = arith.constant 0 : index
    %45 = vector.load %arg8[%c0_25, %c0_26, %c0_27] : memref<2x1x384xf32, #tpu.memory_space<vmem>>, vector<1x1x384xf32>
    %46 = vector.shape_cast %45 : vector<1x1x384xf32> to vector<1x384xf32>
    %47 = vector.broadcast %46 : vector<1x384xf32> to vector<8x384xf32>
    %48 = arith.addf %44, %47 : vector<8x384xf32>
    %49 = vector.extract_strided_slice %48 {offsets = [0, 0], sizes = [8, 32], strides = [1, 1]} : vector<8x384xf32> to vector<8x32xf32>
    %50 = vector.extract_strided_slice %48 {offsets = [0, 32], sizes = [8, 32], strides = [1, 1]} : vector<8x384xf32> to vector<8x32xf32>
    %51 = vector.extract_strided_slice %48 {offsets = [0, 64], sizes = [8, 32], strides = [1, 1]} : vector<8x384xf32> to vector<8x32xf32>
    %52 = vector.extract_strided_slice %48 {offsets = [0, 96], sizes = [8, 32], strides = [1, 1]} : vector<8x384xf32> to vector<8x32xf32>
    %53 = vector.shape_cast %49 : vector<8x32xf32> to vector<1x8x32xf32>
    %54 = vector.shape_cast %50 : vector<8x32xf32> to vector<1x8x32xf32>
    %55 = vector.shape_cast %51 : vector<8x32xf32> to vector<1x8x32xf32>
    %56 = vector.shape_cast %52 : vector<8x32xf32> to vector<1x8x32xf32>
    %57 = tpu.concatenate %53, %54, %55, %56 in 0 : vector<1x8x32xf32>, vector<1x8x32xf32>, vector<1x8x32xf32>, vector<1x8x32xf32> -> vector<4x8x32xf32>
    %58 = arith.truncf %57 : vector<4x8x32xf32> to vector<4x8x32xbf16>
    %59 = vector.extract_strided_slice %48 {offsets = [0, 128], sizes = [8, 32], strides = [1, 1]} : vector<8x384xf32> to vector<8x32xf32>
    %60 = vector.extract_strided_slice %48 {offsets = [0, 160], sizes = [8, 32], strides = [1, 1]} : vector<8x384xf32> to vector<8x32xf32>
    %61 = vector.extract_strided_slice %48 {offsets = [0, 192], sizes = [8, 32], strides = [1, 1]} : vector<8x384xf32> to vector<8x32xf32>
    %62 = vector.extract_strided_slice %48 {offsets = [0, 224], sizes = [8, 32], strides = [1, 1]} : vector<8x384xf32> to vector<8x32xf32>
    %63 = vector.shape_cast %59 : vector<8x32xf32> to vector<1x8x32xf32>
    %64 = vector.shape_cast %60 : vector<8x32xf32> to vector<1x8x32xf32>
    %65 = vector.shape_cast %61 : vector<8x32xf32> to vector<1x8x32xf32>
    %66 = vector.shape_cast %62 : vector<8x32xf32> to vector<1x8x32xf32>
    %67 = tpu.concatenate %63, %64, %65, %66 in 0 : vector<1x8x32xf32>, vector<1x8x32xf32>, vector<1x8x32xf32>, vector<1x8x32xf32> -> vector<4x8x32xf32>
    %68 = arith.truncf %67 : vector<4x8x32xf32> to vector<4x8x32xbf16>
    %69 = vector.extract_strided_slice %48 {offsets = [0, 256], sizes = [8, 32], strides = [1, 1]} : vector<8x384xf32> to vector<8x32xf32>
    %70 = vector.extract_strided_slice %48 {offsets = [0, 288], sizes = [8, 32], strides = [1, 1]} : vector<8x384xf32> to vector<8x32xf32>
    %71 = vector.extract_strided_slice %48 {offsets = [0, 320], sizes = [8, 32], strides = [1, 1]} : vector<8x384xf32> to vector<8x32xf32>
    %72 = vector.extract_strided_slice %48 {offsets = [0, 352], sizes = [8, 32], strides = [1, 1]} : vector<8x384xf32> to vector<8x32xf32>
    %73 = vector.shape_cast %69 : vector<8x32xf32> to vector<1x8x32xf32>
    %74 = vector.shape_cast %70 : vector<8x32xf32> to vector<1x8x32xf32>
    %75 = vector.shape_cast %71 : vector<8x32xf32> to vector<1x8x32xf32>
    %76 = vector.shape_cast %72 : vector<8x32xf32> to vector<1x8x32xf32>
    %77 = tpu.concatenate %73, %74, %75, %76 in 0 : vector<1x8x32xf32>, vector<1x8x32xf32>, vector<1x8x32xf32>, vector<1x8x32xf32> -> vector<4x8x32xf32>
    %78 = arith.truncf %77 : vector<4x8x32xf32> to vector<4x8x32xbf16>
    "tpu.trace_start"() <{level = 10 : i32, message = "hqd,hkd->hqk"}> : () -> ()
    %cst_28 = arith.constant dense<0.000000e+00> : vector<4x8x8xf32>
    %79 = tpu.matmul %58, %68, %cst_28 {dimension_numbers = #tpu.dot_dimension_numbers<[2], [2], [1], [1], [0, 0, 0, 1, 1, 1], [0], [0]>} : vector<4x8x32xbf16>, vector<4x8x32xbf16>, vector<4x8x8xf32> -> vector<4x8x8xf32>
    "tpu.trace_stop"() : () -> ()
    %cst_29 = arith.constant 0.176776692 : f32
    %80 = vector.broadcast %cst_29 : f32 to vector<4x8x8xf32>
    %81 = arith.mulf %79, %80 : vector<4x8x8xf32>
    %82 = vector.shape_cast %14 : vector<8x8xf32> to vector<1x8x8xf32>
    %83 = vector.broadcast %82 : vector<1x8x8xf32> to vector<4x8x8xf32>
    %84 = arith.addf %81, %83 : vector<4x8x8xf32>
    %cst_30 = arith.constant dense<0xFF800000> : vector<4x8xf32>
    %85 = vector.multi_reduction <maximumf>, %84, %cst_30 [2] : vector<4x8x8xf32> to vector<4x8xf32>
    %86 = vector.shape_cast %85 : vector<4x8xf32> to vector<4x8x1xf32>
    %87 = vector.broadcast %86 : vector<4x8x1xf32> to vector<4x8x8xf32>
    %88 = arith.subf %84, %87 : vector<4x8x8xf32>
    %89 = math.exp %88 : vector<4x8x8xf32>
    %cst_31 = arith.constant dense<0.000000e+00> : vector<4x8xf32>
    %90 = vector.multi_reduction <add>, %89, %cst_31 [2] : vector<4x8x8xf32> to vector<4x8xf32>
    %91 = vector.shape_cast %90 : vector<4x8xf32> to vector<4x8x1xf32>
    %92 = tpu.reciprocal %91 {approx = true} : vector<4x8x1xf32> -> vector<4x8x1xf32>
    %93 = vector.broadcast %92 : vector<4x8x1xf32> to vector<4x8x8xf32>
    %94 = arith.mulf %89, %93 : vector<4x8x8xf32>
    %95 = arith.truncf %94 : vector<4x8x8xf32> to vector<4x8x8xbf16>
    "tpu.trace_start"() <{level = 10 : i32, message = "hqk,hkd->hqd"}> : () -> ()
    %cst_32 = arith.constant dense<0.000000e+00> : vector<4x8x32xf32>
    %96 = tpu.matmul %95, %78, %cst_32 {dimension_numbers = #tpu.dot_dimension_numbers<[2], [1], [1], [2], [0, 0, 0, 1, 1, 2], [0], [0]>} : vector<4x8x8xbf16>, vector<4x8x32xbf16>, vector<4x8x32xf32> -> vector<4x8x32xf32>
    "tpu.trace_stop"() : () -> ()
    %97 = vector.extract_strided_slice %96 {offsets = [0, 0, 0], sizes = [1, 8, 32], strides = [1, 1, 1]} : vector<4x8x32xf32> to vector<1x8x32xf32>
    %98 = vector.shape_cast %97 : vector<1x8x32xf32> to vector<8x32xf32>
    %99 = vector.extract_strided_slice %96 {offsets = [1, 0, 0], sizes = [1, 8, 32], strides = [1, 1, 1]} : vector<4x8x32xf32> to vector<1x8x32xf32>
    %100 = vector.shape_cast %99 : vector<1x8x32xf32> to vector<8x32xf32>
    %101 = vector.extract_strided_slice %96 {offsets = [2, 0, 0], sizes = [1, 8, 32], strides = [1, 1, 1]} : vector<4x8x32xf32> to vector<1x8x32xf32>
    %102 = vector.shape_cast %101 : vector<1x8x32xf32> to vector<8x32xf32>
    %103 = vector.extract_strided_slice %96 {offsets = [3, 0, 0], sizes = [1, 8, 32], strides = [1, 1, 1]} : vector<4x8x32xf32> to vector<1x8x32xf32>
    %104 = vector.shape_cast %103 : vector<1x8x32xf32> to vector<8x32xf32>
    %105 = tpu.concatenate %98, %100, %102, %104 in 1 : vector<8x32xf32>, vector<8x32xf32>, vector<8x32xf32>, vector<8x32xf32> -> vector<8x128xf32>
    %106 = arith.truncf %105 : vector<8x128xf32> to vector<8x128xbf16>
    %c0_33 = arith.constant 0 : index
    %c0_34 = arith.constant 0 : index
    %c0_35 = arith.constant 0 : index
    %107 = vector.load %arg9[%c0_33, %c0_34, %c0_35] : memref<2x128x128xbf16, #tpu.memory_space<vmem>>, vector<1x128x128xbf16>
    %108 = vector.shape_cast %107 : vector<1x128x128xbf16> to vector<128x128xbf16>
    %cst_36 = arith.constant dense<0.000000e+00> : vector<8x128xf32>
    %109 = tpu.matmul %106, %108, %cst_36 {dimension_numbers = #tpu.dot_dimension_numbers<[1], [0], [0], [1], [0, 0, 1, 1], [], []>} : vector<8x128xbf16>, vector<128x128xbf16>, vector<8x128xf32> -> vector<8x128xf32>
    %110 = arith.addf %8, %109 : vector<8x128xf32>
    %c0_37 = arith.constant 0 : index
    %c0_38 = arith.constant 0 : index
    %c0_39 = arith.constant 0 : index
    %111 = vector.load %arg10[%c0_37, %c0_38, %c0_39] : memref<2x1x128xf32, #tpu.memory_space<vmem>>, vector<1x1x128xf32>
    %112 = vector.shape_cast %111 : vector<1x1x128xf32> to vector<1x128xf32>
    %113 = vector.broadcast %112 : vector<1x128xf32> to vector<8x128xf32>
    %114 = arith.addf %110, %113 : vector<8x128xf32>
    %c0_40 = arith.constant 0 : index
    %c0_41 = arith.constant 0 : index
    %c0_42 = arith.constant 0 : index
    %115 = vector.load %arg11[%c0_40, %c0_41, %c0_42] : memref<2x1x128xf32, #tpu.memory_space<vmem>>, vector<1x1x128xf32>
    %116 = vector.shape_cast %115 : vector<1x1x128xf32> to vector<1x128xf32>
    %c0_43 = arith.constant 0 : index
    %c0_44 = arith.constant 0 : index
    %c0_45 = arith.constant 0 : index
    %117 = vector.load %arg12[%c0_43, %c0_44, %c0_45] : memref<2x1x128xf32, #tpu.memory_space<vmem>>, vector<1x1x128xf32>
    %118 = vector.shape_cast %117 : vector<1x1x128xf32> to vector<1x128xf32>
    %cst_46 = arith.constant dense<0.000000e+00> : vector<8xf32>
    %119 = vector.multi_reduction <add>, %114, %cst_46 [1] : vector<8x128xf32> to vector<8xf32>
    %120 = vector.shape_cast %119 : vector<8xf32> to vector<8x1xf32>
    %cst_47 = arith.constant 1.280000e+02 : f32
    %121 = vector.broadcast %cst_47 : f32 to vector<8x1xf32>
    %122 = arith.divf %120, %121 : vector<8x1xf32>
    %123 = vector.broadcast %122 : vector<8x1xf32> to vector<8x128xf32>
    %124 = arith.subf %114, %123 : vector<8x128xf32>
    %125 = arith.mulf %124, %124 : vector<8x128xf32>
    %cst_48 = arith.constant dense<0.000000e+00> : vector<8xf32>
    %126 = vector.multi_reduction <add>, %125, %cst_48 [1] : vector<8x128xf32> to vector<8xf32>
    %127 = vector.shape_cast %126 : vector<8xf32> to vector<8x1xf32>
    %cst_49 = arith.constant 1.280000e+02 : f32
    %128 = vector.broadcast %cst_49 : f32 to vector<8x1xf32>
    %129 = arith.divf %127, %128 : vector<8x1xf32>
    %130 = vector.broadcast %122 : vector<8x1xf32> to vector<8x128xf32>
    %131 = arith.subf %114, %130 : vector<8x128xf32>
    %cst_50 = arith.constant 9.99999997E-7 : f32
    %132 = vector.broadcast %cst_50 : f32 to vector<8x1xf32>
    %133 = arith.addf %129, %132 : vector<8x1xf32>
    %134 = math.rsqrt %133 : vector<8x1xf32>
    %135 = vector.broadcast %134 : vector<8x1xf32> to vector<8x128xf32>
    %136 = arith.mulf %131, %135 : vector<8x128xf32>
    %137 = vector.broadcast %116 : vector<1x128xf32> to vector<8x128xf32>
    %138 = arith.mulf %136, %137 : vector<8x128xf32>
    %139 = vector.broadcast %118 : vector<1x128xf32> to vector<8x128xf32>
    %140 = arith.addf %138, %139 : vector<8x128xf32>
    %141 = arith.truncf %140 : vector<8x128xf32> to vector<8x128xbf16>
    %c0_51 = arith.constant 0 : index
    %c0_52 = arith.constant 0 : index
    %c0_53 = arith.constant 0 : index
    %142 = vector.load %arg13[%c0_51, %c0_52, %c0_53] : memref<2x128x256xbf16, #tpu.memory_space<vmem>>, vector<1x128x256xbf16>
    %143 = vector.shape_cast %142 : vector<1x128x256xbf16> to vector<128x256xbf16>
    %cst_54 = arith.constant dense<0.000000e+00> : vector<8x256xf32>
    %144 = tpu.matmul %141, %143, %cst_54 {dimension_numbers = #tpu.dot_dimension_numbers<[1], [0], [0], [1], [0, 0, 1, 1], [], []>} : vector<8x128xbf16>, vector<128x256xbf16>, vector<8x256xf32> -> vector<8x256xf32>
    %c0_55 = arith.constant 0 : index
    %c0_56 = arith.constant 0 : index
    %c0_57 = arith.constant 0 : index
    %145 = vector.load %arg14[%c0_55, %c0_56, %c0_57] : memref<2x1x256xf32, #tpu.memory_space<vmem>>, vector<1x1x256xf32>
    %146 = vector.shape_cast %145 : vector<1x1x256xf32> to vector<1x256xf32>
    %147 = vector.broadcast %146 : vector<1x256xf32> to vector<8x256xf32>
    %148 = arith.addf %144, %147 : vector<8x256xf32>
    %cst_58 = arith.constant 5.000000e-01 : f32
    %149 = vector.broadcast %cst_58 : f32 to vector<8x256xf32>
    %150 = arith.mulf %149, %148 : vector<8x256xf32>
    %cst_59 = arith.constant 0.707106769 : f32
    %151 = vector.broadcast %cst_59 : f32 to vector<8x256xf32>
    %152 = arith.mulf %148, %151 : vector<8x256xf32>
    %153 = math.erf %152 : vector<8x256xf32>
    %cst_60 = arith.constant 1.000000e+00 : f32
    %154 = vector.broadcast %cst_60 : f32 to vector<8x256xf32>
    %155 = arith.addf %154, %153 : vector<8x256xf32>
    %156 = arith.mulf %150, %155 : vector<8x256xf32>
    %157 = arith.truncf %156 : vector<8x256xf32> to vector<8x256xbf16>
    %c0_61 = arith.constant 0 : index
    %c0_62 = arith.constant 0 : index
    %c0_63 = arith.constant 0 : index
    %158 = vector.load %arg15[%c0_61, %c0_62, %c0_63] : memref<2x256x128xbf16, #tpu.memory_space<vmem>>, vector<1x256x128xbf16>
    %159 = vector.shape_cast %158 : vector<1x256x128xbf16> to vector<256x128xbf16>
    %cst_64 = arith.constant dense<0.000000e+00> : vector<8x128xf32>
    %160 = tpu.matmul %157, %159, %cst_64 {dimension_numbers = #tpu.dot_dimension_numbers<[1], [0], [0], [1], [0, 0, 1, 1], [], []>} : vector<8x256xbf16>, vector<256x128xbf16>, vector<8x128xf32> -> vector<8x128xf32>
    %161 = arith.addf %114, %160 : vector<8x128xf32>
    %c0_65 = arith.constant 0 : index
    %c0_66 = arith.constant 0 : index
    %c0_67 = arith.constant 0 : index
    %162 = vector.load %arg16[%c0_65, %c0_66, %c0_67] : memref<2x1x128xf32, #tpu.memory_space<vmem>>, vector<1x1x128xf32>
    %163 = vector.shape_cast %162 : vector<1x1x128xf32> to vector<1x128xf32>
    %164 = vector.broadcast %163 : vector<1x128xf32> to vector<8x128xf32>
    %165 = arith.addf %161, %164 : vector<8x128xf32>
    %c1 = arith.constant 1 : index
    %c0_68 = arith.constant 0 : index
    %c0_69 = arith.constant 0 : index
    %166 = vector.load %arg5[%c1, %c0_68, %c0_69] : memref<2x1x128xf32, #tpu.memory_space<vmem>>, vector<1x1x128xf32>
    %167 = vector.shape_cast %166 : vector<1x1x128xf32> to vector<1x128xf32>
    %c1_70 = arith.constant 1 : index
    %c0_71 = arith.constant 0 : index
    %c0_72 = arith.constant 0 : index
    %168 = vector.load %arg6[%c1_70, %c0_71, %c0_72] : memref<2x1x128xf32, #tpu.memory_space<vmem>>, vector<1x1x128xf32>
    %169 = vector.shape_cast %168 : vector<1x1x128xf32> to vector<1x128xf32>
    %cst_73 = arith.constant dense<0.000000e+00> : vector<8xf32>
    %170 = vector.multi_reduction <add>, %165, %cst_73 [1] : vector<8x128xf32> to vector<8xf32>
    %171 = vector.shape_cast %170 : vector<8xf32> to vector<8x1xf32>
    %cst_74 = arith.constant 1.280000e+02 : f32
    %172 = vector.broadcast %cst_74 : f32 to vector<8x1xf32>
    %173 = arith.divf %171, %172 : vector<8x1xf32>
    %174 = vector.broadcast %173 : vector<8x1xf32> to vector<8x128xf32>
    %175 = arith.subf %165, %174 : vector<8x128xf32>
    %176 = arith.mulf %175, %175 : vector<8x128xf32>
    %cst_75 = arith.constant dense<0.000000e+00> : vector<8xf32>
    %177 = vector.multi_reduction <add>, %176, %cst_75 [1] : vector<8x128xf32> to vector<8xf32>
    %178 = vector.shape_cast %177 : vector<8xf32> to vector<8x1xf32>
    %cst_76 = arith.constant 1.280000e+02 : f32
    %179 = vector.broadcast %cst_76 : f32 to vector<8x1xf32>
    %180 = arith.divf %178, %179 : vector<8x1xf32>
    %181 = vector.broadcast %173 : vector<8x1xf32> to vector<8x128xf32>
    %182 = arith.subf %165, %181 : vector<8x128xf32>
    %cst_77 = arith.constant 9.99999997E-7 : f32
    %183 = vector.broadcast %cst_77 : f32 to vector<8x1xf32>
    %184 = arith.addf %180, %183 : vector<8x1xf32>
    %185 = math.rsqrt %184 : vector<8x1xf32>
    %186 = vector.broadcast %185 : vector<8x1xf32> to vector<8x128xf32>
    %187 = arith.mulf %182, %186 : vector<8x128xf32>
    %188 = vector.broadcast %167 : vector<1x128xf32> to vector<8x128xf32>
    %189 = arith.mulf %187, %188 : vector<8x128xf32>
    %190 = vector.broadcast %169 : vector<1x128xf32> to vector<8x128xf32>
    %191 = arith.addf %189, %190 : vector<8x128xf32>
    %192 = arith.truncf %191 : vector<8x128xf32> to vector<8x128xbf16>
    %c1_78 = arith.constant 1 : index
    %c0_79 = arith.constant 0 : index
    %c0_80 = arith.constant 0 : index
    %193 = vector.load %arg7[%c1_78, %c0_79, %c0_80] : memref<2x128x384xbf16, #tpu.memory_space<vmem>>, vector<1x128x384xbf16>
    %194 = vector.shape_cast %193 : vector<1x128x384xbf16> to vector<128x384xbf16>
    %cst_81 = arith.constant dense<0.000000e+00> : vector<8x384xf32>
    %195 = tpu.matmul %192, %194, %cst_81 {dimension_numbers = #tpu.dot_dimension_numbers<[1], [0], [0], [1], [0, 0, 1, 1], [], []>} : vector<8x128xbf16>, vector<128x384xbf16>, vector<8x384xf32> -> vector<8x384xf32>
    %c1_82 = arith.constant 1 : index
    %c0_83 = arith.constant 0 : index
    %c0_84 = arith.constant 0 : index
    %196 = vector.load %arg8[%c1_82, %c0_83, %c0_84] : memref<2x1x384xf32, #tpu.memory_space<vmem>>, vector<1x1x384xf32>
    %197 = vector.shape_cast %196 : vector<1x1x384xf32> to vector<1x384xf32>
    %198 = vector.broadcast %197 : vector<1x384xf32> to vector<8x384xf32>
    %199 = arith.addf %195, %198 : vector<8x384xf32>
    %200 = vector.extract_strided_slice %199 {offsets = [0, 0], sizes = [8, 32], strides = [1, 1]} : vector<8x384xf32> to vector<8x32xf32>
    %201 = vector.extract_strided_slice %199 {offsets = [0, 32], sizes = [8, 32], strides = [1, 1]} : vector<8x384xf32> to vector<8x32xf32>
    %202 = vector.extract_strided_slice %199 {offsets = [0, 64], sizes = [8, 32], strides = [1, 1]} : vector<8x384xf32> to vector<8x32xf32>
    %203 = vector.extract_strided_slice %199 {offsets = [0, 96], sizes = [8, 32], strides = [1, 1]} : vector<8x384xf32> to vector<8x32xf32>
    %204 = vector.shape_cast %200 : vector<8x32xf32> to vector<1x8x32xf32>
    %205 = vector.shape_cast %201 : vector<8x32xf32> to vector<1x8x32xf32>
    %206 = vector.shape_cast %202 : vector<8x32xf32> to vector<1x8x32xf32>
    %207 = vector.shape_cast %203 : vector<8x32xf32> to vector<1x8x32xf32>
    %208 = tpu.concatenate %204, %205, %206, %207 in 0 : vector<1x8x32xf32>, vector<1x8x32xf32>, vector<1x8x32xf32>, vector<1x8x32xf32> -> vector<4x8x32xf32>
    %209 = arith.truncf %208 : vector<4x8x32xf32> to vector<4x8x32xbf16>
    %210 = vector.extract_strided_slice %199 {offsets = [0, 128], sizes = [8, 32], strides = [1, 1]} : vector<8x384xf32> to vector<8x32xf32>
    %211 = vector.extract_strided_slice %199 {offsets = [0, 160], sizes = [8, 32], strides = [1, 1]} : vector<8x384xf32> to vector<8x32xf32>
    %212 = vector.extract_strided_slice %199 {offsets = [0, 192], sizes = [8, 32], strides = [1, 1]} : vector<8x384xf32> to vector<8x32xf32>
    %213 = vector.extract_strided_slice %199 {offsets = [0, 224], sizes = [8, 32], strides = [1, 1]} : vector<8x384xf32> to vector<8x32xf32>
    %214 = vector.shape_cast %210 : vector<8x32xf32> to vector<1x8x32xf32>
    %215 = vector.shape_cast %211 : vector<8x32xf32> to vector<1x8x32xf32>
    %216 = vector.shape_cast %212 : vector<8x32xf32> to vector<1x8x32xf32>
    %217 = vector.shape_cast %213 : vector<8x32xf32> to vector<1x8x32xf32>
    %218 = tpu.concatenate %214, %215, %216, %217 in 0 : vector<1x8x32xf32>, vector<1x8x32xf32>, vector<1x8x32xf32>, vector<1x8x32xf32> -> vector<4x8x32xf32>
    %219 = arith.truncf %218 : vector<4x8x32xf32> to vector<4x8x32xbf16>
    %220 = vector.extract_strided_slice %199 {offsets = [0, 256], sizes = [8, 32], strides = [1, 1]} : vector<8x384xf32> to vector<8x32xf32>
    %221 = vector.extract_strided_slice %199 {offsets = [0, 288], sizes = [8, 32], strides = [1, 1]} : vector<8x384xf32> to vector<8x32xf32>
    %222 = vector.extract_strided_slice %199 {offsets = [0, 320], sizes = [8, 32], strides = [1, 1]} : vector<8x384xf32> to vector<8x32xf32>
    %223 = vector.extract_strided_slice %199 {offsets = [0, 352], sizes = [8, 32], strides = [1, 1]} : vector<8x384xf32> to vector<8x32xf32>
    %224 = vector.shape_cast %220 : vector<8x32xf32> to vector<1x8x32xf32>
    %225 = vector.shape_cast %221 : vector<8x32xf32> to vector<1x8x32xf32>
    %226 = vector.shape_cast %222 : vector<8x32xf32> to vector<1x8x32xf32>
    %227 = vector.shape_cast %223 : vector<8x32xf32> to vector<1x8x32xf32>
    %228 = tpu.concatenate %224, %225, %226, %227 in 0 : vector<1x8x32xf32>, vector<1x8x32xf32>, vector<1x8x32xf32>, vector<1x8x32xf32> -> vector<4x8x32xf32>
    %229 = arith.truncf %228 : vector<4x8x32xf32> to vector<4x8x32xbf16>
    "tpu.trace_start"() <{level = 10 : i32, message = "hqd,hkd->hqk"}> : () -> ()
    %cst_85 = arith.constant dense<0.000000e+00> : vector<4x8x8xf32>
    %230 = tpu.matmul %209, %219, %cst_85 {dimension_numbers = #tpu.dot_dimension_numbers<[2], [2], [1], [1], [0, 0, 0, 1, 1, 1], [0], [0]>} : vector<4x8x32xbf16>, vector<4x8x32xbf16>, vector<4x8x8xf32> -> vector<4x8x8xf32>
    "tpu.trace_stop"() : () -> ()
    %cst_86 = arith.constant 0.176776692 : f32
    %231 = vector.broadcast %cst_86 : f32 to vector<4x8x8xf32>
    %232 = arith.mulf %230, %231 : vector<4x8x8xf32>
    %233 = vector.shape_cast %14 : vector<8x8xf32> to vector<1x8x8xf32>
    %234 = vector.broadcast %233 : vector<1x8x8xf32> to vector<4x8x8xf32>
    %235 = arith.addf %232, %234 : vector<4x8x8xf32>
    %cst_87 = arith.constant dense<0xFF800000> : vector<4x8xf32>
    %236 = vector.multi_reduction <maximumf>, %235, %cst_87 [2] : vector<4x8x8xf32> to vector<4x8xf32>
    %237 = vector.shape_cast %236 : vector<4x8xf32> to vector<4x8x1xf32>
    %238 = vector.broadcast %237 : vector<4x8x1xf32> to vector<4x8x8xf32>
    %239 = arith.subf %235, %238 : vector<4x8x8xf32>
    %240 = math.exp %239 : vector<4x8x8xf32>
    %cst_88 = arith.constant dense<0.000000e+00> : vector<4x8xf32>
    %241 = vector.multi_reduction <add>, %240, %cst_88 [2] : vector<4x8x8xf32> to vector<4x8xf32>
    %242 = vector.shape_cast %241 : vector<4x8xf32> to vector<4x8x1xf32>
    %243 = tpu.reciprocal %242 {approx = true} : vector<4x8x1xf32> -> vector<4x8x1xf32>
    %244 = vector.broadcast %243 : vector<4x8x1xf32> to vector<4x8x8xf32>
    %245 = arith.mulf %240, %244 : vector<4x8x8xf32>
    %246 = arith.truncf %245 : vector<4x8x8xf32> to vector<4x8x8xbf16>
    "tpu.trace_start"() <{level = 10 : i32, message = "hqk,hkd->hqd"}> : () -> ()
    %cst_89 = arith.constant dense<0.000000e+00> : vector<4x8x32xf32>
    %247 = tpu.matmul %246, %229, %cst_89 {dimension_numbers = #tpu.dot_dimension_numbers<[2], [1], [1], [2], [0, 0, 0, 1, 1, 2], [0], [0]>} : vector<4x8x8xbf16>, vector<4x8x32xbf16>, vector<4x8x32xf32> -> vector<4x8x32xf32>
    "tpu.trace_stop"() : () -> ()
    %248 = vector.extract_strided_slice %247 {offsets = [0, 0, 0], sizes = [1, 8, 32], strides = [1, 1, 1]} : vector<4x8x32xf32> to vector<1x8x32xf32>
    %249 = vector.shape_cast %248 : vector<1x8x32xf32> to vector<8x32xf32>
    %250 = vector.extract_strided_slice %247 {offsets = [1, 0, 0], sizes = [1, 8, 32], strides = [1, 1, 1]} : vector<4x8x32xf32> to vector<1x8x32xf32>
    %251 = vector.shape_cast %250 : vector<1x8x32xf32> to vector<8x32xf32>
    %252 = vector.extract_strided_slice %247 {offsets = [2, 0, 0], sizes = [1, 8, 32], strides = [1, 1, 1]} : vector<4x8x32xf32> to vector<1x8x32xf32>
    %253 = vector.shape_cast %252 : vector<1x8x32xf32> to vector<8x32xf32>
    %254 = vector.extract_strided_slice %247 {offsets = [3, 0, 0], sizes = [1, 8, 32], strides = [1, 1, 1]} : vector<4x8x32xf32> to vector<1x8x32xf32>
    %255 = vector.shape_cast %254 : vector<1x8x32xf32> to vector<8x32xf32>
    %256 = tpu.concatenate %249, %251, %253, %255 in 1 : vector<8x32xf32>, vector<8x32xf32>, vector<8x32xf32>, vector<8x32xf32> -> vector<8x128xf32>
    %257 = arith.truncf %256 : vector<8x128xf32> to vector<8x128xbf16>
    %c1_90 = arith.constant 1 : index
    %c0_91 = arith.constant 0 : index
    %c0_92 = arith.constant 0 : index
    %258 = vector.load %arg9[%c1_90, %c0_91, %c0_92] : memref<2x128x128xbf16, #tpu.memory_space<vmem>>, vector<1x128x128xbf16>
    %259 = vector.shape_cast %258 : vector<1x128x128xbf16> to vector<128x128xbf16>
    %cst_93 = arith.constant dense<0.000000e+00> : vector<8x128xf32>
    %260 = tpu.matmul %257, %259, %cst_93 {dimension_numbers = #tpu.dot_dimension_numbers<[1], [0], [0], [1], [0, 0, 1, 1], [], []>} : vector<8x128xbf16>, vector<128x128xbf16>, vector<8x128xf32> -> vector<8x128xf32>
    %261 = arith.addf %165, %260 : vector<8x128xf32>
    %c1_94 = arith.constant 1 : index
    %c0_95 = arith.constant 0 : index
    %c0_96 = arith.constant 0 : index
    %262 = vector.load %arg10[%c1_94, %c0_95, %c0_96] : memref<2x1x128xf32, #tpu.memory_space<vmem>>, vector<1x1x128xf32>
    %263 = vector.shape_cast %262 : vector<1x1x128xf32> to vector<1x128xf32>
    %264 = vector.broadcast %263 : vector<1x128xf32> to vector<8x128xf32>
    %265 = arith.addf %261, %264 : vector<8x128xf32>
    %c1_97 = arith.constant 1 : index
    %c0_98 = arith.constant 0 : index
    %c0_99 = arith.constant 0 : index
    %266 = vector.load %arg11[%c1_97, %c0_98, %c0_99] : memref<2x1x128xf32, #tpu.memory_space<vmem>>, vector<1x1x128xf32>
    %267 = vector.shape_cast %266 : vector<1x1x128xf32> to vector<1x128xf32>
    %c1_100 = arith.constant 1 : index
    %c0_101 = arith.constant 0 : index
    %c0_102 = arith.constant 0 : index
    %268 = vector.load %arg12[%c1_100, %c0_101, %c0_102] : memref<2x1x128xf32, #tpu.memory_space<vmem>>, vector<1x1x128xf32>
    %269 = vector.shape_cast %268 : vector<1x1x128xf32> to vector<1x128xf32>
    %cst_103 = arith.constant dense<0.000000e+00> : vector<8xf32>
    %270 = vector.multi_reduction <add>, %265, %cst_103 [1] : vector<8x128xf32> to vector<8xf32>
    %271 = vector.shape_cast %270 : vector<8xf32> to vector<8x1xf32>
    %cst_104 = arith.constant 1.280000e+02 : f32
    %272 = vector.broadcast %cst_104 : f32 to vector<8x1xf32>
    %273 = arith.divf %271, %272 : vector<8x1xf32>
    %274 = vector.broadcast %273 : vector<8x1xf32> to vector<8x128xf32>
    %275 = arith.subf %265, %274 : vector<8x128xf32>
    %276 = arith.mulf %275, %275 : vector<8x128xf32>
    %cst_105 = arith.constant dense<0.000000e+00> : vector<8xf32>
    %277 = vector.multi_reduction <add>, %276, %cst_105 [1] : vector<8x128xf32> to vector<8xf32>
    %278 = vector.shape_cast %277 : vector<8xf32> to vector<8x1xf32>
    %cst_106 = arith.constant 1.280000e+02 : f32
    %279 = vector.broadcast %cst_106 : f32 to vector<8x1xf32>
    %280 = arith.divf %278, %279 : vector<8x1xf32>
    %281 = vector.broadcast %273 : vector<8x1xf32> to vector<8x128xf32>
    %282 = arith.subf %265, %281 : vector<8x128xf32>
    %cst_107 = arith.constant 9.99999997E-7 : f32
    %283 = vector.broadcast %cst_107 : f32 to vector<8x1xf32>
    %284 = arith.addf %280, %283 : vector<8x1xf32>
    %285 = math.rsqrt %284 : vector<8x1xf32>
    %286 = vector.broadcast %285 : vector<8x1xf32> to vector<8x128xf32>
    %287 = arith.mulf %282, %286 : vector<8x128xf32>
    %288 = vector.broadcast %267 : vector<1x128xf32> to vector<8x128xf32>
    %289 = arith.mulf %287, %288 : vector<8x128xf32>
    %290 = vector.broadcast %269 : vector<1x128xf32> to vector<8x128xf32>
    %291 = arith.addf %289, %290 : vector<8x128xf32>
    %292 = arith.truncf %291 : vector<8x128xf32> to vector<8x128xbf16>
    %c1_108 = arith.constant 1 : index
    %c0_109 = arith.constant 0 : index
    %c0_110 = arith.constant 0 : index
    %293 = vector.load %arg13[%c1_108, %c0_109, %c0_110] : memref<2x128x256xbf16, #tpu.memory_space<vmem>>, vector<1x128x256xbf16>
    %294 = vector.shape_cast %293 : vector<1x128x256xbf16> to vector<128x256xbf16>
    %cst_111 = arith.constant dense<0.000000e+00> : vector<8x256xf32>
    %295 = tpu.matmul %292, %294, %cst_111 {dimension_numbers = #tpu.dot_dimension_numbers<[1], [0], [0], [1], [0, 0, 1, 1], [], []>} : vector<8x128xbf16>, vector<128x256xbf16>, vector<8x256xf32> -> vector<8x256xf32>
    %c1_112 = arith.constant 1 : index
    %c0_113 = arith.constant 0 : index
    %c0_114 = arith.constant 0 : index
    %296 = vector.load %arg14[%c1_112, %c0_113, %c0_114] : memref<2x1x256xf32, #tpu.memory_space<vmem>>, vector<1x1x256xf32>
    %297 = vector.shape_cast %296 : vector<1x1x256xf32> to vector<1x256xf32>
    %298 = vector.broadcast %297 : vector<1x256xf32> to vector<8x256xf32>
    %299 = arith.addf %295, %298 : vector<8x256xf32>
    %cst_115 = arith.constant 5.000000e-01 : f32
    %300 = vector.broadcast %cst_115 : f32 to vector<8x256xf32>
    %301 = arith.mulf %300, %299 : vector<8x256xf32>
    %cst_116 = arith.constant 0.707106769 : f32
    %302 = vector.broadcast %cst_116 : f32 to vector<8x256xf32>
    %303 = arith.mulf %299, %302 : vector<8x256xf32>
    %304 = math.erf %303 : vector<8x256xf32>
    %cst_117 = arith.constant 1.000000e+00 : f32
    %305 = vector.broadcast %cst_117 : f32 to vector<8x256xf32>
    %306 = arith.addf %305, %304 : vector<8x256xf32>
    %307 = arith.mulf %301, %306 : vector<8x256xf32>
    %308 = arith.truncf %307 : vector<8x256xf32> to vector<8x256xbf16>
    %c1_118 = arith.constant 1 : index
    %c0_119 = arith.constant 0 : index
    %c0_120 = arith.constant 0 : index
    %309 = vector.load %arg15[%c1_118, %c0_119, %c0_120] : memref<2x256x128xbf16, #tpu.memory_space<vmem>>, vector<1x256x128xbf16>
    %310 = vector.shape_cast %309 : vector<1x256x128xbf16> to vector<256x128xbf16>
    %cst_121 = arith.constant dense<0.000000e+00> : vector<8x128xf32>
    %311 = tpu.matmul %308, %310, %cst_121 {dimension_numbers = #tpu.dot_dimension_numbers<[1], [0], [0], [1], [0, 0, 1, 1], [], []>} : vector<8x256xbf16>, vector<256x128xbf16>, vector<8x128xf32> -> vector<8x128xf32>
    %312 = arith.addf %265, %311 : vector<8x128xf32>
    %c1_122 = arith.constant 1 : index
    %c0_123 = arith.constant 0 : index
    %c0_124 = arith.constant 0 : index
    %313 = vector.load %arg16[%c1_122, %c0_123, %c0_124] : memref<2x1x128xf32, #tpu.memory_space<vmem>>, vector<1x1x128xf32>
    %314 = vector.shape_cast %313 : vector<1x1x128xf32> to vector<1x128xf32>
    %315 = vector.broadcast %314 : vector<1x128xf32> to vector<8x128xf32>
    %316 = arith.addf %312, %315 : vector<8x128xf32>
    %c0_125 = arith.constant 0 : index
    %c0_126 = arith.constant 0 : index
    %317 = vector.load %arg17[%c0_125, %c0_126] : memref<1x128xf32, #tpu.memory_space<vmem>>, vector<1x128xf32>
    %c0_127 = arith.constant 0 : index
    %c0_128 = arith.constant 0 : index
    %318 = vector.load %arg18[%c0_127, %c0_128] : memref<1x128xf32, #tpu.memory_space<vmem>>, vector<1x128xf32>
    %cst_129 = arith.constant dense<0.000000e+00> : vector<8xf32>
    %319 = vector.multi_reduction <add>, %316, %cst_129 [1] : vector<8x128xf32> to vector<8xf32>
    %320 = vector.shape_cast %319 : vector<8xf32> to vector<8x1xf32>
    %cst_130 = arith.constant 1.280000e+02 : f32
    %321 = vector.broadcast %cst_130 : f32 to vector<8x1xf32>
    %322 = arith.divf %320, %321 : vector<8x1xf32>
    %323 = vector.broadcast %322 : vector<8x1xf32> to vector<8x128xf32>
    %324 = arith.subf %316, %323 : vector<8x128xf32>
    %325 = arith.mulf %324, %324 : vector<8x128xf32>
    %cst_131 = arith.constant dense<0.000000e+00> : vector<8xf32>
    %326 = vector.multi_reduction <add>, %325, %cst_131 [1] : vector<8x128xf32> to vector<8xf32>
    %327 = vector.shape_cast %326 : vector<8xf32> to vector<8x1xf32>
    %cst_132 = arith.constant 1.280000e+02 : f32
    %328 = vector.broadcast %cst_132 : f32 to vector<8x1xf32>
    %329 = arith.divf %327, %328 : vector<8x1xf32>
    %330 = vector.broadcast %322 : vector<8x1xf32> to vector<8x128xf32>
    %331 = arith.subf %316, %330 : vector<8x128xf32>
    %cst_133 = arith.constant 9.99999997E-7 : f32
    %332 = vector.broadcast %cst_133 : f32 to vector<8x1xf32>
    %333 = arith.addf %329, %332 : vector<8x1xf32>
    %334 = math.rsqrt %333 : vector<8x1xf32>
    %335 = vector.broadcast %334 : vector<8x1xf32> to vector<8x128xf32>
    %336 = arith.mulf %331, %335 : vector<8x128xf32>
    %337 = vector.broadcast %317 : vector<1x128xf32> to vector<8x128xf32>
    %338 = arith.mulf %336, %337 : vector<8x128xf32>
    %339 = vector.broadcast %318 : vector<1x128xf32> to vector<8x128xf32>
    %340 = arith.addf %338, %339 : vector<8x128xf32>
    %341 = arith.truncf %340 : vector<8x128xf32> to vector<8x128xbf16>
    %c0_134 = arith.constant 0 : index
    %c0_135 = arith.constant 0 : index
    %c0_136 = arith.constant 0 : index
    %342 = vector.load %arg19[%c0_134, %c0_135, %c0_136] : memref<1x8x128xbf16, #tpu.memory_space<vmem>>, vector<1x8x128xbf16>
    %343 = vector.shape_cast %342 : vector<1x8x128xbf16> to vector<8x128xbf16>
    %344 = vector.shape_cast %341 : vector<8x128xbf16> to vector<1x8x128xbf16>
    tpu.vector_store %arg19[%c0_134, %c0_135, %c0_136], %344 {strides = array<i32>} : memref<1x8x128xbf16, #tpu.memory_space<vmem>>, vector<1x8x128xbf16>,
    return
  }
  func.func @transform_0(%arg0: i32) -> (i32, i32, i32) {
    %c0_i32 = arith.constant 0 : i32
    %c0_i32_0 = arith.constant 0 : i32
    %c0_i32_1 = arith.constant 0 : i32
    return %arg0, %c0_i32, %c0_i32_0 : i32, i32, i32
  }
  func.func @transform_1(%arg0: i32) -> (i32, i32) {
    %c0_i32 = arith.constant 0 : i32
    %c0_i32_0 = arith.constant 0 : i32
    %c0_i32_1 = arith.constant 0 : i32
    return %c0_i32, %c0_i32_0 : i32, i32
  }
  func.func @transform_2(%arg0: i32) -> (i32, i32) {
    %c0_i32 = arith.constant 0 : i32
    %c0_i32_0 = arith.constant 0 : i32
    %c0_i32_1 = arith.constant 0 : i32
    return %c0_i32, %c0_i32_0 : i32, i32
  }
  func.func @transform_3(%arg0: i32) -> (i32, i32) {
    %c0_i32 = arith.constant 0 : i32
    %c0_i32_0 = arith.constant 0 : i32
    %c0_i32_1 = arith.constant 0 : i32
    return %c0_i32, %c0_i32_0 : i32, i32
  }
  func.func @transform_4(%arg0: i32) -> (i32, i32, i32) {
    %c0_i32 = arith.constant 0 : i32
    %c0_i32_0 = arith.constant 0 : i32
    %c0_i32_1 = arith.constant 0 : i32
    %c0_i32_2 = arith.constant 0 : i32
    return %c0_i32, %c0_i32_0, %c0_i32_1 : i32, i32, i32
  }
  func.func @transform_5(%arg0: i32) -> (i32, i32, i32) {
    %c0_i32 = arith.constant 0 : i32
    %c0_i32_0 = arith.constant 0 : i32
    %c0_i32_1 = arith.constant 0 : i32
    %c0_i32_2 = arith.constant 0 : i32
    return %c0_i32, %c0_i32_0, %c0_i32_1 : i32, i32, i32
  }
  func.func @transform_6(%arg0: i32) -> (i32, i32, i32) {
    %c0_i32 = arith.constant 0 : i32
    %c0_i32_0 = arith.constant 0 : i32
    %c0_i32_1 = arith.constant 0 : i32
    %c0_i32_2 = arith.constant 0 : i32
    return %c0_i32, %c0_i32_0, %c0_i32_1 : i32, i32, i32
  }
  func.func @transform_7(%arg0: i32) -> (i32, i32, i32) {
    %c0_i32 = arith.constant 0 : i32
    %c0_i32_0 = arith.constant 0 : i32
    %c0_i32_1 = arith.constant 0 : i32
    %c0_i32_2 = arith.constant 0 : i32
    return %c0_i32, %c0_i32_0, %c0_i32_1 : i32, i32, i32
  }
  func.func @transform_8(%arg0: i32) -> (i32, i32, i32) {
    %c0_i32 = arith.constant 0 : i32
    %c0_i32_0 = arith.constant 0 : i32
    %c0_i32_1 = arith.constant 0 : i32
    %c0_i32_2 = arith.constant 0 : i32
    return %c0_i32, %c0_i32_0, %c0_i32_1 : i32, i32, i32
  }
  func.func @transform_9(%arg0: i32) -> (i32, i32, i32) {
    %c0_i32 = arith.constant 0 : i32
    %c0_i32_0 = arith.constant 0 : i32
    %c0_i32_1 = arith.constant 0 : i32
    %c0_i32_2 = arith.constant 0 : i32
    return %c0_i32, %c0_i32_0, %c0_i32_1 : i32, i32, i32
  }
  func.func @transform_10(%arg0: i32) -> (i32, i32, i32) {
    %c0_i32 = arith.constant 0 : i32
    %c0_i32_0 = arith.constant 0 : i32
    %c0_i32_1 = arith.constant 0 : i32
    %c0_i32_2 = arith.constant 0 : i32
    return %c0_i32, %c0_i32_0, %c0_i32_1 : i32, i32, i32
  }
  func.func @transform_11(%arg0: i32) -> (i32, i32, i32) {
    %c0_i32 = arith.constant 0 : i32
    %c0_i32_0 = arith.constant 0 : i32
    %c0_i32_1 = arith.constant 0 : i32
    %c0_i32_2 = arith.constant 0 : i32
    return %c0_i32, %c0_i32_0, %c0_i32_1 : i32, i32, i32
  }
  func.func @transform_12(%arg0: i32) -> (i32, i32, i32) {
    %c0_i32 = arith.constant 0 : i32
    %c0_i32_0 = arith.constant 0 : i32
    %c0_i32_1 = arith.constant 0 : i32
    %c0_i32_2 = arith.constant 0 : i32
    return %c0_i32, %c0_i32_0, %c0_i32_1 : i32, i32, i32
  }
  func.func @transform_13(%arg0: i32) -> (i32, i32, i32) {
    %c0_i32 = arith.constant 0 : i32
    %c0_i32_0 = arith.constant 0 : i32
    %c0_i32_1 = arith.constant 0 : i32
    %c0_i32_2 = arith.constant 0 : i32
    return %c0_i32, %c0_i32_0, %c0_i32_1 : i32, i32, i32
  }
  func.func @transform_14(%arg0: i32) -> (i32, i32, i32) {
    %c0_i32 = arith.constant 0 : i32
    %c0_i32_0 = arith.constant 0 : i32
    %c0_i32_1 = arith.constant 0 : i32
    %c0_i32_2 = arith.constant 0 : i32
    return %c0_i32, %c0_i32_0, %c0_i32_1 : i32, i32, i32
  }
  func.func @transform_15(%arg0: i32) -> (i32, i32, i32) {
    %c0_i32 = arith.constant 0 : i32
    %c0_i32_0 = arith.constant 0 : i32
    %c0_i32_1 = arith.constant 0 : i32
    %c0_i32_2 = arith.constant 0 : i32
    return %c0_i32, %c0_i32_0, %c0_i32_1 : i32, i32, i32
  }
  func.func @transform_16(%arg0: i32) -> (i32, i32) {
    %c0_i32 = arith.constant 0 : i32
    %c0_i32_0 = arith.constant 0 : i32
    %c0_i32_1 = arith.constant 0 : i32
    return %c0_i32, %c0_i32_0 : i32, i32
  }
  func.func @transform_17(%arg0: i32) -> (i32, i32) {
    %c0_i32 = arith.constant 0 : i32
    %c0_i32_0 = arith.constant 0 : i32
    %c0_i32_1 = arith.constant 0 : i32
    return %c0_i32, %c0_i32_0 : i32, i32
  }
  func.func @transform_18(%arg0: i32) -> (i32, i32, i32) {
    %c0_i32 = arith.constant 0 : i32
    %c0_i32_0 = arith.constant 0 : i32
    %c0_i32_1 = arith.constant 0 : i32
    return %arg0, %c0_i32, %c0_i32_0 : i32, i32, i32
  }
}

</mosaic_0001>

<bundles_post_ra>
// kernel: tpu_custom_call.1
= control target key start
LH: loop header
LB: loop body
LE: loop exit
PB: predicated region body
PF: predicated region fallthrough
CT: control target
= control target key end

     0   :  { %s5277_s0 = inlined_call_operand.hbm [shape: bf16[2,8,192], index: 0, kind: input, shape index: {}]   ;;  %s5278_s1 = inlined_call_operand.hbm [shape: bf16[192,128], index: 1, kind: input, shape index: {}]   ;;  %s5279_s2 = inlined_call_operand.hbm [shape: f32[1,128], index: 2, kind: input, shape index: {}]   ;;  %s5280_s3 = inlined_call_operand.hbm [shape: f32[8,128], index: 3, kind: input, shape index: {}]   ;;  %s5281_s4 = inlined_call_operand.hbm [shape: f32[2,1,128], index: 4, kind: input, shape index: {}]   ;;  %s5282_s5 = inlined_call_operand.hbm [shape: f32[2,1,128], index: 5, kind: input, shape index: {}]   ;;  %s5283_s6 = inlined_call_operand.hbm [shape: bf16[2,128,384], index: 6, kind: input, shape index: {}]   ;;  %s5284_s7 = inlined_call_operand.vmem [shape: f32[2,1,384], index: 7, kind: input, shape index: {}]   ;;  %s5285_s8 = inlined_call_operand.hbm [shape: bf16[2,128,128], index: 8, kind: input, shape index: {}]   ;;  %s5286_s9 = inlined_call_operand.hbm [shape: f32[2,1,128], index: 9, kind: input, shape index: {}]   ;;  %s5287_s10 = inlined_call_operand.hbm [shape: f32[2,1,128], index: 10, kind: input, shape index: {}]   ;;  %s5288_s11 = inlined_call_operand.hbm [shape: f32[2,1,128], index: 11, kind: input, shape index: {}]   ;;  %s5289_s12 = inlined_call_operand.hbm [shape: bf16[2,128,256], index: 12, kind: input, shape index: {}]   ;;  %s5290_s13 = inlined_call_operand.vmem [shape: f32[2,1,256], index: 13, kind: input, shape index: {}]   ;;  %s5291_s14 = inlined_call_operand.hbm [shape: bf16[2,256,128], index: 14, kind: input, shape index: {}]   ;;  %s5292_s15 = inlined_call_operand.vmem [shape: f32[2,1,128], index: 15, kind: input, shape index: {}]   ;;  %s5293_s16 = inlined_call_operand.vmem [shape: f32[1,128], index: 16, kind: input, shape index: {}]   ;;  %s5294_s17 = inlined_call_operand.vmem [shape: f32[1,128], index: 17, kind: input, shape index: {}]   ;;  %s5295_s18 = inlined_call_operand.hbm [shape: bf16[2,8,128], index: 18, kind: output, shape index: {}]  }
   0x1   :  { %5306 = sst [smem:[#allocation33_spill]] %s5277_s0 }
   0x2   :  { %5307 = sst [smem:[#allocation34_spill]] %s5278_s1 }
   0x3   :  { %5308 = sst [smem:[#allocation35_spill]] %s5279_s2 }
   0x4   :  { %5309 = sst [smem:[#allocation36_spill]] %s5280_s3 }
   0x5   :  { %5310 = sst [smem:[#allocation37_spill]] %s5281_s4 }
   0x6   :  { %5311 = sst [smem:[#allocation38_spill]] %s5282_s5 }
   0x7   :  { %5312 = sst [smem:[#allocation39_spill]] %s5283_s6 }
   0x8   :  { %5313 = sst [smem:[#allocation40_spill]] %s5284_s7 }
   0x9   :  { %5314 = sst [smem:[#allocation41_spill]] %s5285_s8 }
   0xa   :  { %5315 = sst [smem:[#allocation42_spill]] %s5286_s9 }
   0xb   :  { %5316 = sst [smem:[#allocation43_spill]] %s5287_s10 }
   0xc   :  { %5317 = sst [smem:[#allocation44_spill]] %s5290_s13 }
   0xd   :  { %5318 = sst [smem:[#allocation45_spill]] %s5292_s15 }
   0xe   :  { %5319 = sst [smem:[#allocation46_spill]] %s5293_s16 }
   0xf   :  { %5320 = sst [smem:[#allocation47_spill]] %s5294_s17 }
  0x10   :  { %5321 = sst [smem:[#allocation48_spill]] %s5295_s18 }
  0x11   :  { %23 = vsyncpa [#allocation3], 0 }
  0x12   :  { %25 = vsyncpa [#allocation3 + $0x1], 0 }
  0x13   :  { %26 = vsyncpa [#allocation6], 0 }
  0x14   :  { %27 = vsyncpa [#allocation9], 0 }
  0x15   :  { %28 = vsyncpa [#allocation12], 0 }
  0x16   :  { %29 = vsyncpa [#allocation15], 0 }
  0x17   :  { %30 = vsyncpa [#allocation18], 0 }
  0x18   :  { %31 = vsyncpa [#allocation21], 0 }
  0x19   :  { %32 = vsyncpa [#allocation4], 0 }
  0x1a   :  { %34 = vsyncpa [#allocation4 + $0x1], 0  ;;  %s4790_s27 = smov 0   ;;  %s4792_s28 = smov 0  }
  0x1b   :  { %s4794_s29 = smov 0   ;;  %s4796_s30 = smov 0  }
  0x1c LB: > { %s5322_s1 = sld [smem:[#allocation34_spill]]  ;;  %s4814_s21 = sadd.s32 4294967295, %s4668_s30   ;;  %s4668_s30 = sphi %s4796_s30, %s5354_s30   ;;  %s4664_s29 = sphi %s4794_s29, %s5353_s29   ;;  %s4660_s28 = sphi %s4792_s28, %s5352_s28   ;;  %s4656_s27 = sphi %s4790_s27, %s5351_s27  }
  0x1d   : > { %p3180_p0 = scmp.ge.s32.totalorder %s4668_s30, 1  ;;  %p61_p1 = scmp.eq.s32.totalorder %s4814_s21, 0 }
  0x1e   : > { %p454_p2 = scmp.lt.s32.totalorder %s4668_s30, 3  ;;  %s4670_s2 = smov [#allocation5]  }
  0x1f   : > { %s467_s23 = sshll.u32 %s4670_s2, 4  ;;  %s5325_s3 = sld [smem:[#allocation36_spill]]  ;;  %s468_s23 = int_to_ptr.vmem [resolvable:$true] %s467_s23 }
  0x20   : > { %p4819_p3 = pnand %p3180_p0, %p454_p2  ;;  %s4671_s19 = smov [#allocation8]  }
  0x21   : > { %s5302_s2 = smov 64   ;;  %s5303_s18 = smov 4  }
  0x22   : > { %s465_s20 = sshll.u32 %s5322_s1, 4  ;;  %p3993_p4 = pneg %p4819_p3  ;;  %s466_s20 = int_to_ptr.hbm [resolvable:$true] %s465_s20 }
  0x23   : > { %s5323_s22 = scalar_select %p4819_p3, 1, 0 }
  0x24   : > { %p4831_p6 = pnand %p3993_p4, %p61_p1  ;;  %s494_s1 = sshll.u32 %s4671_s19, 4  ;;  %s495_s1 = int_to_ptr.vmem [resolvable:$true] %s494_s1 }
  0x25   : > { %5324 = sst [smem:[#allocation32_spill]] %s5323_s22  ;;  %s492_s26 = sshll.u32 %s5325_s3, 4  ;;  %s493_s26 = int_to_ptr.hbm [resolvable:$true] %s492_s26 }
  0x26   : > { %3996 = dma.hbm_to_vmem [thread:$0]  (!%p4831_p6), %s466_s20, 1536, %s468_s23, [#allocation6], %s5302_s2, %s5302_s2, %s5303_s18  }
  0x27   : > { %4002 = dma.hbm_to_vmem [thread:$0]  (!%p4831_p6), %s493_s26, 128, %s495_s1, [#allocation9]  }
  0x28   : > { %s5327_s5 = sld [smem:[#allocation38_spill]]  ;;  %s4674_s17 = smov [#allocation11]  }
  0x29   : > { %s519_s16 = sshll.u32 %s4674_s17, 4  ;;  %s5328_s8 = sld [smem:[#allocation41_spill]]  ;;  %s520_s16 = int_to_ptr.vmem [resolvable:$true] %s519_s16 }
  0x2a   : > { %s5304_s7 = smov 16   ;;  %s4676_s22 = smov 1  }
  0x2b   : > { %s4677_s20 = smov [#allocation14]   ;;  %s5329_s10 = sld [smem:[#allocation43_spill]] }
  0x2c   : > { %s550_s23 = sshll.u32 %s4677_s20, 4  ;;  %s604_s25 = sshll.u32 %s5289_s12, 4  ;;  %s551_s23 = int_to_ptr.vmem [resolvable:$true] %s550_s23  ;;  %s605_s25 = int_to_ptr.hbm [resolvable:$true] %s604_s25 }
  0x2d   : > { %s4679_s19 = smov [#allocation20]   ;;  %s4680_s26 = smov 128  }
  0x2e   : > { %s517_s3 = sshll.u32 %s5327_s5, 4  ;;  %s606_s20 = sshll.u32 %s4679_s19, 4  ;;  %s518_s3 = int_to_ptr.hbm [resolvable:$true] %s517_s3  ;;  %s607_s20 = int_to_ptr.vmem [resolvable:$true] %s606_s20 }
  0x2f   : > { %s548_s13 = sshll.u32 %s5328_s8, 4  ;;  %s5330_s15 = sld [smem:[#allocation35_spill]]  ;;  %s549_s13 = int_to_ptr.hbm [resolvable:$true] %s548_s13 }
  0x30   : > { %4008 = dma.hbm_to_vmem [thread:$0]  (!%p4831_p6), %s518_s3, 32, %s520_s16, [#allocation12], %s5304_s7, %s5304_s7, %s4676_s22  }
  0x31   : > { %s576_s17 = sshll.u32 %s5329_s10, 4  ;;  %s4678_s3 = smov [#allocation17]   ;;  %s577_s17 = int_to_ptr.hbm [resolvable:$true] %s576_s17 }
  0x32   : > { %4014 = dma.hbm_to_vmem [thread:$0]  (!%p4831_p6), %s549_s13, 2048, %s551_s23, [#allocation15], %s5302_s2, %s5302_s2, %s5303_s18  }
  0x33   : > { %s578_s16 = sshll.u32 %s4678_s3, 4  ;;  %s4681_s13 = smov 8   ;;  %s579_s16 = int_to_ptr.vmem [resolvable:$true] %s578_s16 }
  0x34   : > { %4020 = dma.hbm_to_vmem [thread:$0]  (!%p4831_p6), %s577_s17, 32, %s579_s16, [#allocation18], %s5304_s7, %s5304_s7, %s4676_s22  }
  0x35   : > { %4026 = dma.hbm_to_vmem [thread:$0]  (!%p4831_p6), %s605_s25, 4096, %s607_s20, [#allocation21], %s4680_s26, %s4680_s26, %s4681_s13  }
  0x36   : > { %s480_s24 = sshll.u32 %s5330_s15, 4  ;;  %s4682_s3 = smov [#allocation7]   ;;  %s481_s24 = int_to_ptr.hbm [resolvable:$true] %s480_s24 }
  0x37   : > { %s482_s2 = sshll.u32 %s4682_s3, 4  ;;  %s5331_s4 = sld [smem:[#allocation37_spill]]  ;;  %s483_s2 = int_to_ptr.vmem [resolvable:$true] %s482_s2 }
  0x38   : > { %3999 = dma.hbm_to_vmem [thread:$0]  (!%p4831_p6), %s481_s24, 16, %s483_s2, [#allocation6]  }
  0x39   : > { %s4683_s16 = smov [#allocation10]   ;;  %s5332_s6 = sld [smem:[#allocation39_spill]] }
  0x3a   : > { %s505_s19 = sshll.u32 %s4683_s16, 4  ;;  %s5333_s26 = smov 16   ;;  %s506_s19 = int_to_ptr.vmem [resolvable:$true] %s505_s19 }
  0x3b   : > { %s4684_s5 = smov [#allocation13]   ;;  %s5334_s9 = sld [smem:[#allocation42_spill]] }
  0x3c   : > { %s533_s18 = sshll.u32 %s4684_s5, 4  ;;  %s4685_s1 = smov 192   ;;  %s534_s18 = int_to_ptr.vmem [resolvable:$true] %s533_s18 }
  0x3d   : > { %s503_s17 = sshll.u32 %s5331_s4, 4  ;;  %s4686_s15 = smov 12   ;;  %s504_s17 = int_to_ptr.hbm [resolvable:$true] %s503_s17 }
  0x3e   : > { %4005 = dma.hbm_to_vmem [thread:$0]  (!%p4831_p6), %s504_s17, 32, %s506_s19, [#allocation9], %s5333_s26, %s5333_s26, %s4676_s22  }
  0x3f   : > { %s531_s20 = sshll.u32 %s5332_s6, 4  ;;  %s4687_s7 = smov [#allocation16]   ;;  %s532_s20 = int_to_ptr.hbm [resolvable:$true] %s531_s20 }
  0x40   : > { %4011 = dma.hbm_to_vmem [thread:$0]  (!%p4831_p6), %s532_s20, 6144, %s534_s18, [#allocation12], %s4685_s1, %s4685_s1, %s4686_s15  }
  0x41   : > { %s562_s23 = sshll.u32 %s5334_s9, 4  ;;  %s564_s24 = sshll.u32 %s4687_s7, 4  ;;  %s563_s23 = int_to_ptr.hbm [resolvable:$true] %s562_s23  ;;  %s565_s24 = int_to_ptr.vmem [resolvable:$true] %s564_s24 }
  0x42   : > { %s590_s17 = sshll.u32 %s5288_s11, 4  ;;  %s621_s20 = sshll.u32 %s5291_s14, 4  ;;  %s591_s17 = int_to_ptr.hbm [resolvable:$true] %s590_s17  ;;  %s622_s20 = int_to_ptr.hbm [resolvable:$true] %s621_s20 }
  0x43   : > { %4017 = dma.hbm_to_vmem [thread:$0]  (!%p4831_p6), %s563_s23, 32, %s565_s24, [#allocation15], %s5333_s26, %s5333_s26, %s4676_s22  }
  0x44   : > { %s4688_s5 = smov [#allocation19]   ;;  %s4689_s13 = smov [#allocation22]  }
  0x45   : > { %s592_s18 = sshll.u32 %s4688_s5, 4  ;;  %s623_s2 = sshll.u32 %s4689_s13, 4  ;;  %s593_s18 = int_to_ptr.vmem [resolvable:$true] %s592_s18  ;;  %s624_s2 = int_to_ptr.vmem [resolvable:$true] %s623_s2 }
  0x46   : > { %4023 = dma.hbm_to_vmem [thread:$0]  (!%p4831_p6), %s591_s17, 32, %s593_s18, [#allocation18], %s5333_s26, %s5333_s26, %s4676_s22  }
  0x47   : > { %s5335_s23 = smov 4   ;;  %s5336_s1 = smov 64  }
  0x48   : > { %4029 = dma.hbm_to_vmem [thread:$0]  (!%p4831_p6), %s622_s20, 4096, %s624_s2, [#allocation21], %s5336_s1, %s5336_s1, %s5335_s23  }
  0x49   : > { %s3179_s15 = sadd.s32 4294967294, %s4668_s30   ;;  %s4915_s7 = sadd.s32 1, %s4668_s30  }
  0x4a   : > { %s44_s24 = ssub.s32 %s4668_s30, %s4915_s7  ;;  %s47_s3 = sadd.s32 1, %s4664_s29 }
  0x4b   : > { %p45_p7 = scmp.eq.s32.totalorder %s44_s24, 0  ;;  %p54_p8 = scmp.ne.s32.totalorder %s4664_s29, %s4660_s28 }
  0x4c   : > { %p55_p9 = scmp.eq.s32.totalorder %s4668_s30, 0  ;;  %p60_p10 = scmp.ne.s32.totalorder %s4660_s28, %s4656_s27 }
  0x4d   : > { %s4926_s22 = scalar_select %p45_p7, %s4664_s29, %s47_s3  }
  0x4e   : > { %p4928_p11 = por %p55_p9, %p54_p8  ;;  %p4934_p12 = por %p61_p1, %p60_p10 }
  0x4f   : > { %p441_p13 = scmp.eq.s32.totalorder %s4814_s21, 1  ;;  %p447_p0 = scmp.eq.s32.totalorder %s3179_s15, 1 }
  0x50   : > { %p4050_p2 = scmp.lt.s32.totalorder %s4668_s30, 2  ;;  %s646_s16 = sand.u32 1, %s4664_s29  }
  0x51   : > { %p4941_p4 = por %p441_p13, %p54_p8  ;;  %p4945_p6 = por %p447_p0, %p60_p10 }
  0x52   : > { %s3194_s25 = sshll.u32 %s646_s16, 3  ;;  %s3800_s20 = sshll.u32 %s4668_s30, 3 }
  0x53   : > { %s5341_s13 = sld [smem:[#allocation33_spill]]  ;;  %s650_s23 = scalar_lea.vmem [#allocation2], %s3194_s25 }
  0x54   : > { %s659_s1 = sshll.u32 %s650_s23, 4  ;;  %p4955_p7 = pnand %p4050_p2, %p4928_p11  ;;  %s660_s1 = int_to_ptr.vmem [resolvable:$true] %s659_s1 }
  0x55   : > { %s647_s3 = scalar_lea.sflag [#allocation3], %s646_s16 }
  0x56   : > { %p4552_p9 = pneg %p4955_p7 }
  0x59   : > { %s655_s2 = scalar_lea.hbm %s5341_s13, %s3800_s20  ;;  %s4555_s5 = scalar_lea.hbm %s5341_s13, 16 }
  0x5a   : > { %s657_s24 = sshll.u32 %s655_s2, 4  ;;  %s658_s24 = int_to_ptr.hbm [resolvable:$true] %s657_s24 }
  0x5b   : > { %s4548_s4 = sshra.s32 %s658_s24, 4  ;;  %s4549_s4 = int_to_ptr.hbm [resolvable:$true] %s4548_s4 }
  0x5c   : > { %s4550_s6 = scalar_lea.hbm %s4549_s4, 8  ;;  %p4556_p11 = scmp.lt.s32.totalorder %s4549_s4, %s5341_s13 }
  0x5d   : > { %p4551_p8 = scmp.ne.s32.totalorder %s4549_s4, %s4550_s6  ;;  %p4557_p0 = scmp.lt.s32.totalorder %s4555_s5, %s4550_s6 }
  0x5f   : > { %p4553_p10 = pnand %p4552_p9, %p4551_p8  ;;  %p4558_p2 = por %p4557_p0, %p4556_p11 }
  0x61   : > { %p4554_p13 = pneg %p4553_p10 }
  0x63   : > { %p4559_p5 = pnand %p4558_p2, %p4554_p13 }
  0x65   : > { %4562 = shalt.err (!%p4559_p5)
}
  0x66   : > { %4033 = dma.hbm_to_vmem [thread:$0]  (!%p4955_p7), %s658_s24, 128, %s660_s1, %s647_s3  }
  0x67   : > { %668 = sbr.rel (%p4819_p3) target bundleno = 4374 (0x1116), region = 92  ;;  %s4972_s2 = sand.u32 (!%p4819_p3), 1, %s4660_s28  }
  0x68   : > { %s3198_s23 = sshll.u32 (!%p4819_p3), %s4972_s2, 3  ;;  %s671_s25 = scalar_lea.sflag (!%p4819_p3), [#allocation3], %s4972_s2 }
  0x69   : > { %s674_s20 = scalar_lea.vmem (!%p4819_p3), [#allocation2], %s3198_s23 }
  0x6c   : > { %4623 = dma.done.wait (%p4934_p12), %s671_s25, 128  }
  0x6d   : > { %4625 = vsyncadd (%p4934_p12), %s671_s25, 4294967168 }
  0x6e   : > { %4627 = dma.done.wait (%p61_p1), [#allocation6], 1552  }
  0x6f   : > { %4629 = vsyncadd (%p61_p1), [#allocation6], 4294965744 }
  0x70   : > { %4631 = dma.done.wait (%p61_p1), [#allocation9], 160  }
  0x71   : > { %4633 = vsyncadd (%p61_p1), [#allocation9], 4294967136 }
  0x72   : > { %4635 = dma.done.wait (%p61_p1), [#allocation12], 6176  }
  0x73   : > { %4637 = vsyncadd (%p61_p1), [#allocation12], 4294961120 }
  0x74   : > { %4639 = dma.done.wait (%p61_p1), [#allocation15], 2080  }
  0x75   : > { %4641 = vsyncadd (%p61_p1), [#allocation15], 4294965216 }
  0x76   : > { %4643 = dma.done.wait (%p61_p1), [#allocation18], 64  }
  0x77   : > { %4645 = vsyncadd (%p61_p1), [#allocation18], 4294967232 }
  0x78   : > { %4647 = dma.done.wait (%p61_p1), [#allocation21], 8192  }
  0x79   : > { %4649 = vsyncadd (%p61_p1), [#allocation21], 4294959104  ;;  %v3808_v0 = vld [vmem:[#allocation5 + $0x38] sm:$0xff]  ;;  %v3807_v2 = vld [vmem:[#allocation5 + $0x30] sm:$0xff]  ;;  %vm896_vm0 = vcmask 523264   ;;  %v4690_v26 = vmov 128.0  }
  0x7a   : > { %v3812_v1 = vld [vmem:[#allocation5 + $0x58] sm:$0xff]  ;;  %900 = vmatpush.bf16.msra.mxu0 %v3808_v0  ;;  %v3811_v3 = vld [vmem:[#allocation5 + $0x50] sm:$0xff]  ;;  %v3806_v4 = vld [vmem:[#allocation5 + $0x28] sm:$0xff]  ;;  %4136 = vrcp.f32 %v4690_v26  ;;  %s5344_s26 = sld [smem:[#allocation40_spill]]  ;;  %vm1356_vm5 = vcmask 1043456   ;;  %vm1219_vm6 = vcmask 261120  }
  0x7b   : > { %917 = vmatpush.bf16.msra.mxu2 %v3812_v1  ;;  %v3810_v5 = vld [vmem:[#allocation5 + $0x48] sm:$0xff]  ;;  %v789_v6 = vld [vmem:[%s674_s20] sm:$0xff]  ;;  %v3805_v8 = vld [vmem:[#allocation5 + $0x20] sm:$0xff]  ;;  %s4691_s1 = smov 32   ;;  %s4692_s24 = smov 96   ;;  %vm1304_vm8 = vcmask 64512  }
  0x7c   : > { %v820_v7 = vunpack.c.h.b16 %v789_v6  ;;  %v3809_v9 = vld [vmem:[#allocation5 + $0x40] sm:$0xff]  ;;  %v3804_v11 = vld [vmem:[#allocation5 + $0x18] sm:$0xff]  ;;  %v3803_v12 = vld [vmem:[#allocation5 + $0x10] sm:$0xff]  ;;  %v819_v14 = vunpack.c.l.b16 %v789_v6  ;;  %s4693_s15 = smov 64   ;;  %vm1444_vm9 = vcmask 785408   ;;  %s5345_s18 = sld [smem:[#allocation44_spill]] }
  0x7d   : > { %v3802_v13 = vld [vmem:[#allocation5 + $0x8] sm:$0xff]  ;;  %v3801_v15 = vld [vmem:[#allocation5] sm:$0xff]  ;;  %v3347_v27 = vld [vmem:[#allocation13 + $0xa8] sm:$0xf]  ;;  %s5346_s23 = sld [smem:[#allocation45_spill]]  ;;  %s3797_s3 = sshll.u32 %s4814_s21, 2 }
  0x7e   : > { %901 = vmatpush.bf16.msra.mxu0 %v3807_v2  ;;  %v822_v10 = vpack.c.b16 %v820_v7, %v820_v7  ;;  %v821_v16 = vpack.c.b16 %v819_v14, %v819_v14  ;;  %v4121_v18 = vld [vmem:[#allocation7] ss:$0 sm:$0xff]  ;;  %v926_v22 = vld [vmem:[#allocation8] sm:$0xff]  ;;  %v3834_v29 = vld [vmem:[#allocation13 + $0xac] sm:$0xf]  ;;  %s5347_s16 = sld [smem:[#allocation46_spill]] }
  0x7f   : > { %918 = vmatpush.bf16.msra.mxu2 %v3811_v3  ;;  %v3835_v28 = vld [vmem:[#allocation13 + $0xb0] sm:$0xf0]  ;;  %v3349_v31 = vld [vmem:[#allocation13 + $0xb4] sm:$0xf0]  ;;  %v3355_v32 = vld [vmem:[#allocation13 + $0xb0] sm:$0xf] }
  0x80   : > { %v3348_v30 = vor.u32 %v3835_v28, %v3347_v27  ;;  %v3836_v33 = vld [vmem:[#allocation13 + $0xb8] sm:$0xf0]  ;;  %v3352_v34 = vor.u32 %v3834_v29, %v3349_v31  ;;  %v4137_v36 = vpop.eup %4136  ;;  %v3335_v46 = vld [vmem:[#allocation13 + $0x90] sm:$0xf]  ;;  %v3831_v48 = vld [vmem:[#allocation13 + $0x94] sm:$0xf] }
  0x81   : > { %v3356_v35 = vor.u32 %v3836_v33, %v3355_v32  ;;  %v937_v37 = vmul.f32 128.0, %v4137_v36  ;;  %vm941_vm1 = vweird.f32 %v4137_v36  ;;  %v3832_v47 = vld [vmem:[#allocation13 + $0x98] sm:$0xf0]  ;;  %v3337_v50 = vld [vmem:[#allocation13 + $0x9c] sm:$0xf0]  ;;  %s5348_s4 = sld [smem:[#allocation47_spill]] }
  0x82   : > { %902 = vmatpush.bf16.msra.mxu0 %v3806_v4  ;;  %1151 = vmatpush.bf16.msra.mxu3 %v3352_v34  ;;  %v3336_v49 = vor.u32 %v3832_v47, %v3335_v46  ;;  %v3343_v51 = vld [vmem:[#allocation13 + $0x98] sm:$0xf]  ;;  %v3833_v52 = vld [vmem:[#allocation13 + $0xa0] sm:$0xf0]  ;;  %v3340_v53 = vor.u32 %v3831_v48, %v3337_v50  ;;  %v3828_v57 = vld [vmem:[#allocation13 + $0x7c] sm:$0xf] }
  0x83   : > { %919 = vmatpush.bf16.msra.mxu2 %v3810_v5  ;;  %1164 = vmatpush.bf16.msra.mxu1 %v3356_v35  ;;  %v938_v38 = vsub.f32 1.0, %v937_v37  ;;  %v3344_v54 = vor.u32 %v3833_v52, %v3343_v51  ;;  %v3323_v55 = vld [vmem:[#allocation13 + $0x78] sm:$0xf]  ;;  %v3829_v56 = vld [vmem:[#allocation13 + $0x80] sm:$0xf0]  ;;  %s2980_s5 = scalar_lea.sflag [#allocation4], %s4972_s2 }
  0x84   : > { %v3324_v58 = vor.u32 %v3829_v56, %v3323_v55  ;;  %v3325_v59 = vld [vmem:[#allocation13 + $0x84] sm:$0xf0]  ;;  %v3331_v60 = vld [vmem:[#allocation13 + $0x80] sm:$0xf]  ;;  %v3830_v61 = vld [vmem:[#allocation13 + $0x88] sm:$0xf0] }
  0x85   : > { %v939_v39 = vmul.f32 %v4137_v36, %v938_v38  ;;  %v3328_v62 = vor.u32 %v3828_v57, %v3325_v59  ;;  %v3332_v63 = vor.u32 %v3830_v61, %v3331_v60  ;;  %v3311_v0 = vld [vmem:[#allocation13 + $0x60] sm:$0xf]  ;;  %v3826_v1 = vld [vmem:[#allocation13 + $0x68] sm:$0xf0]  ;;  %v3825_v2 = vld [vmem:[#allocation13 + $0x64] sm:$0xf] }
  0x86   : > { %903 = vmatpush.bf16.msra.mxu0 %v3805_v8  ;;  %1152 = vmatpush.bf16.msra.mxu3 %v3340_v53  ;;  %v3312_v3 = vor.u32 %v3826_v1, %v3311_v0  ;;  %v3313_v4 = vld [vmem:[#allocation13 + $0x6c] sm:$0xf0]  ;;  %v3319_v5 = vld [vmem:[#allocation13 + $0x68] sm:$0xf]  ;;  %v3827_v6 = vld [vmem:[#allocation13 + $0x70] sm:$0xf0] }
  0x87   : > { %920 = vmatpush.bf16.msra.mxu2 %v3809_v9  ;;  %v940_v40 = vadd.f32 %v4137_v36, %v939_v39  ;;  %1165 = vmatpush.bf16.msra.mxu1 %v3344_v54  ;;  %v3316_v7 = vor.u32 %v3825_v2, %v3313_v4  ;;  %v3320_v8 = vor.u32 %v3827_v6, %v3319_v5  ;;  %v3299_v9 = vld [vmem:[#allocation13 + $0x48] sm:$0xf]  ;;  %v3307_v14 = vld [vmem:[#allocation13 + $0x50] sm:$0xf]  ;;  %v3275_v28 = vld [vmem:[#allocation13 + $0x18] sm:$0xf] }
  0x88   : > { %v3817_v29 = vld [vmem:[#allocation13 + $0x20] sm:$0xf0]  ;;  %v3277_v32 = vld [vmem:[#allocation13 + $0x24] sm:$0xf0]  ;;  %v3283_v33 = vld [vmem:[#allocation13 + $0x20] sm:$0xf] }
  0x89   : > { %v5008_v41 = vsel %vm941_vm1, %v4137_v36, %v940_v40  ;;  %v3276_v31 = vor.u32 %v3817_v29, %v3275_v28  ;;  %v3818_v34 = vld [vmem:[#allocation13 + $0x28] sm:$0xf0]  ;;  %v3263_v37 = vld [vmem:[#allocation13] sm:$0xf]  ;;  %v3813_v39 = vld [vmem:[#allocation13 + $0x4] sm:$0xf] }
  0x8a   : > { %3260 = vmatmul.msk.bf16.vlgmr.msra.gmra.mxu2 %vm896_vm0, %v822_v10  ;;  %904 = vmatpush.bf16.msra.mxu0 %v3804_v11  ;;  %v3823_v10 = vld [vmem:[#allocation13 + $0x50] sm:$0xf0]  ;;  %v3822_v11 = vld [vmem:[#allocation13 + $0x4c] sm:$0xf]  ;;  %v3284_v36 = vor.u32 %v3818_v34, %v3283_v33  ;;  %v4122_v57 = vld [vmem:[#allocation10] ss:$0 sm:$0xff] }
  0x8b   : > { %1138 = vmatpush.bf16.msrb.mxu2 %v3348_v30  ;;  %1153 = vmatpush.bf16.msra.mxu3 %v3328_v62  ;;  %v3816_v30 = vld [vmem:[#allocation13 + $0x1c] sm:$0xf]  ;;  %v3814_v38 = vld [vmem:[#allocation13 + $0x8] sm:$0xf0]  ;;  %v1002_v0 = vld [vmem:[%s5344_s26] sm:$0x7] }
  0x8c   : > { %1166 = vmatpush.bf16.msra.mxu1 %v3332_v63  ;;  %v3280_v35 = vor.u32 %v3816_v30, %v3277_v32  ;;  %v3264_v40 = vor.u32 %v3814_v38, %v3263_v37  ;;  %v4123_v60 = vld [vmem:[#allocation11] ss:$0 sm:$0xff]  ;;  %v1006_v1 = vperm.slane %v1002_v0, 2  ;;  %v1004_v4 = vperm.slane %v1002_v0, 0 }
  0x8d   : > { %v1005_v5 = vperm.slane %v1002_v0, 1 }
  0x8e   : > { %905 = vmatpush.bf16.msra.mxu0 %v3803_v12  ;;  %v3300_v12 = vor.u32 %v3823_v10, %v3299_v9 }
  0x8f   : > { %1139 = vmatpush.bf16.msrb.mxu2 %v3336_v49  ;;  %1154 = vmatpush.bf16.msra.mxu3 %v3316_v7 }
  0x90   : > { %1167 = vmatpush.bf16.msra.mxu1 %v3320_v8 }
  0x92   : > { %906 = vmatpush.bf16.msra.mxu0 %v3802_v13  ;;  %v3301_v13 = vld [vmem:[#allocation13 + $0x54] sm:$0xf0] }
  0x93   : > { %1140 = vmatpush.bf16.msrb.mxu2 %v3324_v58 }
  0x96   : > { %907 = vmatpush.bf16.msra.mxu0 %v3801_v15  ;;  %v3824_v15 = vld [vmem:[#allocation13 + $0x58] sm:$0xf0] }
  0x97   : > { %1141 = vmatpush.bf16.msrb.mxu2 %v3312_v3 }
  0x99   : > { %908 = vmatmul.bf16.vlgmr.msra.gmra.mxu0 %v821_v16  ;;  %v3304_v16 = vor.u32 %v3822_v11, %v3301_v13 }
  0x9b   : > { %1142 = vmatpush.bf16.msrb.mxu2 %v3300_v12  ;;  %1155 = vmatpush.bf16.msra.mxu3 %v3304_v16 }
 0x10d   : > { %v922_v17 = vpop.f32.mrf.mxu2 }
 0x115   : > { %v924_v19 = vpop.f32.mrf.mxu2 }
 0x116   : > { %v909_v20 = vpop.f32.mrf.mxu0  ;;  %v3820_v19 = vld [vmem:[#allocation13 + $0x38] sm:$0xf0] }
 0x117   : > { %v910_v21 = vadd.f32 %v4121_v18, %v909_v20  ;;  %v3287_v18 = vld [vmem:[#allocation13 + $0x30] sm:$0xf]  ;;  %v3819_v20 = vld [vmem:[#allocation13 + $0x34] sm:$0xf] }
 0x119   : > { %v923_v23 = vadd.f32 %v922_v17, %v910_v21  ;;  %v3308_v17 = vor.u32 %v3824_v15, %v3307_v14  ;;  %v3288_v21 = vor.u32 %v3820_v19, %v3287_v18 }
 0x11b   : > { %v5005_v24 = vadd.f32 %v926_v22, %v923_v23  ;;  %1168 = vmatpush.bf16.msra.mxu1 %v3308_v17  ;;  %v3289_v22 = vld [vmem:[#allocation13 + $0x3c] sm:$0xf0]  ;;  %v3295_v23 = vld [vmem:[#allocation13 + $0x38] sm:$0xf]  ;;  %1143 = vmatpush.bf16.msrb.mxu2 %v3288_v21 }
 0x11c   : > { %v3292_v26 = vor.u32 %v3819_v20, %v3289_v22 }
 0x11d   : > { %934 = vadd.xlane.f32.xlu0 %v5005_v24 }
 0x11e   : > { %v911_v25 = vpop.f32.mrf.mxu0  ;;  %1156 = vmatpush.bf16.msra.mxu3 %v3292_v26 }
 0x11f   : > { %v3821_v25 = vld [vmem:[#allocation13 + $0x40] sm:$0xf0]  ;;  %1144 = vmatpush.bf16.msrb.mxu2 %v3276_v31 }
 0x120   : > { %v3296_v27 = vor.u32 %v3821_v25, %v3295_v23 }
 0x122   : > { %1169 = vmatpush.bf16.msra.mxu1 %v3296_v27  ;;  %1157 = vmatpush.bf16.msra.mxu3 %v3280_v35  ;;  %v928_v35 = vlaneseq }
 0x123   : > { %1145 = vmatpush.bf16.msrb.mxu2 %v3264_v40  ;;  %v4694_v40 = vmov -1e+30  }
 0x126   : > { %1170 = vmatpush.bf16.msra.mxu1 %v3284_v36  ;;  %v929_v36 = vand.u32 127, %v928_v35 }
 0x128   : > { %vm930_vm7 = vcmp.lt.s32.totalorder %v929_v36, 5 }
 0x190   : > { %v935_v42 = vpop.xlane.xlu0 %934 }
 0x191   : > { %v943_v43 = vmul.f32 %v5008_v41, %v935_v42  ;;  %v3265_v42 = vld [vmem:[#allocation13 + $0xc] sm:$0xf0] }
 0x192   : > { %v3268_v46 = vor.u32 %v3813_v39, %v3265_v42  ;;  %v5040_v42 = vsel %vm930_vm7, 0.0, %v4694_v40 }
 0x193   : > { %v5012_v44 = vsub.f32 %v5005_v24, %v943_v43  ;;  %v3271_v43 = vld [vmem:[#allocation13 + $0x8] sm:$0xf] }
 0x194   : > { %1158 = vmatpush.bf16.msra.mxu3 %v3268_v46 }
 0x195   : > { %v945_v45 = vmul.f32 %v5012_v44, %v5012_v44 }
 0x197   : > { %946 = vadd.xlane.f32.xlu0 %v945_v45  ;;  %v3815_v45 = vld [vmem:[#allocation13 + $0x10] sm:$0xf0] }
 0x198   : > { %v3272_v47 = vor.u32 %v3815_v45, %v3271_v43 }
 0x19a   : > { %1171 = vmatpush.bf16.msra.mxu1 %v3272_v47 }
 0x20a   : > { %v947_v48 = vpop.xlane.xlu0 %946 }
 0x20b   : > { %v948_v49 = vmul.f32 %v947_v48, %v5008_v41 }
 0x20d   : > { %v949_v50 = vadd.f32 1e-06, %v948_v49 }
 0x20f   : > { %4138 = vrsqrt.f32 %v949_v50  ;;  %vm956_vm3 = vweird.f32 %v949_v50 }
 0x215   : > { %v4139_v51 = vpop.eup %4138 }
 0x216   : > { %v951_v52 = vmul.f32 %v4139_v51, %v949_v50  ;;  %vm957_vm2 = vweird.f32 %v4139_v51 }
 0x217   : > { %vm958_vm4 = vmor %vm956_vm3, %vm957_vm2 }
 0x218   : > { %v952_v53 = vmul.f32 %v4139_v51, %v951_v52 }
 0x21a   : > { %v953_v54 = vmul.f32 0.5, %v952_v53 }
 0x21c   : > { %v954_v55 = vsub.f32 1.5, %v953_v54 }
 0x21e   : > { %v955_v56 = vmul.f32 %v4139_v51, %v954_v55 }
 0x220   : > { %v959_v58 = vsel %vm958_vm4, %v4139_v51, %v955_v56 }
 0x221   : > { %v960_v59 = vmul.f32 %v959_v58, %v5012_v44 }
 0x223   : > { %v964_v61 = vmul.f32 %v4122_v57, %v960_v59 }
 0x225   : > { %v968_v62 = vadd.f32 %v4123_v60, %v964_v61 }
 0x227   : > { %v969_v63 = vpack.c.bf16 %v968_v62, %v968_v62 }
 0x229   : > { %1146 = vmatmul.bf16.vlgmr.msrb.gmra.mxu2 %v969_v63  ;;  %1159 = vmatmul.bf16.vlgmr.msra.gmra.mxu3 %v969_v63 }
 0x22a   : > { %1172 = vmatmul.bf16.vlgmr.msra.gmra.mxu1 %v969_v63 }
 0x2a7   : > { %v1173_v2 = vpop.f32.mrf.mxu1 }
 0x2a8   : > { %v5021_v3 = vadd.f32 %v1173_v2, %v1006_v1 }
 0x2aa   : > { %v1215_v44 = vpack.c.bf16 %v5021_v3, %v5021_v3 }
 0x2ac   : > { %v1147_v6 = vpop.f32.mrf.mxu2  ;;  %v1160_v7 = vpop.f32.mrf.mxu3  ;;  %v1358_v8 = vsel %vm1356_vm5, %v1215_v44, 0 }
 0x2ad   : > { %v1148_v9 = vadd.f32 %v1147_v6, %v1004_v4  ;;  %v1161_v10 = vadd.f32 %v1160_v7, %v1005_v5  ;;  %1367 = vmatpush.bf16.msrb.mxu1 %v1358_v8 }
 0x2af   : > { %v1175_v11 = vpop.f32.mrf.mxu1  ;;  %1198 = vrot.lane.b32.xlu0 %v1161_v10, %s4691_s1  ;;  %1192 = vrot.lane.b32.xlu1 %v1161_v10, %s4692_s24  ;;  %v1201_v12 = vpack.c.bf16 %v1161_v10, %v1161_v10  ;;  %v1187_v16 = vpack.c.bf16 %v1148_v9, %v1148_v9 }
 0x2b0   : > { %1178 = vrot.lane.b32.xlu2 %v1148_v9, %s4692_s24 }
 0x2b1   : > { %v1224_v13 = vsel %vm1219_vm6, %v1201_v12, 0 }
 0x2b2   : > { %1233 = vmatpush.bf16.xpose.msrb.mxu0 %v1224_v13 }
 0x2b4   : > { %v1149_v14 = vpop.f32.mrf.mxu2  ;;  %v1162_v15 = vpop.f32.mrf.mxu3 }
 0x2b7   : > { %1195 = vrot.lane.b32.xlu1 %v1161_v10, %s4693_s15 }
 0x2b8   : > { %1181 = vrot.lane.b32.xlu2 %v1148_v9, %s4693_s15 }
 0x2b9   : > { %3357 = vmatmul.msk.bf16.vlgmr.msrb.gmra.mxu0 %vm1219_vm6, %v1187_v16 }
 0x2bf   : > { %1184 = vrot.lane.b32.xlu1 %v1148_v9, %s4691_s1 }
 0x30a   : > { %v1179_v23 = vpop.permute.xlu2 %1178 }
 0x30b   : > { %v1188_v26 = vpack.c.bf16 %v1179_v23, %v1179_v23 }
 0x312   : > { %v1182_v29 = vpop.permute.xlu2 %1181 }
 0x313   : > { %v1189_v31 = vpack.c.bf16 %v1182_v29, %v1182_v29 }
 0x321   : > { %v1199_v17 = vpop.permute.xlu0 %1198  ;;  %v1193_v18 = vpop.permute.xlu1 %1192 }
 0x322   : > { %v1204_v19 = vpack.c.bf16 %v1199_v17, %v1199_v17  ;;  %v1202_v20 = vpack.c.bf16 %v1193_v18, %v1193_v18 }
 0x324   : > { %v1281_v21 = vsel %vm1219_vm6, %v1204_v19, 0  ;;  %v1243_v22 = vsel %vm1219_vm6, %v1202_v20, 0 }
 0x325   : > { %1252 = vmatpush.bf16.xpose.msra.mxu2 %v1243_v22  ;;  %1290 = vmatpush.bf16.xpose.msra.mxu0 %v1281_v21 }
 0x329   : > { %v1196_v25 = vpop.permute.xlu1 %1195 }
 0x32a   : > { %v1203_v27 = vpack.c.bf16 %v1196_v25, %v1196_v25 }
 0x32c   : > { %3358 = vmatmul.msk.bf16.vlgmr.msra.gmra.mxu2 %vm1219_vm6, %v1188_v26  ;;  %v1262_v28 = vsel %vm1219_vm6, %v1203_v27, 0 }
 0x32d   : > { %1271 = vmatpush.bf16.xpose.msrb.mxu3 %v1262_v28 }
 0x331   : > { %v1185_v30 = vpop.permute.xlu1 %1184 }
 0x332   : > { %v1190_v32 = vpack.c.bf16 %v1185_v30, %v1185_v30 }
 0x334   : > { %3359 = vmatmul.msk.bf16.vlgmr.msrb.gmra.mxu3 %vm1219_vm6, %v1189_v31  ;;  %3360 = vmatmul.msk.bf16.vlgmr.msra.gmra.mxu0 %vm1219_vm6, %v1190_v32 }
 0x336   : > { %v1235_v33 = vpop.f32.mrf.mxu0 }
 0x337   : > { %v1296_v46 = vmul.f32 0.17677669, %v1235_v33 }
 0x339   : > { %v1300_v53 = vadd.f32 %v1296_v46, %v5040_v42 }
 0x33b   : > { %v1305_v57 = vsel %vm1304_vm8, %v1300_v53, -inf }
 0x33e   : > { %v1237_v34 = vpop.f32.mrf.mxu0 }
 0x3af   : > { %v1254_v37 = vpop.f32.mrf.mxu2 }
 0x3b0   : > { %v1297_v38 = vmul.f32 0.17677669, %v1254_v37 }
 0x3b1   : > { %v1292_v39 = vpop.f32.mrf.mxu0 }
 0x3b2   : > { %v1299_v43 = vmul.f32 0.17677669, %v1292_v39  ;;  %v1301_v45 = vadd.f32 %v1297_v38, %v5040_v42 }
 0x3b4   : > { %v1308_v47 = vsel %vm1304_vm8, %v1301_v45, -inf  ;;  %v1303_v48 = vadd.f32 %v1299_v43, %v5040_v42 }
 0x3b5   : > { %1309 = vmax.xlane.f32.xlu2 %v1308_v47 }
 0x3b6   : > { %v1314_v49 = vsel %vm1304_vm8, %v1303_v48, -inf }
 0x3b7   : > { %v1256_v50 = vpop.f32.mrf.mxu2  ;;  %v1273_v51 = vpop.f32.mrf.mxu3  ;;  %1315 = vmax.xlane.f32.xlu0 %v1314_v49  ;;  %v3844_v49 = vld [vmem:[#allocation14 + $0x38] sm:$0xff] }
 0x3b8   : > { %v1298_v52 = vmul.f32 0.17677669, %v1273_v51  ;;  %1511 = vmatpush.bf16.msra.mxu1 %v3844_v49  ;;  %v3407_v49 = vld [vmem:[#allocation20 + $0x10] sm:$0xf] }
 0x3b9   : > { %v1294_v54 = vpop.f32.mrf.mxu0 }
 0x3ba   : > { %v1302_v55 = vadd.f32 %v1298_v52, %v5040_v42  ;;  %v3843_v52 = vld [vmem:[#allocation14 + $0x30] sm:$0xff]  ;;  %v3841_v54 = vld [vmem:[#allocation14 + $0x20] sm:$0xff] }
 0x3bc   : > { %v1311_v56 = vsel %vm1304_vm8, %v1302_v55, -inf  ;;  %1512 = vmatpush.bf16.msra.mxu1 %v3843_v52 }
 0x3bd   : > { %1312 = vmax.xlane.f32.xlu1 %v1311_v56  ;;  %1306 = vmax.xlane.f32.xlu2 %v1305_v57  ;;  %v3839_v56 = vld [vmem:[#allocation14 + $0x10] sm:$0xff]  ;;  %v3838_v57 = vld [vmem:[#allocation14 + $0x8] sm:$0xff] }
 0x3bf   : > { %v1275_v58 = vpop.f32.mrf.mxu3 }
 0x3c0   : > { %v3837_v58 = vld [vmem:[#allocation14] sm:$0xff] }
 0x428   : > { %v1310_v59 = vpop.xlane.xlu2 %1309 }
 0x429   : > { %v1318_v60 = vsub.f32 %v1301_v45, %v1310_v59 }
 0x42a   : > { %v1316_v61 = vpop.xlane.xlu0 %1315 }
 0x42b   : > { %v1323_v62 = vmul.f32 1.442695, %v1318_v60  ;;  %v1320_v63 = vsub.f32 %v1303_v48, %v1316_v61 }
 0x42d   : > { %4140 = vpow2.f32 %v1323_v62  ;;  %v1327_v0 = vmul.f32 1.442695, %v1320_v63 }
 0x42f   : > { %4142 = vpow2.f32 %v1327_v0 }
 0x430   : > { %v1313_v1 = vpop.xlane.xlu1 %1312  ;;  %v1307_v10 = vpop.xlane.xlu2 %1306 }
 0x431   : > { %v1319_v2 = vsub.f32 %v1302_v55, %v1313_v1  ;;  %v1317_v11 = vsub.f32 %v1300_v53, %v1307_v10  ;;  %v3842_v53 = vld [vmem:[#allocation14 + $0x28] sm:$0xff]  ;;  %v3840_v55 = vld [vmem:[#allocation14 + $0x18] sm:$0xff] }
 0x432   : > { %1513 = vmatpush.bf16.msra.mxu1 %v3842_v53  ;;  %v3409_v53 = vld [vmem:[#allocation20 + $0x18] sm:$0xf0] }
 0x433   : > { %v4141_v4 = vpop.eup %4140  ;;  %v1325_v5 = vmul.f32 1.442695, %v1319_v2  ;;  %v1321_v12 = vmul.f32 1.442695, %v1317_v11  ;;  %v4124_v2 = vld [vmem:[#allocation16] ss:$0 sm:$0xff] }
 0x434   : > { %v1332_v44 = vsel %vm1304_vm8, %v4141_v4, 0.0  ;;  %v3457_v11 = vld [vmem:[#allocation20 + $0x78] sm:$0xf0] }
 0x435   : > { %v4143_v6 = vpop.eup %4142  ;;  %4144 = vpow2.f32 %v1325_v5  ;;  %1333 = vadd.xlane.f32.xlu2 %v1332_v44 }
 0x436   : > { %v1338_v7 = vsel %vm1304_vm8, %v4143_v6, 0.0  ;;  %4146 = vpow2.f32 %v1321_v12  ;;  %1514 = vmatpush.bf16.msra.mxu1 %v3841_v54  ;;  %v3399_v54 = vld [vmem:[#allocation20] sm:$0xf] }
 0x437   : > { %1339 = vadd.xlane.f32.xlu0 %v1338_v7  ;;  %v3455_v7 = vld [vmem:[#allocation20 + $0x70] sm:$0xf] }
 0x43a   : > { %1515 = vmatpush.bf16.msra.mxu1 %v3840_v55  ;;  %v3846_v55 = vld [vmem:[#allocation20 + $0x4] sm:$0xf0] }
 0x43b   : > { %v4145_v8 = vpop.eup %4144 }
 0x43c   : > { %v1335_v9 = vsel %vm1304_vm8, %v4145_v8, 0.0  ;;  %v4147_v13 = vpop.eup %4146 }
 0x43d   : > { %1336 = vadd.xlane.f32.xlu1 %v1335_v9  ;;  %v1329_v14 = vsel %vm1304_vm8, %v4147_v13, 0.0  ;;  %v3859_v9 = vld [vmem:[#allocation20 + $0x74] sm:$0xf] }
 0x43e   : > { %1516 = vmatpush.bf16.msra.mxu1 %v3839_v56  ;;  %v3460_v12 = vor.u32 %v3859_v9, %v3457_v11 }
 0x442   : > { %1517 = vmatpush.bf16.msra.mxu1 %v3838_v57  ;;  %v3845_v57 = vld [vmem:[#allocation20 + $0x4] sm:$0xf] }
 0x446   : > { %1518 = vmatpush.bf16.msra.mxu1 %v3837_v58  ;;  %v3401_v58 = vld [vmem:[#allocation20 + $0x8] sm:$0xf0] }
 0x44b   : > { %1212 = vrot.lane.b32.xlu0 %v5021_v3, %s4691_s1 }
 0x44d   : > { %1206 = vrot.lane.b32.xlu2 %v5021_v3, %s4692_s24 }
 0x456   : > { %1209 = vrot.lane.b32.xlu1 %v5021_v3, %s4693_s15 }
 0x476   : > { %1330 = vadd.xlane.f32.xlu2 %v1329_v14 }
 0x4a8   : > { %v1334_v15 = vpop.xlane.xlu2 %1333 }
 0x4a9   : > { %4148 = vrcp.f32 %v1334_v15 }
 0x4aa   : > { %v1340_v20 = vpop.xlane.xlu0 %1339 }
 0x4ab   : > { %4150 = vrcp.f32 %v1340_v20  ;;  %v3449_v20 = vld [vmem:[#allocation20 + $0x68] sm:$0xf0] }
 0x4af   : > { %v4149_v16 = vpop.eup %4148 }
 0x4b0   : > { %v1207_v17 = vpop.permute.xlu2 %1206  ;;  %v1346_v18 = vmul.f32 %v4149_v16, %v4141_v4  ;;  %v1337_v23 = vpop.xlane.xlu1 %1336  ;;  %v3447_v16 = vld [vmem:[#allocation20 + $0x60] sm:$0xf] }
 0x4b1   : > { %v1216_v19 = vpack.c.bf16 %v1207_v17, %v1207_v17  ;;  %v4151_v3 = vpop.eup %4150  ;;  %4152 = vrcp.f32 %v1337_v23  ;;  %v3858_v17 = vld [vmem:[#allocation20 + $0x64] sm:$0xf0]  ;;  %v3855_v23 = vld [vmem:[#allocation20 + $0x54] sm:$0xf] }
 0x4b2   : > { %v1350_v22 = vpack.c.bf16 %v1346_v18, %v1346_v18  ;;  %v1348_v26 = vmul.f32 %v4151_v3, %v4143_v6  ;;  %v3857_v18 = vld [vmem:[#allocation20 + $0x64] sm:$0xf]  ;;  %v3856_v3 = vld [vmem:[#allocation20 + $0x54] sm:$0xf0] }
 0x4b3   : > { %v1377_v21 = vsel %vm1356_vm5, %v1216_v19, 0  ;;  %v3448_v19 = vor.u32 %v3858_v17, %v3447_v16  ;;  %v1577_v16 = vld [vmem:[%s5345_s18] sm:$0x3] }
 0x4b4   : > { %1386 = vmatpush.bf16.msrb.mxu2 %v1377_v21  ;;  %v1352_v29 = vpack.c.bf16 %v1348_v26, %v1348_v26  ;;  %v3452_v21 = vor.u32 %v3857_v18, %v3449_v20  ;;  %v3441_v26 = vld [vmem:[#allocation20 + $0x58] sm:$0xf0]  ;;  %v1579_v17 = vperm.slane %v1577_v16, 0  ;;  %v1580_v18 = vperm.slane %v1577_v16, 1  ;;  %v3875_v20 = vld [vmem:[#allocation22 + $0x70] sm:$0xff] }
 0x4b7   : > { %3362 = vmatmul.msk.bf16.vlgmr.msrb.gmra.mxu2 %vm1304_vm8, %v1350_v22  ;;  %v4153_v30 = vpop.eup %4152  ;;  %v3439_v22 = vld [vmem:[#allocation20 + $0x50] sm:$0xf] }
 0x4b8   : > { %v1347_v32 = vmul.f32 %v4153_v30, %v4145_v8  ;;  %v3860_v8 = vld [vmem:[#allocation20 + $0x74] sm:$0xf0]  ;;  %v3853_v30 = vld [vmem:[#allocation20 + $0x44] sm:$0xf] }
 0x4b9   : > { %v3456_v10 = vor.u32 %v3860_v8, %v3455_v7  ;;  %v4125_v7 = vld [vmem:[#allocation17] ss:$0 sm:$0xff] }
 0x4ba   : > { %v1351_v35 = vpack.c.bf16 %v1347_v32, %v1347_v32  ;;  %v3433_v32 = vld [vmem:[#allocation20 + $0x48] sm:$0xf0] }
 0x4bb   : > { %1663 = vmatpush.bf16.msra.mxu2 %v3456_v10  ;;  %v4126_v10 = vld [vmem:[#allocation19] ss:$0 sm:$0xff] }
 0x4bd   : > { %v1213_v25 = vpop.permute.xlu0 %1212 }
 0x4be   : > { %v1218_v27 = vpack.c.bf16 %v1213_v25, %v1213_v25  ;;  %v3440_v25 = vor.u32 %v3856_v3, %v3439_v22 }
 0x4bf   : > { %1664 = vmatpush.bf16.msra.mxu2 %v3448_v19  ;;  %v3867_v19 = vld [vmem:[#allocation22 + $0x30] sm:$0xff] }
 0x4c0   : > { %v1415_v28 = vsel %vm1356_vm5, %v1218_v27, 0  ;;  %v3444_v27 = vor.u32 %v3855_v23, %v3441_v26  ;;  %v3866_v23 = vld [vmem:[#allocation22 + $0x28] sm:$0xff] }
 0x4c1   : > { %1424 = vmatpush.bf16.msrb.mxu0 %v1415_v28  ;;  %v3431_v28 = vld [vmem:[#allocation20 + $0x40] sm:$0xf] }
 0x4c3   : > { %1665 = vmatpush.bf16.msra.mxu2 %v3440_v25  ;;  %v3874_v25 = vld [vmem:[#allocation22 + $0x68] sm:$0xff] }
 0x4c4   : > { %3364 = vmatmul.msk.bf16.vlgmr.msrb.gmra.mxu0 %vm1304_vm8, %v1352_v29  ;;  %v3854_v29 = vld [vmem:[#allocation20 + $0x44] sm:$0xf0] }
 0x4c8   : > { %v1210_v31 = vpop.permute.xlu1 %1209 }
 0x4c9   : > { %v1217_v33 = vpack.c.bf16 %v1210_v31, %v1210_v31  ;;  %v3432_v31 = vor.u32 %v3854_v29, %v3431_v28 }
 0x4cb   : > { %v1396_v34 = vsel %vm1356_vm5, %v1217_v33, 0  ;;  %v3436_v33 = vor.u32 %v3853_v30, %v3433_v32  ;;  %1666 = vmatpush.bf16.msra.mxu2 %v3432_v31  ;;  %v3865_v30 = vld [vmem:[#allocation22 + $0x20] sm:$0xff] }
 0x4cc   : > { %1405 = vmatpush.bf16.msra.mxu3 %v1396_v34  ;;  %v3423_v34 = vld [vmem:[#allocation20 + $0x30] sm:$0xf]  ;;  %v3873_v31 = vld [vmem:[#allocation22 + $0x60] sm:$0xff] }
 0x4cf   : > { %3363 = vmatmul.msk.bf16.vlgmr.msra.gmra.mxu3 %vm1304_vm8, %v1351_v35  ;;  %v3852_v35 = vld [vmem:[#allocation20 + $0x34] sm:$0xf0] }
 0x4d0   : > { %1676 = vmatpush.bf16.msrb.mxu3 %v3460_v12 }
 0x4d4   : > { %1677 = vmatpush.bf16.msrb.mxu3 %v3452_v21 }
 0x4d8   : > { %1678 = vmatpush.bf16.msrb.mxu3 %v3444_v27 }
 0x4dc   : > { %1679 = vmatpush.bf16.msrb.mxu3 %v3436_v33 }
 0x4e9   : > { %v1331_v36 = vpop.xlane.xlu2 %1330 }
 0x4ea   : > { %4154 = vrcp.f32 %v1331_v36  ;;  %v3851_v36 = vld [vmem:[#allocation20 + $0x34] sm:$0xf] }
 0x4f0   : > { %v4155_v37 = vpop.eup %4154 }
 0x4f1   : > { %v1345_v38 = vmul.f32 %v4155_v37, %v4147_v13  ;;  %v3424_v37 = vor.u32 %v3852_v35, %v3423_v34 }
 0x4f3   : > { %v1349_v39 = vpack.c.bf16 %v1345_v38, %v1345_v38  ;;  %v3425_v38 = vld [vmem:[#allocation20 + $0x38] sm:$0xf0]  ;;  %1667 = vmatpush.bf16.msra.mxu2 %v3424_v37 }
 0x4f5   : > { %3361 = vmatmul.msk.bf16.vlgmr.msrb.gmra.mxu1 %vm1304_vm8, %v1349_v39  ;;  %v3428_v39 = vor.u32 %v3851_v36, %v3425_v38 }
 0x4f7   : > { %1680 = vmatpush.bf16.msrb.mxu3 %v3428_v39 }
 0x53a   : > { %v1388_v40 = vpop.f32.mrf.mxu2 }
 0x53b   : > { %1431 = vrot.lane.b32.xlu1 %v1388_v40, %s4691_s1  ;;  %v3415_v40 = vld [vmem:[#allocation20 + $0x20] sm:$0xf] }
 0x541   : > { %v1426_v43 = vpop.f32.mrf.mxu0 }
 0x542   : > { %v1390_v45 = vpop.f32.mrf.mxu2 }
 0x543   : > { %1439 = vrot.lane.b32.xlu1 %v1426_v43, %s4692_s24  ;;  %v3850_v43 = vld [vmem:[#allocation20 + $0x24] sm:$0xf0]  ;;  %v3849_v45 = vld [vmem:[#allocation20 + $0x24] sm:$0xf] }
 0x549   : > { %v1428_v46 = vpop.f32.mrf.mxu0 }
 0x54a   : > { %v3416_v46 = vor.u32 %v3850_v43, %v3415_v40  ;;  %v3864_v40 = vld [vmem:[#allocation22 + $0x18] sm:$0xff] }
 0x54b   : > { %v3872_v43 = vld [vmem:[#allocation22 + $0x58] sm:$0xff] }
 0x54c   : > { %1668 = vmatpush.bf16.msra.mxu2 %v3416_v46 }
 0x552   : > { %v1407_v47 = vpop.f32.mrf.mxu3 }
 0x553   : > { %1435 = vrot.lane.b32.xlu0 %v1407_v47, %s4693_s15  ;;  %v3417_v47 = vld [vmem:[#allocation20 + $0x28] sm:$0xf0] }
 0x55a   : > { %v1409_v48 = vpop.f32.mrf.mxu3 }
 0x55b   : > { %v3420_v48 = vor.u32 %v3849_v45, %v3417_v47 }
 0x55d   : > { %1681 = vmatpush.bf16.msrb.mxu3 %v3420_v48 }
 0x572   : > { %v1369_v50 = vpop.f32.mrf.mxu1 }
 0x57a   : > { %v1371_v51 = vpop.f32.mrf.mxu1 }
 0x57b   : > { %v3847_v51 = vld [vmem:[#allocation20 + $0x14] sm:$0xf] }
 0x57c   : > { %v3412_v56 = vor.u32 %v3847_v51, %v3409_v53  ;;  %v3871_v53 = vld [vmem:[#allocation22 + $0x50] sm:$0xff] }
 0x57e   : > { %1682 = vmatpush.bf16.msrb.mxu3 %v3412_v56 }
 0x5ad   : > { %v1432_v59 = vpop.permute.xlu1 %1431 }
 0x5ae   : > { %v1442_v60 = vsel %vm1219_vm6, %v1369_v50, %v1432_v59  ;;  %v3848_v50 = vld [vmem:[#allocation20 + $0x14] sm:$0xf0]  ;;  %v3400_v59 = vor.u32 %v3846_v55, %v3399_v54 }
 0x5af   : > { %v3408_v52 = vor.u32 %v3848_v50, %v3407_v49 }
 0x5b1   : > { %1669 = vmatpush.bf16.msra.mxu2 %v3408_v52  ;;  %v3863_v52 = vld [vmem:[#allocation22 + $0x10] sm:$0xff] }
 0x5b5   : > { %v1440_v62 = vpop.permute.xlu1 %1439  ;;  %1670 = vmatpush.bf16.msra.mxu2 %v3400_v59 }
 0x5c5   : > { %v1436_v61 = vpop.permute.xlu0 %1435 }
 0x5c6   : > { %v1443_v63 = vsel %vm896_vm0, %v1442_v60, %v1436_v61  ;;  %v3404_v60 = vor.u32 %v3845_v57, %v3401_v58 }
 0x5c7   : > { %v1445_v0 = vsel %vm1444_vm9, %v1443_v63, %v1440_v62 }
 0x5c8   : > { %v1446_v1 = vpack.c.bf16 %v1445_v0, %v1445_v0  ;;  %1683 = vmatpush.bf16.msrb.mxu3 %v3404_v60  ;;  %v3862_v60 = vld [vmem:[#allocation22 + $0x8] sm:$0xff] }
 0x5ca   : > { %1519 = vmatmul.bf16.vlgmr.msra.gmra.mxu1 %v1446_v1 }
 0x647   : > { %v1520_v4 = vpop.f32.mrf.mxu1 }
 0x648   : > { %v1524_v5 = vadd.f32 %v1520_v4, %v5005_v24 }
 0x64a   : > { %v5074_v44 = vadd.f32 %v4124_v2, %v1524_v5 }
 0x64c   : > { %1532 = vadd.xlane.f32.xlu0 %v5074_v44 }
 0x64f   : > { %v1522_v6 = vpop.f32.mrf.mxu1 }
 0x6bf   : > { %v1533_v13 = vpop.xlane.xlu0 %1532 }
 0x6c0   : > { %v1534_v14 = vmul.f32 %v1533_v13, %v5008_v41 }
 0x6c2   : > { %v5079_v15 = vsub.f32 %v5074_v44, %v1534_v14  ;;  %v3868_v14 = vld [vmem:[#allocation22 + $0x38] sm:$0xff] }
 0x6c3   : > { %1907 = vmatpush.bf16.msra.mxu0 %v3868_v14 }
 0x6c4   : > { %v1536_v24 = vmul.f32 %v5079_v15, %v5079_v15 }
 0x6c6   : > { %1537 = vadd.xlane.f32.xlu1 %v1536_v24  ;;  %v3876_v24 = vld [vmem:[#allocation22 + $0x78] sm:$0xff] }
 0x6c7   : > { %1920 = vmatpush.bf16.msrb.mxu1 %v3876_v24  ;;  %1908 = vmatpush.bf16.msra.mxu0 %v3867_v19 }
 0x6cb   : > { %1921 = vmatpush.bf16.msrb.mxu1 %v3875_v20  ;;  %1909 = vmatpush.bf16.msra.mxu0 %v3866_v23 }
 0x6cf   : > { %1922 = vmatpush.bf16.msrb.mxu1 %v3874_v25  ;;  %1910 = vmatpush.bf16.msra.mxu0 %v3865_v30 }
 0x6d3   : > { %1923 = vmatpush.bf16.msrb.mxu1 %v3873_v31  ;;  %1911 = vmatpush.bf16.msra.mxu0 %v3864_v40 }
 0x6d7   : > { %1924 = vmatpush.bf16.msrb.mxu1 %v3872_v43  ;;  %1912 = vmatpush.bf16.msra.mxu0 %v3863_v52 }
 0x6db   : > { %1925 = vmatpush.bf16.msrb.mxu1 %v3871_v53  ;;  %1913 = vmatpush.bf16.msra.mxu0 %v3862_v60 }
 0x739   : > { %v1538_v61 = vpop.xlane.xlu1 %1537 }
 0x73a   : > { %v1539_v62 = vmul.f32 %v1538_v61, %v5008_v41  ;;  %v3870_v61 = vld [vmem:[#allocation22 + $0x48] sm:$0xff] }
 0x73b   : > { %1926 = vmatpush.bf16.msrb.mxu1 %v3870_v61 }
 0x73c   : > { %v1540_v63 = vadd.f32 1e-06, %v1539_v62 }
 0x73e   : > { %4156 = vrsqrt.f32 %v1540_v63  ;;  %vm1547_vm11 = vweird.f32 %v1540_v63 }
 0x744   : > { %v4157_v0 = vpop.eup %4156 }
 0x745   : > { %v1542_v1 = vmul.f32 %v4157_v0, %v1540_v63  ;;  %vm1548_vm10 = vweird.f32 %v4157_v0 }
 0x746   : > { %vm1549_vm12 = vmor %vm1547_vm11, %vm1548_vm10 }
 0x747   : > { %v1543_v2 = vmul.f32 %v4157_v0, %v1542_v1 }
 0x749   : > { %v1544_v4 = vmul.f32 0.5, %v1543_v2 }
 0x74b   : > { %v1545_v5 = vsub.f32 1.5, %v1544_v4 }
 0x74d   : > { %v1546_v6 = vmul.f32 %v4157_v0, %v1545_v5  ;;  %v3861_v5 = vld [vmem:[#allocation22] sm:$0xff] }
 0x74e   : > { %1914 = vmatpush.bf16.msra.mxu0 %v3861_v5  ;;  %v3614_v5 = vld [vmem:[#allocation13 + $0x168] sm:$0xf] }
 0x74f   : > { %v1550_v8 = vsel %vm1549_vm12, %v4157_v0, %v1546_v6  ;;  %v3869_v6 = vld [vmem:[#allocation22 + $0x40] sm:$0xff] }
 0x750   : > { %v1551_v9 = vmul.f32 %v1550_v8, %v5079_v15  ;;  %1927 = vmatpush.bf16.msrb.mxu1 %v3869_v6  ;;  %v3899_v6 = vld [vmem:[#allocation13 + $0x170] sm:$0xf0] }
 0x752   : > { %v1555_v11 = vmul.f32 %v4125_v7, %v1551_v9 }
 0x754   : > { %v1559_v12 = vadd.f32 %v4126_v10, %v1555_v11 }
 0x756   : > { %v1560_v13 = vpack.c.bf16 %v1559_v12, %v1559_v12 }
 0x758   : > { %1671 = vmatmul.bf16.vlgmr.msra.gmra.mxu2 %v1560_v13  ;;  %1684 = vmatmul.bf16.vlgmr.msrb.gmra.mxu3 %v1560_v13 }
 0x7db   : > { %v1672_v15 = vpop.f32.mrf.mxu2  ;;  %v1685_v21 = vpop.f32.mrf.mxu3 }
 0x7dc   : > { %v5088_v22 = vadd.f32 %v1672_v15, %v1579_v17  ;;  %v5090_v3 = vadd.f32 %v1685_v21, %v1580_v18 }
 0x7de   : > { %v5093_v26 = vmul.f32 0.70710677, %v5088_v22  ;;  %v5096_v27 = vmul.f32 0.70710677, %v5090_v3 }
 0x7e0   : > { %v1693_v28 = vmul.f32 %v5093_v26, %v5093_v26  ;;  %v1733_v29 = vmul.f32 %v5096_v27, %v5096_v27 }
 0x7e2   : > { %v1694_v32 = vmin.f32 %v1693_v28, 16.0  ;;  %v5102_v33 = vmin.f32 %v1733_v29, 16.0 }
 0x7e3   : > { %v1674_v34 = vpop.f32.mrf.mxu2  ;;  %v1687_v35 = vpop.f32.mrf.mxu3 }
 0x7e4   : > { %v1695_v36 = vmul.f32 2.1237322e-06, %v1694_v32  ;;  %v1706_v37 = vmul.f32 3.8918573e-05, %v1694_v32  ;;  %v1735_v38 = vmul.f32 2.1237322e-06, %v5102_v33 }
 0x7e5   : > { %v1746_v39 = vmul.f32 3.8918573e-05, %v5102_v33 }
 0x7e6   : > { %v1696_v45 = vadd.f32 0.00028619796, %v1695_v36  ;;  %v1707_v46 = vadd.f32 0.001143296, %v1706_v37  ;;  %v1736_v47 = vadd.f32 0.00028619796, %v1735_v38 }
 0x7e7   : > { %v1747_v48 = vadd.f32 0.001143296, %v1746_v39 }
 0x7e8   : > { %v1697_v49 = vmul.f32 %v1696_v45, %v1694_v32  ;;  %v1708_v50 = vmul.f32 %v1707_v46, %v1694_v32  ;;  %v1737_v51 = vmul.f32 %v1736_v47, %v5102_v33 }
 0x7e9   : > { %v1748_v54 = vmul.f32 %v1747_v48, %v5102_v33 }
 0x7ea   : > { %v1698_v55 = vadd.f32 0.0036580483, %v1697_v49  ;;  %v1709_v56 = vadd.f32 0.014752088, %v1708_v50  ;;  %v1738_v59 = vadd.f32 0.0036580483, %v1737_v51 }
 0x7eb   : > { %v1749_v57 = vadd.f32 0.014752088, %v1748_v54 }
 0x7ec   : > { %v1710_v58 = vmul.f32 %v1709_v56, %v1694_v32  ;;  %v1699_v63 = vmul.f32 %v1698_v55, %v1694_v32  ;;  %v1739_v4 = vmul.f32 %v1738_v59, %v5102_v33  ;;  %v1689_v56 = vmul.f32 0.5, %v5088_v22 }
 0x7ed   : > { %v1750_v62 = vmul.f32 %v1749_v57, %v5102_v33 }
 0x7ee   : > { %v1711_v0 = vadd.f32 0.112945676, %v1710_v58  ;;  %v1700_v8 = vadd.f32 0.05243302, %v1699_v63  ;;  %v1740_v12 = vadd.f32 0.05243302, %v1739_v4 }
 0x7ef   : > { %v1751_v1 = vadd.f32 0.112945676, %v1750_v62  ;;  %v1690_v58 = vmul.f32 0.5, %v5090_v3 }
 0x7f0   : > { %v1712_v2 = vmul.f32 %v1711_v0, %v1694_v32  ;;  %v1701_v14 = vmul.f32 %v1700_v8, %v1694_v32  ;;  %v1741_v17 = vmul.f32 %v1740_v12, %v5102_v33  ;;  %v3615_v8 = vor.u32 %v3899_v6, %v3614_v5  ;;  %v3544_v6 = vld [vmem:[#allocation13 + $0xe4] sm:$0xf0] }
 0x7f1   : > { %v1752_v7 = vmul.f32 %v1751_v1, %v5102_v33  ;;  %v4127_v1 = vld [vmem:[%s5346_s23] ss:$0 sm:$0xff] }
 0x7f2   : > { %v1713_v9 = vadd.f32 0.4994258, %v1712_v2  ;;  %v1702_v18 = vadd.f32 0.18741608, %v1701_v14  ;;  %v1742_v19 = vadd.f32 0.18741608, %v1741_v17  ;;  %2142 = vmatpush.bf16.msrb.mxu2 %v3615_v8 }
 0x7f3   : > { %v1753_v10 = vadd.f32 0.4994258, %v1752_v7  ;;  %v3898_v7 = vld [vmem:[#allocation13 + $0x16c] sm:$0xf]  ;;  %v3602_v17 = vld [vmem:[#allocation13 + $0x150] sm:$0xf] }
 0x7f4   : > { %v1714_v11 = vmul.f32 %v1713_v9, %v1694_v32  ;;  %v1703_v15 = vmul.f32 %v1702_v18, %v1694_v32  ;;  %v1743_v25 = vmul.f32 %v1742_v19, %v5102_v33  ;;  %v3616_v9 = vld [vmem:[#allocation13 + $0x174] sm:$0xf0]  ;;  %v3896_v18 = vld [vmem:[#allocation13 + $0x158] sm:$0xf0]  ;;  %v3895_v19 = vld [vmem:[#allocation13 + $0x154] sm:$0xf] }
 0x7f5   : > { %v1754_v13 = vmul.f32 %v1753_v10, %v5102_v33  ;;  %v3622_v10 = vld [vmem:[#allocation13 + $0x170] sm:$0xf]  ;;  %v3619_v12 = vor.u32 %v3898_v7, %v3616_v9  ;;  %v3550_v7 = vld [vmem:[#allocation13 + $0xe0] sm:$0xf]  ;;  %v3882_v8 = vld [vmem:[#allocation13 + $0xe8] sm:$0xf0] }
 0x7f6   : > { %v1715_v24 = vadd.f32 1.0, %v1714_v11  ;;  %v1704_v30 = vadd.f32 1.1283791, %v1703_v15  ;;  %v1744_v38 = vadd.f32 1.1283791, %v1743_v25 }
 0x7f7   : > { %v1755_v16 = vadd.f32 1.0, %v1754_v13  ;;  %v3900_v11 = vld [vmem:[#allocation13 + $0x178] sm:$0xf0]  ;;  %2155 = vmatpush.bf16.msra.mxu3 %v3619_v12  ;;  %v3604_v15 = vld [vmem:[#allocation13 + $0x15c] sm:$0xf0] }
 0x7f8   : > { %4158 = vrcp.f32 %v1715_v24  ;;  %v1727_v31 = vand.u32 2147483648, %v1715_v24  ;;  %v1725_v36 = vand.u32 2147483647, %v1715_v24  ;;  %vm1721_vm15 = vweird.f32 %v1715_v24  ;;  %v3878_v12 = vld [vmem:[#allocation13 + $0xc8] sm:$0xf0] }
 0x7f9   : > { %4160 = vrcp.f32 %v1755_v16  ;;  %v1767_v37 = vand.u32 2147483648, %v1755_v16  ;;  %v1765_v40 = vand.u32 2147483647, %v1755_v16  ;;  %vm1761_vm2 = vweird.f32 %v1755_v16 }
 0x7fa   : > { %v1728_v32 = vor.u32 1.1754944e-38, %v1727_v31  ;;  %v1705_v33 = vmul.f32 %v1704_v30, %v5093_v26  ;;  %vm1726_vm3 = vcmp.eq.f32.partialorder %v1725_v36, 8.507059e+37  ;;  %v1745_v49 = vmul.f32 %v1744_v38, %v5096_v27  ;;  %v3893_v30 = vld [vmem:[#allocation13 + $0x140] sm:$0xf0]  ;;  %v3892_v31 = vld [vmem:[#allocation13 + $0x13c] sm:$0xf] }
 0x7fb   : > { %v1768_v47 = vor.u32 1.1754944e-38, %v1767_v37  ;;  %vm1766_vm7 = vcmp.eq.f32.partialorder %v1765_v40, 8.507059e+37  ;;  %v3623_v13 = vor.u32 %v3900_v11, %v3622_v10  ;;  %v3607_v25 = vor.u32 %v3895_v19, %v3604_v15  ;;  %v3598_v36 = vld [vmem:[#allocation13 + $0x140] sm:$0xf]  ;;  %v3894_v37 = vld [vmem:[#allocation13 + $0x148] sm:$0xf0] }
 0x7fc   : > { %v3578_v40 = vld [vmem:[#allocation13 + $0x120] sm:$0xf]  ;;  %v3551_v10 = vor.u32 %v3882_v8, %v3550_v7 }
 0x7fd   : > { %2168 = vmatpush.bf16.msrb.mxu0 %v3623_v13  ;;  %2156 = vmatpush.bf16.msra.mxu3 %v3607_v25  ;;  %v3530_v11 = vld [vmem:[#allocation13 + $0xc0] sm:$0xf]  ;;  %v3877_v13 = vld [vmem:[#allocation13 + $0xc4] sm:$0xf] }
 0x7fe   : > { %v4159_v20 = vpop.eup %4158 }
 0x7ff   : > { %v4161_v21 = vpop.eup %4160  ;;  %v1717_v23 = vmul.f32 %v4159_v20, %v1715_v24  ;;  %vm1722_vm13 = vweird.f32 %v4159_v20 }
 0x800   : > { %v1757_v28 = vmul.f32 %v4161_v21, %v1755_v16  ;;  %vm1762_vm14 = vweird.f32 %v4161_v21  ;;  %vm1723_vm1 = vmor %vm1721_vm15, %vm1722_vm13 }
 0x801   : > { %v1718_v29 = vsub.f32 1.0, %v1717_v23  ;;  %vm1763_vm4 = vmor %vm1761_vm2, %vm1762_vm14  ;;  %v3897_v23 = vld [vmem:[#allocation13 + $0x160] sm:$0xf0] }
 0x802   : > { %v1758_v34 = vsub.f32 1.0, %v1757_v28 }
 0x803   : > { %v1719_v35 = vmul.f32 %v4159_v20, %v1718_v29  ;;  %v3590_v29 = vld [vmem:[#allocation13 + $0x138] sm:$0xf] }
 0x804   : > { %v1759_v39 = vmul.f32 %v4161_v21, %v1758_v34  ;;  %v3591_v34 = vor.u32 %v3893_v30, %v3590_v29 }
 0x805   : > { %v1720_v43 = vadd.f32 %v4159_v20, %v1719_v35  ;;  %v3592_v35 = vld [vmem:[#allocation13 + $0x144] sm:$0xf0] }
 0x806   : > { %v1760_v45 = vadd.f32 %v4161_v21, %v1759_v39  ;;  %v3595_v38 = vor.u32 %v3892_v31, %v3592_v35  ;;  %v3599_v39 = vor.u32 %v3894_v37, %v3598_v36  ;;  %v4129_v37 = vld [vmem:[#allocation11 + $0x1] ss:$0 sm:$0xff] }
 0x807   : > { %v1724_v46 = vsel %vm1723_vm1, %v4159_v20, %v1720_v43  ;;  %v3603_v20 = vor.u32 %v3896_v18, %v3602_v17  ;;  %v3890_v43 = vld [vmem:[#allocation13 + $0x128] sm:$0xf0]  ;;  %v3879_v17 = vld [vmem:[#allocation13 + $0xd0] sm:$0xf0] }
 0x808   : > { %v1729_v48 = vsel %vm1726_vm3, %v1728_v32, %v1724_v46  ;;  %v1764_v50 = vsel %vm1763_vm4, %v4161_v21, %v1760_v45  ;;  %v3610_v21 = vld [vmem:[#allocation13 + $0x158] sm:$0xf]  ;;  %2157 = vmatpush.bf16.msra.mxu3 %v3595_v38  ;;  %v3889_v32 = vld [vmem:[#allocation13 + $0x124] sm:$0xf]  ;;  %v3579_v45 = vor.u32 %v3890_v43, %v3578_v40  ;;  %v3586_v46 = vld [vmem:[#allocation13 + $0x128] sm:$0xf] }
 0x809   : > { %v1730_v51 = vmul.f32 %v1729_v48, %v1705_v33  ;;  %v1769_v52 = vsel %vm1766_vm7, %v1768_v47, %v1764_v50  ;;  %v3611_v28 = vor.u32 %v3897_v23, %v3610_v21  ;;  %2143 = vmatpush.bf16.msrb.mxu2 %v3603_v20  ;;  %v3580_v33 = vld [vmem:[#allocation13 + $0x12c] sm:$0xf0]  ;;  %v3891_v47 = vld [vmem:[#allocation13 + $0x130] sm:$0xf0]  ;;  %v3566_v50 = vld [vmem:[#allocation13 + $0x108] sm:$0xf] }
 0x80a   : > { %v1770_v53 = vmul.f32 %v1769_v52, %v1745_v49  ;;  %v3583_v48 = vor.u32 %v3889_v32, %v3580_v33  ;;  %v3587_v49 = vor.u32 %v3891_v47, %v3586_v46  ;;  %v3886_v52 = vld [vmem:[#allocation13 + $0x10c] sm:$0xf]  ;;  %v3527_v43 = vld [vmem:[%s5344_s26 + $0x3] sm:$0x7] }
 0x80b   : > { %v3461_v54 = vclamps-f32 %v1730_v51, 1.0  ;;  %2169 = vmatpush.bf16.msrb.mxu0 %v3611_v28  ;;  %v3887_v51 = vld [vmem:[#allocation13 + $0x110] sm:$0xf0]  ;;  %v2010_v32 = vperm.slane %v3527_v43, 2  ;;  %v2008_v33 = vperm.slane %v3527_v43, 0  ;;  %v2009_v46 = vperm.slane %v3527_v43, 1 }
 0x80c   : > { %v3462_v55 = vclamps-f32 %v1770_v53, 1.0  ;;  %2158 = vmatpush.bf16.msra.mxu3 %v3583_v48  ;;  %v3567_v53 = vor.u32 %v3887_v51, %v3566_v50 }
 0x80d   : > { %v1773_v57 = vadd.f32 1.0, %v3461_v54  ;;  %2144 = vmatpush.bf16.msrb.mxu2 %v3591_v34  ;;  %v3568_v54 = vld [vmem:[#allocation13 + $0x114] sm:$0xf0]  ;;  %v4128_v34 = vld [vmem:[#allocation10 + $0x1] ss:$0 sm:$0xff] }
 0x80e   : > { %v1774_v26 = vadd.f32 1.0, %v3462_v55  ;;  %v3574_v55 = vld [vmem:[#allocation13 + $0x110] sm:$0xf] }
 0x80f   : > { %v1775_v59 = vmul.f32 %v1773_v57, %v1689_v56  ;;  %2170 = vmatpush.bf16.msrb.mxu0 %v3599_v39  ;;  %v3888_v56 = vld [vmem:[#allocation13 + $0x118] sm:$0xf0]  ;;  %v3571_v57 = vor.u32 %v3886_v52, %v3568_v54 }
 0x810   : > { %v1776_v60 = vmul.f32 %v1774_v26, %v1690_v58  ;;  %v3575_v58 = vor.u32 %v3888_v56, %v3574_v55  ;;  %v3554_v26 = vld [vmem:[#allocation13 + $0xf0] sm:$0xf] }
 0x811   : > { %v1777_v61 = vpack.c.bf16 %v1775_v59, %v1775_v59  ;;  %2145 = vmatpush.bf16.msrb.mxu2 %v3579_v45  ;;  %2159 = vmatpush.bf16.msra.mxu3 %v3571_v57  ;;  %v3884_v59 = vld [vmem:[#allocation13 + $0xf8] sm:$0xf0] }
 0x812   : > { %v1778_v62 = vpack.c.bf16 %v1776_v60, %v1776_v60  ;;  %v3883_v60 = vld [vmem:[#allocation13 + $0xf4] sm:$0xf] }
 0x813   : > { %1915 = vmatmul.bf16.vlgmr.msra.gmra.mxu0 %v1777_v61  ;;  %v3555_v61 = vor.u32 %v3884_v59, %v3554_v26 }
 0x814   : > { %1928 = vmatmul.bf16.vlgmr.msrb.gmra.mxu1 %v1778_v62  ;;  %2171 = vmatpush.bf16.msrb.mxu0 %v3587_v49  ;;  %v3556_v62 = vld [vmem:[#allocation13 + $0xfc] sm:$0xf0] }
 0x815   : > { %2146 = vmatpush.bf16.msrb.mxu2 %v3567_v53 }
 0x818   : > { %2172 = vmatpush.bf16.msrb.mxu0 %v3575_v58 }
 0x819   : > { %2147 = vmatpush.bf16.msrb.mxu2 %v3555_v61 }
 0x890   : > { %v1916_v27 = vpop.f32.mrf.mxu0 }
 0x891   : > { %v1929_v63 = vpop.f32.mrf.mxu1 }
 0x892   : > { %v1930_v0 = vadd.f32 %v1929_v63, %v1916_v27  ;;  %v3562_v27 = vld [vmem:[#allocation13 + $0xf8] sm:$0xf]  ;;  %v3885_v63 = vld [vmem:[#allocation13 + $0x100] sm:$0xf0] }
 0x894   : > { %v1933_v2 = vadd.f32 %v1930_v0, %v5074_v44  ;;  %v3559_v0 = vor.u32 %v3883_v60, %v3556_v62 }
 0x896   : > { %v5122_v22 = vadd.f32 %v4127_v1, %v1933_v2  ;;  %v3563_v1 = vor.u32 %v3885_v63, %v3562_v27  ;;  %2160 = vmatpush.bf16.msra.mxu3 %v3559_v0  ;;  %v3542_v2 = vld [vmem:[#allocation13 + $0xd8] sm:$0xf] }
 0x898   : > { %1943 = vadd.xlane.f32.xlu2 %v5122_v22  ;;  %v1918_v3 = vpop.f32.mrf.mxu0  ;;  %2173 = vmatpush.bf16.msrb.mxu0 %v3563_v1 }
 0x899   : > { %v1931_v4 = vpop.f32.mrf.mxu1  ;;  %v3881_v3 = vld [vmem:[#allocation13 + $0xe0] sm:$0xf0] }
 0x89a   : > { %v3880_v4 = vld [vmem:[#allocation13 + $0xdc] sm:$0xf]  ;;  %v3543_v5 = vor.u32 %v3881_v3, %v3542_v2 }
 0x89b   : > { %v3547_v9 = vor.u32 %v3880_v4, %v3544_v6 }
 0x89c   : > { %2148 = vmatpush.bf16.msrb.mxu2 %v3543_v5  ;;  %2174 = vmatpush.bf16.msrb.mxu0 %v3551_v10 }
 0x89d   : > { %2161 = vmatpush.bf16.msra.mxu3 %v3547_v9 }
 0x90b   : > { %v1944_v14 = vpop.xlane.xlu2 %1943 }
 0x90c   : > { %v1945_v44 = vmul.f32 %v1944_v14, %v5008_v41  ;;  %v3531_v14 = vor.u32 %v3878_v12, %v3530_v11 }
 0x90e   : > { %v5127_v24 = vsub.f32 %v5122_v22, %v1945_v44  ;;  %v3532_v44 = vld [vmem:[#allocation13 + $0xcc] sm:$0xf0]  ;;  %2149 = vmatpush.bf16.msrb.mxu2 %v3531_v14 }
 0x90f   : > { %v3535_v18 = vor.u32 %v3877_v13, %v3532_v44 }
 0x910   : > { %v1947_v16 = vmul.f32 %v5127_v24, %v5127_v24 }
 0x911   : > { %2162 = vmatpush.bf16.msra.mxu3 %v3535_v18 }
 0x912   : > { %1948 = vadd.xlane.f32.xlu2 %v1947_v16  ;;  %v3538_v16 = vld [vmem:[#allocation13 + $0xc8] sm:$0xf] }
 0x913   : > { %v3539_v19 = vor.u32 %v3879_v17, %v3538_v16 }
 0x915   : > { %2175 = vmatpush.bf16.msrb.mxu0 %v3539_v19 }
 0x985   : > { %v1949_v20 = vpop.xlane.xlu2 %1948 }
 0x986   : > { %v1950_v15 = vmul.f32 %v1949_v20, %v5008_v41 }
 0x988   : > { %v1951_v21 = vadd.f32 1e-06, %v1950_v15 }
 0x98a   : > { %4162 = vrsqrt.f32 %v1951_v21  ;;  %vm1958_vm11 = vweird.f32 %v1951_v21 }
 0x990   : > { %v4163_v23 = vpop.eup %4162 }
 0x991   : > { %v1953_v25 = vmul.f32 %v4163_v23, %v1951_v21  ;;  %vm1959_vm10 = vweird.f32 %v4163_v23 }
 0x992   : > { %vm1960_vm12 = vmor %vm1958_vm11, %vm1959_vm10 }
 0x993   : > { %v1954_v28 = vmul.f32 %v4163_v23, %v1953_v25 }
 0x995   : > { %v1955_v29 = vmul.f32 0.5, %v1954_v28 }
 0x997   : > { %v1956_v30 = vsub.f32 1.5, %v1955_v29 }
 0x999   : > { %v1957_v31 = vmul.f32 %v4163_v23, %v1956_v30 }
 0x99b   : > { %v1961_v35 = vsel %vm1960_vm12, %v4163_v23, %v1957_v31 }
 0x99c   : > { %v1962_v36 = vmul.f32 %v1961_v35, %v5127_v24 }
 0x99e   : > { %v1966_v38 = vmul.f32 %v4128_v34, %v1962_v36 }
 0x9a0   : > { %v1970_v39 = vadd.f32 %v4129_v37, %v1966_v38 }
 0x9a2   : > { %v1971_v40 = vpack.c.bf16 %v1970_v39, %v1970_v39 }
 0x9a4   : > { %2150 = vmatmul.bf16.vlgmr.msrb.gmra.mxu2 %v1971_v40  ;;  %2163 = vmatmul.bf16.vlgmr.msra.gmra.mxu3 %v1971_v40 }
 0x9a5   : > { %2176 = vmatmul.bf16.vlgmr.msrb.gmra.mxu0 %v1971_v40 }
 0xa22   : > { %v2177_v45 = vpop.f32.mrf.mxu0 }
 0xa23   : > { %v5136_v47 = vadd.f32 %v2177_v45, %v2010_v32 }
 0xa25   : > { %v2219_v51 = vpack.c.bf16 %v5136_v47, %v5136_v47 }
 0xa27   : > { %v2151_v48 = vpop.f32.mrf.mxu2  ;;  %v2164_v49 = vpop.f32.mrf.mxu3  ;;  %v2359_v55 = vsel %vm1356_vm5, %v2219_v51, 0 }
 0xa28   : > { %v2152_v24 = vadd.f32 %v2151_v48, %v2008_v33  ;;  %v2165_v50 = vadd.f32 %v2164_v49, %v2009_v46 }
 0xa2a   : > { %v2179_v52 = vpop.f32.mrf.mxu0  ;;  %2199 = vrot.lane.b32.xlu0 %v2165_v50, %s4693_s15  ;;  %2196 = vrot.lane.b32.xlu2 %v2165_v50, %s4692_s24  ;;  %v2205_v53 = vpack.c.bf16 %v2165_v50, %v2165_v50  ;;  %v2191_v58 = vpack.c.bf16 %v2152_v24, %v2152_v24 }
 0xa2b   : > { %2182 = vrot.lane.b32.xlu1 %v2152_v24, %s4692_s24 }
 0xa2c   : > { %v2227_v54 = vsel %vm1219_vm6, %v2205_v53, 0 }
 0xa2d   : > { %2236 = vmatpush.bf16.xpose.msra.mxu1 %v2227_v54 }
 0xa2f   : > { %v2153_v56 = vpop.f32.mrf.mxu2  ;;  %v2166_v57 = vpop.f32.mrf.mxu3 }
 0xa32   : > { %2202 = vrot.lane.b32.xlu2 %v2165_v50, %s4691_s1  ;;  %2185 = vrot.lane.b32.xlu0 %v2152_v24, %s4693_s15 }
 0xa33   : > { %2188 = vrot.lane.b32.xlu1 %v2152_v24, %s4691_s1 }
 0xa34   : > { %3624 = vmatmul.msk.bf16.vlgmr.msra.gmra.mxu1 %vm1219_vm6, %v2191_v58 }
 0xa35   : > { %2368 = vmatpush.bf16.msrb.mxu1 %v2359_v55 }
 0xa84   : > { %v2197_v26 = vpop.permute.xlu2 %2196 }
 0xa85   : > { %v2206_v59 = vpack.c.bf16 %v2197_v26, %v2197_v26 }
 0xa87   : > { %v2246_v60 = vsel %vm1219_vm6, %v2206_v59, 0 }
 0xa88   : > { %2255 = vmatpush.bf16.xpose.msra.mxu2 %v2246_v60 }
 0xa8c   : > { %v2203_v61 = vpop.permute.xlu2 %2202 }
 0xa8d   : > { %v2208_v62 = vpack.c.bf16 %v2203_v61, %v2203_v61 }
 0xa8f   : > { %v2284_v27 = vsel %vm1219_vm6, %v2208_v62, 0 }
 0xa90   : > { %2293 = vmatpush.bf16.xpose.msra.mxu0 %v2284_v27 }
 0xa9c   : > { %v2200_v63 = vpop.permute.xlu0 %2199 }
 0xa9d   : > { %v2207_v0 = vpack.c.bf16 %v2200_v63, %v2200_v63  ;;  %v2183_v1 = vpop.permute.xlu1 %2182 }
 0xa9e   : > { %v2192_v2 = vpack.c.bf16 %v2183_v1, %v2183_v1 }
 0xa9f   : > { %v2265_v3 = vsel %vm1219_vm6, %v2207_v0, 0 }
 0xaa0   : > { %3625 = vmatmul.msk.bf16.vlgmr.msra.gmra.mxu2 %vm1219_vm6, %v2192_v2  ;;  %2274 = vmatpush.bf16.xpose.msrb.mxu3 %v2265_v3 }
 0xaa4   : > { %v2186_v4 = vpop.permute.xlu0 %2185 }
 0xaa5   : > { %v2193_v5 = vpack.c.bf16 %v2186_v4, %v2186_v4  ;;  %v2189_v6 = vpop.permute.xlu1 %2188 }
 0xaa6   : > { %v2194_v7 = vpack.c.bf16 %v2189_v6, %v2189_v6 }
 0xaa7   : > { %3626 = vmatmul.msk.bf16.vlgmr.msrb.gmra.mxu3 %vm1219_vm6, %v2193_v5 }
 0xaa8   : > { %3627 = vmatmul.msk.bf16.vlgmr.msra.gmra.mxu0 %vm1219_vm6, %v2194_v7 }
 0xab1   : > { %v2238_v8 = vpop.f32.mrf.mxu1 }
 0xab2   : > { %v2299_v44 = vmul.f32 0.17677669, %v2238_v8 }
 0xab4   : > { %v2303_v21 = vadd.f32 %v2299_v44, %v5040_v42 }
 0xab6   : > { %v2307_v29 = vsel %vm1304_vm8, %v2303_v21, -inf }
 0xab9   : > { %v2240_v9 = vpop.f32.mrf.mxu1 }
 0xb23   : > { %v2257_v10 = vpop.f32.mrf.mxu2 }
 0xb24   : > { %v2300_v11 = vmul.f32 0.17677669, %v2257_v10 }
 0xb25   : > { %v2295_v12 = vpop.f32.mrf.mxu0 }
 0xb26   : > { %v2302_v13 = vmul.f32 0.17677669, %v2295_v12  ;;  %v2304_v14 = vadd.f32 %v2300_v11, %v5040_v42 }
 0xb28   : > { %v2310_v16 = vsel %vm1304_vm8, %v2304_v14, -inf  ;;  %v2306_v17 = vadd.f32 %v2302_v13, %v5040_v42 }
 0xb29   : > { %2311 = vmax.xlane.f32.xlu0 %v2310_v16 }
 0xb2a   : > { %v2276_v18 = vpop.f32.mrf.mxu3  ;;  %v2316_v19 = vsel %vm1304_vm8, %v2306_v17, -inf }
 0xb2b   : > { %v2259_v20 = vpop.f32.mrf.mxu2  ;;  %v2301_v15 = vmul.f32 0.17677669, %v2276_v18  ;;  %2317 = vmax.xlane.f32.xlu1 %v2316_v19  ;;  %v3908_v19 = vld [vmem:[#allocation14 + $0x78] sm:$0xff] }
 0xb2c   : > { %2512 = vmatpush.bf16.msra.mxu1 %v3908_v19  ;;  %v3907_v20 = vld [vmem:[#allocation14 + $0x70] sm:$0xff] }
 0xb2d   : > { %v2297_v23 = vpop.f32.mrf.mxu0  ;;  %v2305_v25 = vadd.f32 %v2301_v15, %v5040_v42  ;;  %v3906_v15 = vld [vmem:[#allocation14 + $0x68] sm:$0xff] }
 0xb2e   : > { %v3904_v23 = vld [vmem:[#allocation14 + $0x58] sm:$0xff] }
 0xb2f   : > { %v2313_v28 = vsel %vm1304_vm8, %v2305_v25, -inf }
 0xb30   : > { %2314 = vmax.xlane.f32.xlu2 %v2313_v28  ;;  %2513 = vmatpush.bf16.msra.mxu1 %v3907_v20  ;;  %v3902_v28 = vld [vmem:[#allocation14 + $0x48] sm:$0xff]  ;;  %v3677_v20 = vld [vmem:[#allocation20 + $0x98] sm:$0xf0] }
 0xb31   : > { %2308 = vmax.xlane.f32.xlu0 %v2307_v29  ;;  %v3901_v29 = vld [vmem:[#allocation14 + $0x40] sm:$0xff] }
 0xb32   : > { %v2278_v30 = vpop.f32.mrf.mxu3 }
 0xb34   : > { %2514 = vmatpush.bf16.msra.mxu1 %v3906_v15 }
 0xb45   : > { %2210 = vrot.lane.b32.xlu0 %v5136_v47, %s4692_s24 }
 0xb9c   : > { %v2312_v31 = vpop.xlane.xlu0 %2311 }
 0xb9d   : > { %v2320_v34 = vsub.f32 %v2304_v14, %v2312_v31 }
 0xb9e   : > { %v2318_v35 = vpop.xlane.xlu1 %2317 }
 0xb9f   : > { %v2325_v36 = vmul.f32 1.442695, %v2320_v34  ;;  %v2322_v37 = vsub.f32 %v2306_v17, %v2318_v35 }
 0xba1   : > { %4164 = vpow2.f32 %v2325_v36  ;;  %v2329_v38 = vmul.f32 1.442695, %v2322_v37 }
 0xba3   : > { %4166 = vpow2.f32 %v2329_v38  ;;  %v2315_v39 = vpop.xlane.xlu2 %2314 }
 0xba4   : > { %v2321_v42 = vsub.f32 %v2305_v25, %v2315_v39  ;;  %v2309_v40 = vpop.xlane.xlu0 %2308  ;;  %v3903_v25 = vld [vmem:[#allocation14 + $0x50] sm:$0xff]  ;;  %v4130_v39 = vld [vmem:[#allocation16 + $0x1] ss:$0 sm:$0xff] }
 0xba5   : > { %v2319_v43 = vsub.f32 %v2303_v21, %v2309_v40  ;;  %v3905_v21 = vld [vmem:[#allocation14 + $0x60] sm:$0xff] }
 0xba6   : > { %v2327_v32 = vmul.f32 1.442695, %v2321_v42  ;;  %2515 = vmatpush.bf16.msra.mxu1 %v3905_v21  ;;  %v3667_v21 = vld [vmem:[#allocation20 + $0x80] sm:$0xf] }
 0xba7   : > { %v4165_v45 = vpop.eup %4164  ;;  %v2323_v33 = vmul.f32 1.442695, %v2319_v43 }
 0xba8   : > { %4168 = vpow2.f32 %v2327_v32  ;;  %v2334_v46 = vsel %vm1304_vm8, %v4165_v45, 0.0 }
 0xba9   : > { %v4167_v48 = vpop.eup %4166  ;;  %4170 = vpow2.f32 %v2323_v33  ;;  %2335 = vadd.xlane.f32.xlu2 %v2334_v46  ;;  %v3924_v33 = vld [vmem:[#allocation20 + $0xf4] sm:$0xf0]  ;;  %v3923_v46 = vld [vmem:[#allocation20 + $0xf4] sm:$0xf] }
 0xbaa   : > { %v2340_v49 = vsel %vm1304_vm8, %v4167_v48, 0.0  ;;  %2516 = vmatpush.bf16.msra.mxu1 %v3904_v23  ;;  %v3910_v23 = vld [vmem:[#allocation20 + $0x84] sm:$0xf0] }
 0xbab   : > { %2341 = vadd.xlane.f32.xlu1 %v2340_v49  ;;  %v3725_v49 = vld [vmem:[#allocation20 + $0xf8] sm:$0xf0] }
 0xbae   : > { %v4169_v24 = vpop.eup %4168  ;;  %2517 = vmatpush.bf16.msra.mxu1 %v3903_v25  ;;  %v3909_v25 = vld [vmem:[#allocation20 + $0x84] sm:$0xf] }
 0xbaf   : > { %v4171_v50 = vpop.eup %4170  ;;  %v2337_v52 = vsel %vm1304_vm8, %v4169_v24, 0.0 }
 0xbb0   : > { %v2331_v51 = vsel %vm1304_vm8, %v4171_v50, 0.0 }
 0xbb1   : > { %2332 = vadd.xlane.f32.xlu0 %v2331_v51 }
 0xbb2   : > { %2518 = vmatpush.bf16.msra.mxu1 %v3902_v28  ;;  %v3668_v28 = vor.u32 %v3910_v23, %v3667_v21 }
 0xbb3   : > { %2338 = vadd.xlane.f32.xlu1 %v2337_v52 }
 0xbb6   : > { %2519 = vmatpush.bf16.msra.mxu1 %v3901_v29  ;;  %v3669_v29 = vld [vmem:[#allocation20 + $0x88] sm:$0xf0] }
 0xbb7   : > { %v2211_v53 = vpop.permute.xlu0 %2210 }
 0xbb8   : > { %v2220_v54 = vpack.c.bf16 %v2211_v53, %v2211_v53  ;;  %v3715_v53 = vld [vmem:[#allocation20 + $0xe0] sm:$0xf] }
 0xbba   : > { %v2378_v55 = vsel %vm1356_vm5, %v2220_v54, 0  ;;  %v3922_v54 = vld [vmem:[#allocation20 + $0xe4] sm:$0xf0] }
 0xbbb   : > { %2387 = vmatpush.bf16.msrb.mxu2 %v2378_v55  ;;  %v3921_v55 = vld [vmem:[#allocation20 + $0xe4] sm:$0xf] }
 0xbc1   : > { %2213 = vrot.lane.b32.xlu2 %v5136_v47, %s4693_s15 }
 0xbcc   : > { %2216 = vrot.lane.b32.xlu1 %v5136_v47, %s4691_s1 }
 0xc1c   : > { %v2336_v56 = vpop.xlane.xlu2 %2335 }
 0xc1d   : > { %4172 = vrcp.f32 %v2336_v56  ;;  %v3716_v56 = vor.u32 %v3922_v54, %v3715_v53 }
 0xc1e   : > { %v2342_v57 = vpop.xlane.xlu1 %2341 }
 0xc23   : > { %v4173_v58 = vpop.eup %4172 }
 0xc24   : > { %v2348_v26 = vmul.f32 %v4173_v58, %v4165_v45  ;;  %v2214_v59 = vpop.permute.xlu2 %2213  ;;  %v2333_v60 = vpop.xlane.xlu0 %2332  ;;  %v3723_v45 = vld [vmem:[#allocation20 + $0xf0] sm:$0xf] }
 0xc25   : > { %v2221_v61 = vpack.c.bf16 %v2214_v59, %v2214_v59  ;;  %4174 = vrcp.f32 %v2333_v60  ;;  %v3920_v59 = vld [vmem:[#allocation20 + $0xd4] sm:$0xf0]  ;;  %v3919_v60 = vld [vmem:[#allocation20 + $0xd4] sm:$0xf] }
 0xc26   : > { %v2352_v62 = vpack.c.bf16 %v2348_v26, %v2348_v26  ;;  %v2339_v27 = vpop.xlane.xlu1 %2338  ;;  %v3707_v26 = vld [vmem:[#allocation20 + $0xd0] sm:$0xf] }
 0xc27   : > { %v2397_v63 = vsel %vm1356_vm5, %v2221_v61, 0  ;;  %4176 = vrcp.f32 %v2339_v27  ;;  %v3708_v61 = vor.u32 %v3920_v59, %v3707_v26  ;;  %v3930_v59 = vld [vmem:[#allocation22 + $0xa8] sm:$0xff] }
 0xc28   : > { %3629 = vmatmul.msk.bf16.vlgmr.msrb.gmra.mxu2 %vm1304_vm8, %v2352_v62  ;;  %2406 = vmatpush.bf16.msra.mxu3 %v2397_v63  ;;  %4178 = vrcp.f32 %v2342_v57  ;;  %v3717_v57 = vld [vmem:[#allocation20 + $0xe8] sm:$0xf0]  ;;  %v3709_v62 = vld [vmem:[#allocation20 + $0xd8] sm:$0xf0]  ;;  %v3699_v63 = vld [vmem:[#allocation20 + $0xc0] sm:$0xf] }
 0xc29   : > { %v3720_v58 = vor.u32 %v3921_v55, %v3717_v57  ;;  %v3712_v27 = vor.u32 %v3919_v60, %v3709_v62  ;;  %v3931_v55 = vld [vmem:[#allocation22 + $0xb0] sm:$0xff]  ;;  %v3938_v60 = vld [vmem:[#allocation22 + $0xe8] sm:$0xff] }
 0xc2b   : > { %v4175_v0 = vpop.eup %4174 }
 0xc2c   : > { %v2347_v1 = vmul.f32 %v4175_v0, %v4171_v50  ;;  %v3918_v0 = vld [vmem:[#allocation20 + $0xc4] sm:$0xf0] }
 0xc2d   : > { %v4177_v47 = vpop.eup %4176 }
 0xc2e   : > { %v2351_v2 = vpack.c.bf16 %v2347_v1, %v2347_v1  ;;  %v2349_v3 = vmul.f32 %v4177_v47, %v4169_v24  ;;  %v4179_v5 = vpop.eup %4178  ;;  %v3728_v24 = vor.u32 %v3923_v46, %v3725_v49  ;;  %v3917_v1 = vld [vmem:[#allocation20 + $0xc4] sm:$0xf]  ;;  %v3700_v47 = vor.u32 %v3918_v0, %v3699_v63  ;;  %v4132_v46 = vld [vmem:[#allocation19 + $0x1] ss:$0 sm:$0xff] }
 0xc2f   : > { %v2350_v7 = vmul.f32 %v4179_v5, %v4167_v48  ;;  %v3724_v48 = vor.u32 %v3924_v33, %v3723_v45  ;;  %v3916_v5 = vld [vmem:[#allocation20 + $0xb4] sm:$0xf0]  ;;  %v3929_v0 = vld [vmem:[#allocation22 + $0xa0] sm:$0xff] }
 0xc30   : > { %v2353_v4 = vpack.c.bf16 %v2349_v3, %v2349_v3  ;;  %3628 = vmatmul.msk.bf16.vlgmr.msrb.gmra.mxu1 %vm1304_vm8, %v2351_v2  ;;  %2682 = vmatpush.bf16.msrb.mxu3 %v3728_v24  ;;  %v3701_v2 = vld [vmem:[#allocation20 + $0xc8] sm:$0xf0] }
 0xc31   : > { %v2354_v10 = vpack.c.bf16 %v2350_v7, %v2350_v7  ;;  %2669 = vmatpush.bf16.msra.mxu2 %v3724_v48  ;;  %v3704_v3 = vor.u32 %v3917_v1, %v3701_v2  ;;  %v3937_v1 = vld [vmem:[#allocation22 + $0xe0] sm:$0xff] }
 0xc32   : > { %3630 = vmatmul.msk.bf16.vlgmr.msra.gmra.mxu3 %vm1304_vm8, %v2353_v4  ;;  %v3691_v4 = vld [vmem:[#allocation20 + $0xb0] sm:$0xf] }
 0xc33   : > { %v3692_v7 = vor.u32 %v3916_v5, %v3691_v4 }
 0xc34   : > { %2683 = vmatpush.bf16.msrb.mxu3 %v3720_v58 }
 0xc35   : > { %2670 = vmatpush.bf16.msra.mxu2 %v3716_v56  ;;  %v3939_v56 = vld [vmem:[#allocation22 + $0xf0] sm:$0xff] }
 0xc38   : > { %2684 = vmatpush.bf16.msrb.mxu3 %v3712_v27 }
 0xc39   : > { %2671 = vmatpush.bf16.msra.mxu2 %v3708_v61 }
 0xc3c   : > { %2685 = vmatpush.bf16.msrb.mxu3 %v3704_v3 }
 0xc3d   : > { %2672 = vmatpush.bf16.msra.mxu2 %v3700_v47 }
 0xc3e   : > { %v2217_v6 = vpop.permute.xlu1 %2216 }
 0xc3f   : > { %v2222_v8 = vpack.c.bf16 %v2217_v6, %v2217_v6  ;;  %v3915_v6 = vld [vmem:[#allocation20 + $0xb4] sm:$0xf] }
 0xc41   : > { %v2416_v9 = vsel %vm1356_vm5, %v2222_v8, 0  ;;  %v3693_v8 = vld [vmem:[#allocation20 + $0xb8] sm:$0xf0]  ;;  %2673 = vmatpush.bf16.msra.mxu2 %v3692_v7 }
 0xc42   : > { %2425 = vmatpush.bf16.msrb.mxu0 %v2416_v9  ;;  %v3696_v9 = vor.u32 %v3915_v6, %v3693_v8 }
 0xc44   : > { %2686 = vmatpush.bf16.msrb.mxu3 %v3696_v9  ;;  %v3928_v9 = vld [vmem:[#allocation22 + $0x98] sm:$0xff] }
 0xc45   : > { %3631 = vmatmul.msk.bf16.vlgmr.msrb.gmra.mxu0 %vm1304_vm8, %v2354_v10  ;;  %v3683_v10 = vld [vmem:[#allocation20 + $0xa0] sm:$0xf] }
 0xcab   : > { %v2389_v11 = vpop.f32.mrf.mxu2 }
 0xcac   : > { %2432 = vrot.lane.b32.xlu2 %v2389_v11, %s4691_s1  ;;  %v3914_v11 = vld [vmem:[#allocation20 + $0xa4] sm:$0xf0] }
 0xcad   : > { %v2370_v12 = vpop.f32.mrf.mxu1 }
 0xcb3   : > { %v2391_v13 = vpop.f32.mrf.mxu2 }
 0xcb4   : > { %v3684_v13 = vor.u32 %v3914_v11, %v3683_v10  ;;  %v3936_v10 = vld [vmem:[#allocation22 + $0xd8] sm:$0xff] }
 0xcb5   : > { %v2372_v14 = vpop.f32.mrf.mxu1  ;;  %v2408_v44 = vpop.f32.mrf.mxu3 }
 0xcb6   : > { %2436 = vrot.lane.b32.xlu2 %v2408_v44, %s4693_s15  ;;  %v3685_v14 = vld [vmem:[#allocation20 + $0xa8] sm:$0xf0]  ;;  %2674 = vmatpush.bf16.msra.mxu2 %v3684_v13  ;;  %s3211_s15 = sshll.u32 %s4972_s2, 2 }
 0xcb7   : > { %s787_s9 = scalar_lea.vmem [#allocation23], %s3211_s15 }
 0xcb8   : > { %s2992_s21 = sshll.u32 %s787_s9, 4  ;;  %s2993_s21 = int_to_ptr.vmem [resolvable:$true] %s2992_s21 }
 0xcbd   : > { %v2410_v16 = vpop.f32.mrf.mxu3 }
 0xcbe   : > { %v3675_v16 = vld [vmem:[#allocation20 + $0x90] sm:$0xf] }
 0xcc2   : > { %v2427_v17 = vpop.f32.mrf.mxu0 }
 0xcc3   : > { %2440 = vrot.lane.b32.xlu1 %v2427_v17, %s4692_s24  ;;  %v3912_v17 = vld [vmem:[#allocation20 + $0x94] sm:$0xf0]  ;;  %s5349_s24 = sld [smem:[#allocation48_spill]] }
 0xcc4   : > { %v3676_v19 = vor.u32 %v3912_v17, %v3675_v16 }
 0xcc6   : > { %2675 = vmatpush.bf16.msra.mxu2 %v3676_v19  ;;  %v3935_v19 = vld [vmem:[#allocation22 + $0xd0] sm:$0xff] }
 0xcc9   : > { %s2990_s8 = scalar_lea.hbm %s5349_s24, %s3797_s3  ;;  %s4598_s3 = scalar_lea.hbm %s5349_s24, 8 }
 0xcca   : > { %v2429_v18 = vpop.f32.mrf.mxu0  ;;  %2676 = vmatpush.bf16.msra.mxu2 %v3668_v28  ;;  %s2994_s10 = sshll.u32 %s2990_s8, 4  ;;  %s2995_s10 = int_to_ptr.hbm [resolvable:$true] %s2994_s10 }
 0xccb   : > { %v3911_v18 = vld [vmem:[#allocation20 + $0x94] sm:$0xf]  ;;  %s4592_s0 = sshra.s32 %s2995_s10, 4  ;;  %s4593_s0 = int_to_ptr.hbm [resolvable:$true] %s4592_s0 }
 0xccc   : > { %v3680_v15 = vor.u32 %v3911_v18, %v3677_v20  ;;  %v3927_v18 = vld [vmem:[#allocation22 + $0x90] sm:$0xff]  ;;  %p4599_p12 = scmp.lt.s32.totalorder %s4593_s0, %s5349_s24 }
 0xd06   : > { %v2433_v30 = vpop.permute.xlu2 %2432 }
 0xd07   : > { %v2443_v34 = vsel %vm1219_vm6, %v2370_v12, %v2433_v30  ;;  %v3913_v12 = vld [vmem:[#allocation20 + $0xa4] sm:$0xf]  ;;  %v3672_v30 = vor.u32 %v3909_v25, %v3669_v29  ;;  %v3926_v29 = vld [vmem:[#allocation22 + $0x88] sm:$0xff] }
 0xd08   : > { %v3688_v44 = vor.u32 %v3913_v12, %v3685_v14 }
 0xd0a   : > { %2687 = vmatpush.bf16.msrb.mxu3 %v3688_v44 }
 0xd0e   : > { %2688 = vmatpush.bf16.msrb.mxu3 %v3680_v15 }
 0xd10   : > { %v2437_v31 = vpop.permute.xlu2 %2436 }
 0xd11   : > { %v2444_v35 = vsel %vm896_vm0, %v2443_v34, %v2437_v31 }
 0xd12   : > { %2689 = vmatpush.bf16.msrb.mxu3 %v3672_v30  ;;  %v3934_v30 = vld [vmem:[#allocation22 + $0xc8] sm:$0xff] }
 0xd35   : > { %v2441_v36 = vpop.permute.xlu1 %2440 }
 0xd36   : > { %v2445_v37 = vsel %vm1444_vm9, %v2444_v35, %v2441_v36 }
 0xd37   : > { %v2446_v38 = vpack.c.bf16 %v2445_v37, %v2445_v37 }
 0xd39   : > { %2520 = vmatmul.bf16.vlgmr.msra.gmra.mxu1 %v2446_v38 }
 0xdb6   : > { %v2521_v42 = vpop.f32.mrf.mxu1 }
 0xdb7   : > { %v2525_v40 = vadd.f32 %v2521_v42, %v5122_v22 }
 0xdb9   : > { %v5187_v43 = vadd.f32 %v4130_v39, %v2525_v40 }
 0xdbb   : > { %2536 = vadd.xlane.f32.xlu2 %v5187_v43 }
 0xdbe   : > { %v2523_v32 = vpop.f32.mrf.mxu1 }
 0xdbf   : > { %v4131_v32 = vld [vmem:[#allocation17 + $0x1] ss:$0 sm:$0xff] }
 0xe2e   : > { %v2537_v50 = vpop.xlane.xlu2 %2536 }
 0xe2f   : > { %v2538_v51 = vmul.f32 %v2537_v50, %v5008_v41  ;;  %v3932_v50 = vld [vmem:[#allocation22 + $0xb8] sm:$0xff] }
 0xe30   : > { %2914 = vmatpush.bf16.msra.mxu0 %v3932_v50 }
 0xe31   : > { %v5192_v52 = vsub.f32 %v5187_v43, %v2538_v51  ;;  %v3940_v51 = vld [vmem:[#allocation22 + $0xf8] sm:$0xff] }
 0xe32   : > { %2927 = vmatpush.bf16.msrb.mxu1 %v3940_v51 }
 0xe33   : > { %v2540_v22 = vmul.f32 %v5192_v52, %v5192_v52 }
 0xe34   : > { %2915 = vmatpush.bf16.msra.mxu0 %v3931_v55 }
 0xe35   : > { %2541 = vadd.xlane.f32.xlu1 %v2540_v22  ;;  %v3664_v22 = vld [vmem:[%s5345_s18 + $0x2] sm:$0x3] }
 0xe36   : > { %v2585_v53 = vperm.slane %v3664_v22, 0  ;;  %v2586_v54 = vperm.slane %v3664_v22, 1  ;;  %2928 = vmatpush.bf16.msrb.mxu1 %v3939_v56 }
 0xe38   : > { %2916 = vmatpush.bf16.msra.mxu0 %v3930_v59 }
 0xe3a   : > { %2929 = vmatpush.bf16.msrb.mxu1 %v3938_v60 }
 0xe3c   : > { %2917 = vmatpush.bf16.msra.mxu0 %v3929_v0 }
 0xe3e   : > { %2930 = vmatpush.bf16.msrb.mxu1 %v3937_v1 }
 0xe40   : > { %2918 = vmatpush.bf16.msra.mxu0 %v3928_v9 }
 0xe42   : > { %2931 = vmatpush.bf16.msrb.mxu1 %v3936_v10 }
 0xe44   : > { %2919 = vmatpush.bf16.msra.mxu0 %v3927_v18 }
 0xe46   : > { %2932 = vmatpush.bf16.msrb.mxu1 %v3935_v19 }
 0xe48   : > { %2920 = vmatpush.bf16.msra.mxu0 %v3926_v29 }
 0xe4a   : > { %2933 = vmatpush.bf16.msrb.mxu1 %v3934_v30 }
 0xea8   : > { %v2542_v31 = vpop.xlane.xlu1 %2541 }
 0xea9   : > { %v2543_v34 = vmul.f32 %v2542_v31, %v5008_v41 }
 0xeab   : > { %v2544_v35 = vadd.f32 1e-06, %v2543_v34 }
 0xead   : > { %4180 = vrsqrt.f32 %v2544_v35  ;;  %vm2551_vm5 = vweird.f32 %v2544_v35 }
 0xeb3   : > { %v4181_v36 = vpop.eup %4180 }
 0xeb4   : > { %v2546_v37 = vmul.f32 %v4181_v36, %v2544_v35  ;;  %vm2552_vm0 = vweird.f32 %v4181_v36 }
 0xeb5   : > { %vm2553_vm6 = vmor %vm2551_vm5, %vm2552_vm0 }
 0xeb6   : > { %v2547_v38 = vmul.f32 %v4181_v36, %v2546_v37 }
 0xeb8   : > { %v2548_v39 = vmul.f32 0.5, %v2547_v38 }
 0xeba   : > { %v2549_v42 = vsub.f32 1.5, %v2548_v39  ;;  %v3925_v39 = vld [vmem:[#allocation22 + $0x80] sm:$0xff] }
 0xebb   : > { %2921 = vmatpush.bf16.msra.mxu0 %v3925_v39 }
 0xebc   : > { %v2550_v40 = vmul.f32 %v4181_v36, %v2549_v42  ;;  %v3933_v42 = vld [vmem:[#allocation22 + $0xc0] sm:$0xff] }
 0xebd   : > { %2934 = vmatpush.bf16.msrb.mxu1 %v3933_v42 }
 0xebe   : > { %v2554_v45 = vsel %vm2553_vm6, %v4181_v36, %v2550_v40 }
 0xebf   : > { %v2555_v33 = vmul.f32 %v2554_v45, %v5192_v52 }
 0xec1   : > { %v2559_v48 = vmul.f32 %v4131_v32, %v2555_v33 }
 0xec3   : > { %v2563_v49 = vadd.f32 %v4132_v46, %v2559_v48 }
 0xec5   : > { %v2564_v24 = vpack.c.bf16 %v2563_v49, %v2563_v49 }
 0xec7   : > { %2677 = vmatmul.bf16.vlgmr.msra.gmra.mxu2 %v2564_v24  ;;  %2690 = vmatmul.bf16.vlgmr.msrb.gmra.mxu3 %v2564_v24 }
 0xf4a   : > { %v2678_v52 = vpop.f32.mrf.mxu2  ;;  %v2691_v57 = vpop.f32.mrf.mxu3 }
 0xf4b   : > { %v5201_v58 = vadd.f32 %v2678_v52, %v2585_v53  ;;  %v5203_v26 = vadd.f32 %v2691_v57, %v2586_v54 }
 0xf4d   : > { %v5206_v61 = vmul.f32 0.70710677, %v5201_v58  ;;  %v5209_v62 = vmul.f32 0.70710677, %v5203_v26 }
 0xf4f   : > { %v2699_v27 = vmul.f32 %v5206_v61, %v5206_v61  ;;  %v2739_v63 = vmul.f32 %v5209_v62, %v5209_v62 }
 0xf51   : > { %v2700_v47 = vmin.f32 %v2699_v27, 16.0  ;;  %v5215_v2 = vmin.f32 %v2739_v63, 16.0 }
 0xf52   : > { %v2680_v3 = vpop.f32.mrf.mxu2  ;;  %v2693_v4 = vpop.f32.mrf.mxu3 }
 0xf53   : > { %v2701_v5 = vmul.f32 2.1237322e-06, %v2700_v47  ;;  %v2712_v6 = vmul.f32 3.8918573e-05, %v2700_v47  ;;  %v2741_v7 = vmul.f32 2.1237322e-06, %v5215_v2 }
 0xf54   : > { %v2752_v8 = vmul.f32 3.8918573e-05, %v5215_v2 }
 0xf55   : > { %v2702_v11 = vadd.f32 0.00028619796, %v2701_v5  ;;  %v2713_v12 = vadd.f32 0.001143296, %v2712_v6  ;;  %v2742_v13 = vadd.f32 0.00028619796, %v2741_v7 }
 0xf56   : > { %v2753_v14 = vadd.f32 0.001143296, %v2752_v8 }
 0xf57   : > { %v2703_v44 = vmul.f32 %v2702_v11, %v2700_v47  ;;  %v2714_v16 = vmul.f32 %v2713_v12, %v2700_v47  ;;  %v2743_v17 = vmul.f32 %v2742_v13, %v5215_v2 }
 0xf58   : > { %v2754_v20 = vmul.f32 %v2753_v14, %v5215_v2 }
 0xf59   : > { %v2704_v15 = vadd.f32 0.0036580483, %v2703_v44  ;;  %v2715_v21 = vadd.f32 0.014752088, %v2714_v16  ;;  %v2744_v28 = vadd.f32 0.0036580483, %v2743_v17 }
 0xf5a   : > { %v2755_v23 = vadd.f32 0.014752088, %v2754_v20 }
 0xf5b   : > { %v2716_v25 = vmul.f32 %v2715_v21, %v2700_v47  ;;  %v2705_v34 = vmul.f32 %v2704_v15, %v2700_v47  ;;  %v2745_v38 = vmul.f32 %v2744_v28, %v5215_v2  ;;  %v2695_v15 = vmul.f32 0.5, %v5201_v58 }
 0xf5c   : > { %v2756_v31 = vmul.f32 %v2755_v23, %v5215_v2  ;;  %v2696_v23 = vmul.f32 0.5, %v5203_v26 }
 0xf5d   : > { %v2717_v35 = vadd.f32 0.112945676, %v2716_v25  ;;  %v2706_v32 = vadd.f32 0.05243302, %v2705_v34  ;;  %v2746_v48 = vadd.f32 0.05243302, %v2745_v38 }
 0xf5e   : > { %v2757_v36 = vadd.f32 0.112945676, %v2756_v31 }
 0xf5f   : > { %v2718_v37 = vmul.f32 %v2717_v35, %v2700_v47  ;;  %v2707_v24 = vmul.f32 %v2706_v32, %v2700_v47  ;;  %v2747_v22 = vmul.f32 %v2746_v48, %v5215_v2  ;;  %v4133_v35 = vld [vmem:[%s5346_s23 + $0x1] ss:$0 sm:$0xff] }
 0xf60   : > { %v2758_v40 = vmul.f32 %v2757_v36, %v5215_v2 }
 0xf61   : > { %v2719_v45 = vadd.f32 0.4994258, %v2718_v37  ;;  %v2708_v53 = vadd.f32 0.18741608, %v2707_v24  ;;  %v2748_v54 = vadd.f32 0.18741608, %v2747_v22 }
 0xf62   : > { %v2759_v33 = vadd.f32 0.4994258, %v2758_v40 }
 0xf63   : > { %v2720_v46 = vmul.f32 %v2719_v45, %v2700_v47  ;;  %v2709_v56 = vmul.f32 %v2708_v53, %v2700_v47  ;;  %v2749_v59 = vmul.f32 %v2748_v54, %v5215_v2  ;;  %v4135_v53 = vld [vmem:[%s5348_s4] ss:$0 sm:$0xff] }
 0xf64   : > { %v2760_v49 = vmul.f32 %v2759_v33, %v5215_v2 }
 0xf65   : > { %v2721_v50 = vadd.f32 1.0, %v2720_v46  ;;  %v2710_v63 = vadd.f32 1.1283791, %v2709_v56  ;;  %v2750_v6 = vadd.f32 1.1283791, %v2749_v59 }
 0xf66   : > { %v2761_v51 = vadd.f32 1.0, %v2760_v49 }
 0xf67   : > { %4182 = vrcp.f32 %v2721_v50  ;;  %v2733_v0 = vand.u32 2147483648, %v2721_v50  ;;  %v2731_v4 = vand.u32 2147483647, %v2721_v50  ;;  %vm2727_vm13 = vweird.f32 %v2721_v50 }
 0xf68   : > { %4184 = vrcp.f32 %v2761_v51  ;;  %v2773_v5 = vand.u32 2147483648, %v2761_v51  ;;  %v2771_v8 = vand.u32 2147483647, %v2761_v51  ;;  %vm2767_vm15 = vweird.f32 %v2761_v51 }
 0xf69   : > { %v2734_v47 = vor.u32 1.1754944e-38, %v2733_v0  ;;  %v2711_v2 = vmul.f32 %v2710_v63, %v5206_v61  ;;  %vm2732_vm1 = vcmp.eq.f32.partialorder %v2731_v4, 8.507059e+37  ;;  %v2751_v14 = vmul.f32 %v2750_v6, %v5209_v62 }
 0xf6a   : > { %v2774_v12 = vor.u32 1.1754944e-38, %v2773_v5  ;;  %vm2772_vm3 = vcmp.eq.f32.partialorder %v2771_v8, 8.507059e+37 }
 0xf6d   : > { %v4183_v55 = vpop.eup %4182 }
 0xf6e   : > { %v4185_v52 = vpop.eup %4184  ;;  %v2723_v57 = vmul.f32 %v4183_v55, %v2721_v50  ;;  %vm2728_vm8 = vweird.f32 %v4183_v55 }
 0xf6f   : > { %v2763_v60 = vmul.f32 %v4185_v52, %v2761_v51  ;;  %vm2768_vm9 = vweird.f32 %v4185_v52  ;;  %vm2729_vm14 = vmor %vm2727_vm13, %vm2728_vm8  ;;  %v4134_v51 = vld [vmem:[%s5347_s16] ss:$0 sm:$0xff]  ;;  %s4594_s16 = scalar_lea.hbm %s4593_s0, 4 }
 0xf70   : > { %v2724_v27 = vsub.f32 1.0, %v2723_v57  ;;  %vm2769_vm2 = vmor %vm2767_vm15, %vm2768_vm9  ;;  %p4595_p1 = scmp.ne.s32.totalorder %s4593_s0, %s4594_s16  ;;  %p4600_p7 = scmp.lt.s32.totalorder %s4598_s3, %s4594_s16 }
 0xf71   : > { %v2764_v1 = vsub.f32 1.0, %v2763_v60 }
 0xf72   : > { %v2725_v3 = vmul.f32 %v4183_v55, %v2724_v27  ;;  %p4596_p3 = pnand %p4595_p1, %p4941_p4  ;;  %p4601_p8 = por %p4600_p7, %p4599_p12 }
 0xf73   : > { %v2765_v7 = vmul.f32 %v4185_v52, %v2764_v1 }
 0xf74   : > { %v2726_v9 = vadd.f32 %v4183_v55, %v2725_v3  ;;  %p4597_p5 = pneg %p4596_p3 }
 0xf75   : > { %v2766_v10 = vadd.f32 %v4185_v52, %v2765_v7 }
 0xf76   : > { %v2730_v11 = vsel %vm2729_vm14, %v4183_v55, %v2726_v9  ;;  %p4602_p9 = pnand %p4601_p8, %p4597_p5 }
 0xf77   : > { %v2735_v13 = vsel %vm2732_vm1, %v2734_v47, %v2730_v11  ;;  %v2770_v44 = vsel %vm2769_vm2, %v4185_v52, %v2766_v10 }
 0xf78   : > { %v2736_v16 = vmul.f32 %v2735_v13, %v2711_v2  ;;  %v2775_v17 = vsel %vm2772_vm3, %v2774_v12, %v2770_v44 }
 0xf79   : > { %v2776_v18 = vmul.f32 %v2775_v17, %v2751_v14 }
 0xf7a   : > { %v3729_v19 = vclamps-f32 %v2736_v16, 1.0 }
 0xf7b   : > { %v3730_v20 = vclamps-f32 %v2776_v18, 1.0 }
 0xf7c   : > { %v2779_v21 = vadd.f32 1.0, %v3729_v19 }
 0xf7d   : > { %v2780_v61 = vadd.f32 1.0, %v3730_v20 }
 0xf7e   : > { %v2781_v25 = vmul.f32 %v2779_v21, %v2695_v15 }
 0xf7f   : > { %v2782_v28 = vmul.f32 %v2780_v61, %v2696_v23 }
 0xf80   : > { %v2783_v29 = vpack.c.bf16 %v2781_v25, %v2781_v25 }
 0xf81   : > { %v2784_v30 = vpack.c.bf16 %v2782_v28, %v2782_v28 }
 0xf82   : > { %2922 = vmatmul.bf16.vlgmr.msra.gmra.mxu0 %v2783_v29 }
 0xf83   : > { %2935 = vmatmul.bf16.vlgmr.msrb.gmra.mxu1 %v2784_v30 }
 0xfff   : > { %v2923_v62 = vpop.f32.mrf.mxu0 }
0x1000   : > { %v2936_v31 = vpop.f32.mrf.mxu1 }
0x1001   : > { %v2937_v34 = vadd.f32 %v2936_v31, %v2923_v62 }
0x1003   : > { %v2940_v36 = vadd.f32 %v2937_v34, %v5187_v43 }
0x1005   : > { %v2946_v58 = vadd.f32 %v4133_v35, %v2940_v36 }
0x1007   : > { %2949 = vadd.xlane.f32.xlu0 %v2946_v58  ;;  %v2925_v37 = vpop.f32.mrf.mxu0 }
0x1008   : > { %v2938_v26 = vpop.f32.mrf.mxu1 }
0x107a   : > { %v2950_v38 = vpop.xlane.xlu0 %2949 }
0x107b   : > { %v2951_v39 = vmul.f32 %v2950_v38, %v5008_v41 }
0x107d   : > { %v2952_v42 = vsub.f32 %v2946_v58, %v2951_v39 }
0x107f   : > { %v2953_v40 = vmul.f32 %v2952_v42, %v2952_v42 }
0x1081   : > { %2954 = vadd.xlane.f32.xlu0 %v2953_v40 }
0x10f4   : > { %v2955_v32 = vpop.xlane.xlu0 %2954 }
0x10f5   : > { %v2956_v45 = vmul.f32 %v2955_v32, %v5008_v41 }
0x10f7   : > { %v2957_v33 = vadd.f32 1e-06, %v2956_v45 }
0x10f9   : > { %4186 = vrsqrt.f32 %v2957_v33  ;;  %vm2964_vm7 = vweird.f32 %v2957_v33 }
0x10ff   : > { %v4187_v46 = vpop.eup %4186 }
0x1100   : > { %v2959_v48 = vmul.f32 %v4187_v46, %v2957_v33  ;;  %vm2965_vm4 = vweird.f32 %v4187_v46 }
0x1101   : > { %vm2966_vm10 = vmor %vm2964_vm7, %vm2965_vm4 }
0x1102   : > { %v2960_v43 = vmul.f32 %v4187_v46, %v2959_v48 }
0x1104   : > { %v2961_v49 = vmul.f32 0.5, %v2960_v43 }
0x1106   : > { %v2962_v24 = vsub.f32 1.5, %v2961_v49 }
0x1108   : > { %v2963_v50 = vmul.f32 %v4187_v46, %v2962_v24 }
0x110a   : > { %v2967_v22 = vsel %vm2966_vm10, %v4187_v46, %v2963_v50 }
0x110b   : > { %v2968_v41 = vmul.f32 %v2967_v22, %v2952_v42 }
0x110d   : > { %v2972_v54 = vmul.f32 %v4134_v51, %v2968_v41 }
0x110f   : > { %v2976_v55 = vadd.f32 %v4135_v53, %v2972_v54 }
0x1111   : > { %v2977_v56 = vpack.c.bf16 %v2976_v55, %v2976_v55 }
0x1113   : > { %2978 = vst [vmem:[%s787_s9] sm:$0xf] %v2977_v56 }
0x1114   : > { %4605 = shalt.err (!%p4602_p9)
}
0x1115   : > { %3991 = dma.vmem_to_hbm [thread:$0]  (%p4941_p4), %s2993_s21, 64, %s2995_s10, %s2980_s5  }
0x1116 PF: > { %s3006_s8 = sand.u32 1, %s4656_s27   ;;  %p5350_p10 = scmp.ge.s32.totalorder %s4668_s30, 2 }
0x1117   : > { %s3007_s9 = scalar_lea.sflag [#allocation4], %s3006_s8 }
0x1118   : > { %p4035_p13 = pnand %p5350_p10, %p4945_p6 }
0x111a   : > { %p4036_p11 = pneg %p4035_p13 }
0x111c   : > { %4651 = dma.done.wait (%p4036_p11), %s3007_s9, 64  }
0x111d   : > { %4653 = vsyncadd (%p4036_p11), %s3007_s9, 4294967232  ;;  %p37_p0 = scmp.ge.s32.totalorder %s4915_s7, 4   ;;  %s5351_s27 = smov %s4660_s28 }
0x111e   : > { %s5352_s28 = smov %s4664_s29  ;;  %s5353_s29 = smov %s4926_s22 }
0x111f   : > { %s5354_s30 = smov %s4915_s7  ;;  %39 = sbr.rel (!%p37_p0) target bundleno = 28 (0x1c), region = 197 }
0x1124   :  { %3013 = vsyncpa [#allocation3], 1 }
0x1125   :  { %3015 = vsyncpa [#allocation3 + $0x1], 1 }
0x1126   :  { %3016 = vsyncpa [#allocation6], 1 }
0x1127   :  { %3017 = vsyncpa [#allocation9], 1 }
0x1128   :  { %3018 = vsyncpa [#allocation12], 1 }
0x1129   :  { %3019 = vsyncpa [#allocation15], 1 }
0x112a   :  { %3020 = vsyncpa [#allocation18], 1 }
0x112b   :  { %3021 = vsyncpa [#allocation21], 1 }
0x112c   :  { %3022 = vsyncpa [#allocation4], 1 }
0x112d   :  { %3024 = vsyncpa [#allocation4 + $0x1], 1 }

</bundles_post_ra>
